<compile_context>
chip_gen: v7x
topology: tpu7x:2x2x1
jax: 0.10.0
libtpu: 0.0.40
codegen_flags: <defaults>
</compile_context>

<pallas_src>
import jax
import jax.numpy as jnp
import numpy as np
from jax.experimental import pallas as pl
from jax.experimental.pallas import tpu as pltpu


# ----------------------------- Pallas kernel -----------------------------

def bigru_text_kernel(x_ref, len_ref, wih_ref, bx_ref,
                      whh_f_ref, bhhn_f_ref, whh_b_ref, bhhn_b_ref,
                      out_ref, xpf_scr, xpb_scr, hb_scr):
    L, Bt, Dp = x_ref.shape
    Hp = whh_f_ref.shape[0]
    H3 = 3 * Hp

    # ---- hoisted input projection: one big MXU matmul instead of 2*L tiny ones ----
    # x bf16, weights bf16, f32 accumulate.  Biases (b_hh_r / b_hh_z pre-folded) added once.
    x2d = x_ref[...].reshape(L * Bt, Dp)
    xp = jnp.dot(x2d, wih_ref[...], preferred_element_type=jnp.float32)    # (L*Bt, 6Hp)
    xp = xp + bx_ref[...]
    xp = xp.reshape(L, Bt, 2 * H3)
    xpf_scr[...] = xp[:, :, :H3]                                           # lane-aligned split
    xpb_scr[...] = xp[:, :, H3:]

    # hoist weight loads / bias broadcasts / length load out of the recurrence
    # (JAX does not CSE broadcast_in_dim).
    whh_f = whh_f_ref[...]                                                 # (Hp, 3Hp) bf16
    whh_b = whh_b_ref[...]
    bhhn_f = jnp.broadcast_to(bhhn_f_ref[...], (Bt, Hp))                   # (Bt, Hp) f32
    bhhn_b = jnp.broadcast_to(bhhn_b_ref[...], (Bt, Hp))
    lens = len_ref[...]                                                    # (Bt, 1) int32
    zero = jnp.zeros((Bt, Hp), jnp.float32)

    def gru_step(xp_t, h, whh, bhh_n):
        # PyTorch GRU gate order [r, z, n]; xp_t already contains b_ih (+ b_hh for r, z).
        hp = jnp.dot(h.astype(jnp.bfloat16), whh,
                     preferred_element_type=jnp.float32)                   # (Bt, 3Hp)
        r = jax.nn.sigmoid(xp_t[:, 0:Hp] + hp[:, 0:Hp])
        z = jax.nn.sigmoid(xp_t[:, Hp:2 * Hp] + hp[:, Hp:2 * Hp])
        n = jnp.tanh(xp_t[:, 2 * Hp:3 * Hp] + r * (hp[:, 2 * Hp:3 * Hp] + bhh_n))
        return (1.0 - z) * n + z * h

    # ---- fused forward/backward recurrence: fwd at t=i, bwd at t=L-1-i in one body ----
    def body(i, carry):
        hf, hb = carry
        tf = i
        tb = L - 1 - i

        mf = lens > tf                                                     # (Bt, 1) bool
        hf_cand = gru_step(xpf_scr[tf], hf, whh_f, bhhn_f)
        hf_new = jnp.where(mf, hf_cand, hf)                                # freeze h past seq end
        out_ref[tf] = jnp.where(mf, hf_new, zero)                          # padded positions -> 0

        mb = lens > tb
        hb_cand = gru_step(xpb_scr[tb], hb, whh_b, bhhn_b)
        hb_new = jnp.where(mb, hb_cand, hb)                                # stays 0 until t=len-1
        hb_scr[tb] = jnp.where(mb, hb_new, zero)
        return hf_new, hb_new

    jax.lax.fori_loop(0, L, body, (zero, zero), unroll=True)

    # ---- bi-GRU merge + l2norm (vectorised epilogue; padded lanes are exactly zero) ----
    avg = (out_ref[...] + hb_scr[...]) * 0.5                               # (L, Bt, Hp)
    norm = jnp.sqrt(jnp.sum(avg * avg, axis=-1, keepdims=True)) + 1e-8
    out_ref[...] = avg * pl.reciprocal(norm, approx=True)


# ----------------------------- wrapper / glue -----------------------------

def _round_up(x, m):
    return (x + m - 1) // m * m


def _pad_gate_cols(w, Hp):
    """(rows, 3H) -> (rows, 3Hp): zero-pad each gate block to Hp lanes (keeps gate boundaries
    at multiples of 128)."""
    rows, threeH = w.shape
    H = threeH // 3
    w3 = w.reshape(rows, 3, H)
    w3 = jnp.pad(w3, ((0, 0), (0, 0), (0, Hp - H)))
    return w3.reshape(rows, 3 * Hp)


def _prep_dir(wih, whh, bih, bhh, Dp, Hp):
    """Pad one GRU direction to lane-dense layout and pre-fold biases:
       bx = [b_ih_r + b_hh_r, b_ih_z + b_hh_z, b_ih_n]; b_hh_n kept separate (inside r*(...))."""
    D, threeH = wih.shape
    H = threeH // 3
    wih_p = jnp.pad(_pad_gate_cols(wih, Hp), ((0, Dp - D), (0, 0)))        # (Dp, 3Hp)
    whh_p = jnp.pad(_pad_gate_cols(whh, Hp), ((0, Hp - H), (0, 0)))        # (Hp, 3Hp)
    bih3 = bih.reshape(3, H)
    bhh3 = bhh.reshape(3, H)
    bx = jnp.concatenate([bih3[0] + bhh3[0],
                          bih3[1] + bhh3[1],
                          bih3[2]]).reshape(1, 3 * H)
    bx_p = _pad_gate_cols(bx, Hp)                                          # (1, 3Hp)
    bhh_n = jnp.pad(bhh3[2].reshape(1, H), ((0, 0), (0, Hp - H)))          # (1, Hp)
    return wih_p, whh_p, bx_p, bhh_n


@jax.jit
def encoder_text_forward(params, captions, lengths):
    """captions: (B, L) int32, lengths: (B,) int32 (sorted descending). Returns (B, L, H)."""
    # Embedding lookup (plain JAX gather); Dropout(p=0.4) is identity in eval mode.
    cap_emb = jnp.take(params["embed"], captions, axis=0).astype(jnp.float32)   # (B, L, D)
    B, L, D = cap_emb.shape
    H = params["whh_f"].shape[0]

    LANE, SUB = 128, 8
    Hp = _round_up(H, LANE)
    Dp = _round_up(D, LANE)
    B_tile = min(64, _round_up(B, SUB))
    B_pad = _round_up(B, B_tile)

    # weights: per-gate pad to Hp lanes, fold r/z hidden biases, concat directions for one big
    # input-projection matmul; matmul operands -> bf16 (f32 accumulate in kernel).
    wih_f, whh_f, bx_f, bhhn_f = _prep_dir(params["wih_f"], params["whh_f"],
                                           params["bih_f"], params["bhh_f"], Dp, Hp)
    wih_b, whh_b, bx_b, bhhn_b = _prep_dir(params["wih_b"], params["whh_b"],
                                           params["bih_b"], params["bhh_b"], Dp, Hp)
    wih_cat = jnp.concatenate([wih_f, wih_b], axis=1).astype(jnp.bfloat16)      # (Dp, 6Hp)
    bx_cat = jnp.concatenate([bx_f, bx_b], axis=1)                              # (1, 6Hp) f32
    whh_f = whh_f.astype(jnp.bfloat16)
    whh_b = whh_b.astype(jnp.bfloat16)

    # inputs: pad batch to sublane multiple, feature dim to lane multiple; time-major; bf16.
    x = jnp.pad(cap_emb, ((0, B_pad - B), (0, 0), (0, Dp - D)))
    x = jnp.transpose(x, (1, 0, 2)).astype(jnp.bfloat16)                        # (L, B_pad, Dp)

    len_col = jnp.pad(lengths.astype(jnp.int32), (0, B_pad - B))                # fake rows -> len 0
    len_col = len_col.reshape(B_pad, 1)                                         # (B_pad, 1)

    grid = (B_pad // B_tile,)
    out_lm = pl.pallas_call(
        bigru_text_kernel,
        out_shape=jax.ShapeDtypeStruct((L, B_pad, Hp), jnp.float32),
        grid=grid,
        in_specs=[
            pl.BlockSpec((L, B_tile, Dp), lambda b: (0, b, 0)),      # x (time-major)
            pl.BlockSpec((B_tile, 1), lambda b: (b, 0)),             # per-example lengths
            pl.BlockSpec((Dp, 6 * Hp), lambda b: (0, 0)),            # wih (both dirs)
            pl.BlockSpec((1, 6 * Hp), lambda b: (0, 0)),             # folded input biases
            pl.BlockSpec((Hp, 3 * Hp), lambda b: (0, 0)),            # whh fwd
            pl.BlockSpec((1, Hp), lambda b: (0, 0)),                 # bhh_n fwd
            pl.BlockSpec((Hp, 3 * Hp), lambda b: (0, 0)),            # whh bwd
            pl.BlockSpec((1, Hp), lambda b: (0, 0)),                 # bhh_n bwd
        ],
        out_specs=pl.BlockSpec((L, B_tile, Hp), lambda b: (0, b, 0)),
        scratch_shapes=[pltpu.VMEM((L, B_tile, 3 * Hp), jnp.float32),   # hoisted xp (fwd)
                        pltpu.VMEM((L, B_tile, 3 * Hp), jnp.float32),   # hoisted xp (bwd)
                        pltpu.VMEM((L, B_tile, Hp), jnp.float32)],      # bwd hidden states
        compiler_params=pltpu.CompilerParams(
            dimension_semantics=("parallel",)),                         # batch tiles independent
    )(x, len_col, wih_cat, bx_cat, whh_f, bhhn_f, whh_b, bhhn_b)

    out = jnp.transpose(out_lm, (1, 0, 2))[:B, :, :H]                   # (B, L, H)
    return out


def init_params(key, vocab_size, word_dim, embed_size):
    """Deterministic synthetic init matching nn.Embedding / nn.GRU shapes.
       GRU weights stored transposed as (in, 3H) / (H, 3H), gate order [r, z, n]."""
    ks = jax.random.split(key, 9)
    lim = float(1.0 / np.sqrt(embed_size))   # PyTorch default GRU init range

    def u(k, shape, l):
        return jax.random.uniform(k, shape, jnp.float32, -l, l)

    return {
        "embed": u(ks[0], (vocab_size, word_dim), 0.1),            # init_weights(): uniform(-0.1, 0.1)
        "wih_f": u(ks[1], (word_dim, 3 * embed_size), lim),
        "whh_f": u(ks[2], (embed_size, 3 * embed_size), lim),
        "bih_f": u(ks[3], (1, 3 * embed_size), lim),
        "bhh_f": u(ks[4], (1, 3 * embed_size), lim),
        "wih_b": u(ks[5], (word_dim, 3 * embed_size), lim),
        "whh_b": u(ks[6], (embed_size, 3 * embed_size), lim),
        "bih_b": u(ks[7], (1, 3 * embed_size), lim),
        "bhh_b": u(ks[8], (1, 3 * embed_size), lim),
    }


if __name__ == "__main__":
    vocab_size, word_dim, embed_size = 20, 32, 32   # num_layers=1, use_bi_gru=True, no_txtnorm=False
    B, L = 4, 8

    key = jax.random.PRNGKey(0)
    kp, kc = jax.random.split(key)
    params = init_params(kp, vocab_size, word_dim, embed_size)

    captions = jax.random.randint(kc, (B, L), 0, vocab_size, dtype=jnp.int32)
    lengths = jnp.array([8, 7, 5, 3], dtype=jnp.int32)   # sorted descending (pack_padded_sequence contract)

    out = encoder_text_forward(params, captions, lengths)
    out = jax.block_until_ready(out)
    assert out.shape == (B, L, embed_size)
    assert bool(jnp.all(jnp.isfinite(out)))
    print("KERNEL_OK")
</pallas_src>

<mosaic_0001>
module attributes {stable_mosaic.version = 11 : i64} {
  func.func @bigru_text_kernel(%arg0: i32, %arg1: memref<8x8x128xbf16, #tpu.memory_space<vmem>>, %arg2: memref<8x1xi32, #tpu.memory_space<vmem>>, %arg3: memref<128x768xbf16, #tpu.memory_space<vmem>>, %arg4: memref<1x768xf32, #tpu.memory_space<vmem>>, %arg5: memref<128x384xbf16, #tpu.memory_space<vmem>>, %arg6: memref<1x128xf32, #tpu.memory_space<vmem>>, %arg7: memref<128x384xbf16, #tpu.memory_space<vmem>>, %arg8: memref<1x128xf32, #tpu.memory_space<vmem>>, %arg9: memref<8x8x128xf32, #tpu.memory_space<vmem>>, %arg10: memref<8x8x384xf32, #tpu.memory_space<vmem>>, %arg11: memref<8x8x384xf32, #tpu.memory_space<vmem>>, %arg12: memref<8x8x128xf32, #tpu.memory_space<vmem>>) attributes {dimension_semantics = [#tpu.dimension_semantics<parallel>], iteration_bounds = array<i64: 1>, scalar_prefetch = 0 : i64, scratch_operands = 3 : i64, tpu.core_type = #tpu.core_type<tc>, window_params = [{transform_indices = @transform_0, window_bounds = array<i64: 8, 8, 128>}, {transform_indices = @transform_1, window_bounds = array<i64: 8, 1>}, {pipeline_mode = #tpu.pipeline_mode<synchronous>, transform_indices = @transform_2, window_bounds = array<i64: 128, 768>}, {pipeline_mode = #tpu.pipeline_mode<synchronous>, transform_indices = @transform_3, window_bounds = array<i64: 1, 768>}, {pipeline_mode = #tpu.pipeline_mode<synchronous>, transform_indices = @transform_4, window_bounds = array<i64: 128, 384>}, {pipeline_mode = #tpu.pipeline_mode<synchronous>, transform_indices = @transform_5, window_bounds = array<i64: 1, 128>}, {pipeline_mode = #tpu.pipeline_mode<synchronous>, transform_indices = @transform_6, window_bounds = array<i64: 128, 384>}, {pipeline_mode = #tpu.pipeline_mode<synchronous>, transform_indices = @transform_7, window_bounds = array<i64: 1, 128>}, {transform_indices = @transform_8, window_bounds = array<i64: 8, 8, 128>}]} {
    %c0 = arith.constant 0 : index
    %c0_0 = arith.constant 0 : index
    %c0_1 = arith.constant 0 : index
    %0 = vector.load %arg1[%c0, %c0_0, %c0_1] : memref<8x8x128xbf16, #tpu.memory_space<vmem>>, vector<8x8x128xbf16>
    %1 = vector.shape_cast %0 : vector<8x8x128xbf16> to vector<64x128xbf16>
    %c0_2 = arith.constant 0 : index
    %c0_3 = arith.constant 0 : index
    %2 = vector.load %arg3[%c0_2, %c0_3] : memref<128x768xbf16, #tpu.memory_space<vmem>>, vector<128x768xbf16>
    %cst = arith.constant dense<0.000000e+00> : vector<64x768xf32>
    %3 = tpu.matmul %1, %2, %cst {dimension_numbers = #tpu.dot_dimension_numbers<[1], [0], [0], [1], [0, 0, 1, 1], [], []>} : vector<64x128xbf16>, vector<128x768xbf16>, vector<64x768xf32> -> vector<64x768xf32>
    %c0_4 = arith.constant 0 : index
    %c0_5 = arith.constant 0 : index
    %4 = vector.load %arg4[%c0_4, %c0_5] : memref<1x768xf32, #tpu.memory_space<vmem>>, vector<1x768xf32>
    %5 = vector.broadcast %4 : vector<1x768xf32> to vector<64x768xf32>
    %6 = arith.addf %3, %5 : vector<64x768xf32>
    %7 = vector.shape_cast %6 : vector<64x768xf32> to vector<8x8x768xf32>
    %8 = vector.extract_strided_slice %7 {offsets = [0, 0, 0], sizes = [8, 8, 384], strides = [1, 1, 1]} : vector<8x8x768xf32> to vector<8x8x384xf32>
    %c0_6 = arith.constant 0 : index
    %c0_7 = arith.constant 0 : index
    %c0_8 = arith.constant 0 : index
    %9 = vector.load %arg10[%c0_6, %c0_7, %c0_8] : memref<8x8x384xf32, #tpu.memory_space<vmem>>, vector<8x8x384xf32>
    tpu.vector_store %arg10[%c0_6, %c0_7, %c0_8], %8 {strides = array<i32>} : memref<8x8x384xf32, #tpu.memory_space<vmem>>, vector<8x8x384xf32>,
    %10 = vector.extract_strided_slice %7 {offsets = [0, 0, 384], sizes = [8, 8, 384], strides = [1, 1, 1]} : vector<8x8x768xf32> to vector<8x8x384xf32>
    %c0_9 = arith.constant 0 : index
    %c0_10 = arith.constant 0 : index
    %c0_11 = arith.constant 0 : index
    %11 = vector.load %arg11[%c0_9, %c0_10, %c0_11] : memref<8x8x384xf32, #tpu.memory_space<vmem>>, vector<8x8x384xf32>
    tpu.vector_store %arg11[%c0_9, %c0_10, %c0_11], %10 {strides = array<i32>} : memref<8x8x384xf32, #tpu.memory_space<vmem>>, vector<8x8x384xf32>,
    %c0_12 = arith.constant 0 : index
    %c0_13 = arith.constant 0 : index
    %12 = vector.load %arg5[%c0_12, %c0_13] : memref<128x384xbf16, #tpu.memory_space<vmem>>, vector<128x384xbf16>
    %c0_14 = arith.constant 0 : index
    %c0_15 = arith.constant 0 : index
    %13 = vector.load %arg7[%c0_14, %c0_15] : memref<128x384xbf16, #tpu.memory_space<vmem>>, vector<128x384xbf16>
    %c0_16 = arith.constant 0 : index
    %c0_17 = arith.constant 0 : index
    %14 = vector.load %arg6[%c0_16, %c0_17] : memref<1x128xf32, #tpu.memory_space<vmem>>, vector<1x128xf32>
    %15 = vector.shape_cast %14 : vector<1x128xf32> to vector<1x128xf32>
    %16 = vector.broadcast %15 : vector<1x128xf32> to vector<8x128xf32>
    %c0_18 = arith.constant 0 : index
    %c0_19 = arith.constant 0 : index
    %17 = vector.load %arg8[%c0_18, %c0_19] : memref<1x128xf32, #tpu.memory_space<vmem>>, vector<1x128xf32>
    %18 = vector.shape_cast %17 : vector<1x128xf32> to vector<1x128xf32>
    %19 = vector.broadcast %18 : vector<1x128xf32> to vector<8x128xf32>
    %c0_20 = arith.constant 0 : index
    %c0_21 = arith.constant 0 : index
    %20 = vector.load %arg2[%c0_20, %c0_21] : memref<8x1xi32, #tpu.memory_space<vmem>>, vector<8x1xi32>
    %cst_22 = arith.constant 0.000000e+00 : f32
    %21 = vector.broadcast %cst_22 : f32 to vector<8x128xf32>
    %c0_i32 = arith.constant 0 : i32
    %c7_i32 = arith.constant 7 : i32
    %22 = arith.subi %c7_i32, %c0_i32 : i32
    %23 = vector.broadcast %c0_i32 : i32 to vector<8x1xi32>
    %24 = arith.cmpi sgt, %20, %23 : vector<8x1xi32>
    %25 = arith.index_cast %c0_i32 : i32 to index
    %c0_23 = arith.constant 0 : index
    %c0_24 = arith.constant 0 : index
    %26 = vector.load %arg10[%25, %c0_23, %c0_24] : memref<8x8x384xf32, #tpu.memory_space<vmem>>, vector<1x8x384xf32>
    %27 = vector.shape_cast %26 : vector<1x8x384xf32> to vector<8x384xf32>
    %28 = arith.truncf %21 : vector<8x128xf32> to vector<8x128xbf16>
    %cst_25 = arith.constant dense<0.000000e+00> : vector<8x384xf32>
    %29 = tpu.matmul %28, %12, %cst_25 {dimension_numbers = #tpu.dot_dimension_numbers<[1], [0], [0], [1], [0, 0, 1, 1], [], []>} : vector<8x128xbf16>, vector<128x384xbf16>, vector<8x384xf32> -> vector<8x384xf32>
    %30 = vector.extract_strided_slice %27 {offsets = [0, 0], sizes = [8, 128], strides = [1, 1]} : vector<8x384xf32> to vector<8x128xf32>
    %31 = vector.extract_strided_slice %29 {offsets = [0, 0], sizes = [8, 128], strides = [1, 1]} : vector<8x384xf32> to vector<8x128xf32>
    %32 = arith.addf %30, %31 : vector<8x128xf32>
    %33 = arith.negf %32 : vector<8x128xf32>
    %34 = math.exp %33 : vector<8x128xf32>
    %cst_26 = arith.constant 1.000000e+00 : f32
    %35 = vector.broadcast %cst_26 : f32 to vector<8x128xf32>
    %36 = arith.addf %35, %34 : vector<8x128xf32>
    %37 = arith.divf %35, %36 : vector<8x128xf32>
    %38 = vector.extract_strided_slice %27 {offsets = [0, 128], sizes = [8, 128], strides = [1, 1]} : vector<8x384xf32> to vector<8x128xf32>
    %39 = vector.extract_strided_slice %29 {offsets = [0, 128], sizes = [8, 128], strides = [1, 1]} : vector<8x384xf32> to vector<8x128xf32>
    %40 = arith.addf %38, %39 : vector<8x128xf32>
    %41 = arith.negf %40 : vector<8x128xf32>
    %42 = math.exp %41 : vector<8x128xf32>
    %cst_27 = arith.constant 1.000000e+00 : f32
    %43 = vector.broadcast %cst_27 : f32 to vector<8x128xf32>
    %44 = arith.addf %43, %42 : vector<8x128xf32>
    %45 = arith.divf %43, %44 : vector<8x128xf32>
    %46 = vector.extract_strided_slice %27 {offsets = [0, 256], sizes = [8, 128], strides = [1, 1]} : vector<8x384xf32> to vector<8x128xf32>
    %47 = vector.extract_strided_slice %29 {offsets = [0, 256], sizes = [8, 128], strides = [1, 1]} : vector<8x384xf32> to vector<8x128xf32>
    %48 = arith.addf %47, %16 : vector<8x128xf32>
    %49 = arith.mulf %37, %48 : vector<8x128xf32>
    %50 = arith.addf %46, %49 : vector<8x128xf32>
    %51 = math.tanh %50 : vector<8x128xf32>
    %cst_28 = arith.constant 1.000000e+00 : f32
    %52 = vector.broadcast %cst_28 : f32 to vector<8x128xf32>
    %53 = arith.subf %52, %45 : vector<8x128xf32>
    %54 = arith.mulf %53, %51 : vector<8x128xf32>
    %55 = arith.mulf %45, %21 : vector<8x128xf32>
    %56 = arith.addf %54, %55 : vector<8x128xf32>
    %57 = vector.shape_cast %24 : vector<8x1xi1> to vector<8x1xi1>
    %58 = vector.broadcast %57 : vector<8x1xi1> to vector<8x128xi1>
    %59 = arith.select %58, %56, %21 : vector<8x128xi1>, vector<8x128xf32>
    %60 = vector.shape_cast %24 : vector<8x1xi1> to vector<8x1xi1>
    %61 = vector.broadcast %60 : vector<8x1xi1> to vector<8x128xi1>
    %62 = arith.select %61, %59, %21 : vector<8x128xi1>, vector<8x128xf32>
    %63 = arith.index_cast %c0_i32 : i32 to index
    %c0_29 = arith.constant 0 : index
    %c0_30 = arith.constant 0 : index
    %64 = vector.load %arg9[%63, %c0_29, %c0_30] : memref<8x8x128xf32, #tpu.memory_space<vmem>>, vector<1x8x128xf32>
    %65 = vector.shape_cast %64 : vector<1x8x128xf32> to vector<8x128xf32>
    %66 = vector.shape_cast %62 : vector<8x128xf32> to vector<1x8x128xf32>
    tpu.vector_store %arg9[%63, %c0_29, %c0_30], %66 {strides = array<i32>} : memref<8x8x128xf32, #tpu.memory_space<vmem>>, vector<1x8x128xf32>,
    %67 = vector.broadcast %22 : i32 to vector<8x1xi32>
    %68 = arith.cmpi sgt, %20, %67 : vector<8x1xi32>
    %69 = arith.index_cast %22 : i32 to index
    %c0_31 = arith.constant 0 : index
    %c0_32 = arith.constant 0 : index
    %70 = vector.load %arg11[%69, %c0_31, %c0_32] : memref<8x8x384xf32, #tpu.memory_space<vmem>>, vector<1x8x384xf32>
    %71 = vector.shape_cast %70 : vector<1x8x384xf32> to vector<8x384xf32>
    %72 = arith.truncf %21 : vector<8x128xf32> to vector<8x128xbf16>
    %cst_33 = arith.constant dense<0.000000e+00> : vector<8x384xf32>
    %73 = tpu.matmul %72, %13, %cst_33 {dimension_numbers = #tpu.dot_dimension_numbers<[1], [0], [0], [1], [0, 0, 1, 1], [], []>} : vector<8x128xbf16>, vector<128x384xbf16>, vector<8x384xf32> -> vector<8x384xf32>
    %74 = vector.extract_strided_slice %71 {offsets = [0, 0], sizes = [8, 128], strides = [1, 1]} : vector<8x384xf32> to vector<8x128xf32>
    %75 = vector.extract_strided_slice %73 {offsets = [0, 0], sizes = [8, 128], strides = [1, 1]} : vector<8x384xf32> to vector<8x128xf32>
    %76 = arith.addf %74, %75 : vector<8x128xf32>
    %77 = arith.negf %76 : vector<8x128xf32>
    %78 = math.exp %77 : vector<8x128xf32>
    %cst_34 = arith.constant 1.000000e+00 : f32
    %79 = vector.broadcast %cst_34 : f32 to vector<8x128xf32>
    %80 = arith.addf %79, %78 : vector<8x128xf32>
    %81 = arith.divf %79, %80 : vector<8x128xf32>
    %82 = vector.extract_strided_slice %71 {offsets = [0, 128], sizes = [8, 128], strides = [1, 1]} : vector<8x384xf32> to vector<8x128xf32>
    %83 = vector.extract_strided_slice %73 {offsets = [0, 128], sizes = [8, 128], strides = [1, 1]} : vector<8x384xf32> to vector<8x128xf32>
    %84 = arith.addf %82, %83 : vector<8x128xf32>
    %85 = arith.negf %84 : vector<8x128xf32>
    %86 = math.exp %85 : vector<8x128xf32>
    %cst_35 = arith.constant 1.000000e+00 : f32
    %87 = vector.broadcast %cst_35 : f32 to vector<8x128xf32>
    %88 = arith.addf %87, %86 : vector<8x128xf32>
    %89 = arith.divf %87, %88 : vector<8x128xf32>
    %90 = vector.extract_strided_slice %71 {offsets = [0, 256], sizes = [8, 128], strides = [1, 1]} : vector<8x384xf32> to vector<8x128xf32>
    %91 = vector.extract_strided_slice %73 {offsets = [0, 256], sizes = [8, 128], strides = [1, 1]} : vector<8x384xf32> to vector<8x128xf32>
    %92 = arith.addf %91, %19 : vector<8x128xf32>
    %93 = arith.mulf %81, %92 : vector<8x128xf32>
    %94 = arith.addf %90, %93 : vector<8x128xf32>
    %95 = math.tanh %94 : vector<8x128xf32>
    %cst_36 = arith.constant 1.000000e+00 : f32
    %96 = vector.broadcast %cst_36 : f32 to vector<8x128xf32>
    %97 = arith.subf %96, %89 : vector<8x128xf32>
    %98 = arith.mulf %97, %95 : vector<8x128xf32>
    %99 = arith.mulf %89, %21 : vector<8x128xf32>
    %100 = arith.addf %98, %99 : vector<8x128xf32>
    %101 = vector.shape_cast %68 : vector<8x1xi1> to vector<8x1xi1>
    %102 = vector.broadcast %101 : vector<8x1xi1> to vector<8x128xi1>
    %103 = arith.select %102, %100, %21 : vector<8x128xi1>, vector<8x128xf32>
    %104 = vector.shape_cast %68 : vector<8x1xi1> to vector<8x1xi1>
    %105 = vector.broadcast %104 : vector<8x1xi1> to vector<8x128xi1>
    %106 = arith.select %105, %103, %21 : vector<8x128xi1>, vector<8x128xf32>
    %107 = arith.index_cast %22 : i32 to index
    %c0_37 = arith.constant 0 : index
    %c0_38 = arith.constant 0 : index
    %108 = vector.load %arg12[%107, %c0_37, %c0_38] : memref<8x8x128xf32, #tpu.memory_space<vmem>>, vector<1x8x128xf32>
    %109 = vector.shape_cast %108 : vector<1x8x128xf32> to vector<8x128xf32>
    %110 = vector.shape_cast %106 : vector<8x128xf32> to vector<1x8x128xf32>
    tpu.vector_store %arg12[%107, %c0_37, %c0_38], %110 {strides = array<i32>} : memref<8x8x128xf32, #tpu.memory_space<vmem>>, vector<1x8x128xf32>,
    %c1_i32 = arith.constant 1 : i32
    %c7_i32_39 = arith.constant 7 : i32
    %111 = arith.subi %c7_i32_39, %c1_i32 : i32
    %112 = vector.broadcast %c1_i32 : i32 to vector<8x1xi32>
    %113 = arith.cmpi sgt, %20, %112 : vector<8x1xi32>
    %114 = arith.index_cast %c1_i32 : i32 to index
    %c0_40 = arith.constant 0 : index
    %c0_41 = arith.constant 0 : index
    %115 = vector.load %arg10[%114, %c0_40, %c0_41] : memref<8x8x384xf32, #tpu.memory_space<vmem>>, vector<1x8x384xf32>
    %116 = vector.shape_cast %115 : vector<1x8x384xf32> to vector<8x384xf32>
    %117 = arith.truncf %59 : vector<8x128xf32> to vector<8x128xbf16>
    %cst_42 = arith.constant dense<0.000000e+00> : vector<8x384xf32>
    %118 = tpu.matmul %117, %12, %cst_42 {dimension_numbers = #tpu.dot_dimension_numbers<[1], [0], [0], [1], [0, 0, 1, 1], [], []>} : vector<8x128xbf16>, vector<128x384xbf16>, vector<8x384xf32> -> vector<8x384xf32>
    %119 = vector.extract_strided_slice %116 {offsets = [0, 0], sizes = [8, 128], strides = [1, 1]} : vector<8x384xf32> to vector<8x128xf32>
    %120 = vector.extract_strided_slice %118 {offsets = [0, 0], sizes = [8, 128], strides = [1, 1]} : vector<8x384xf32> to vector<8x128xf32>
    %121 = arith.addf %119, %120 : vector<8x128xf32>
    %122 = arith.negf %121 : vector<8x128xf32>
    %123 = math.exp %122 : vector<8x128xf32>
    %cst_43 = arith.constant 1.000000e+00 : f32
    %124 = vector.broadcast %cst_43 : f32 to vector<8x128xf32>
    %125 = arith.addf %124, %123 : vector<8x128xf32>
    %126 = arith.divf %124, %125 : vector<8x128xf32>
    %127 = vector.extract_strided_slice %116 {offsets = [0, 128], sizes = [8, 128], strides = [1, 1]} : vector<8x384xf32> to vector<8x128xf32>
    %128 = vector.extract_strided_slice %118 {offsets = [0, 128], sizes = [8, 128], strides = [1, 1]} : vector<8x384xf32> to vector<8x128xf32>
    %129 = arith.addf %127, %128 : vector<8x128xf32>
    %130 = arith.negf %129 : vector<8x128xf32>
    %131 = math.exp %130 : vector<8x128xf32>
    %cst_44 = arith.constant 1.000000e+00 : f32
    %132 = vector.broadcast %cst_44 : f32 to vector<8x128xf32>
    %133 = arith.addf %132, %131 : vector<8x128xf32>
    %134 = arith.divf %132, %133 : vector<8x128xf32>
    %135 = vector.extract_strided_slice %116 {offsets = [0, 256], sizes = [8, 128], strides = [1, 1]} : vector<8x384xf32> to vector<8x128xf32>
    %136 = vector.extract_strided_slice %118 {offsets = [0, 256], sizes = [8, 128], strides = [1, 1]} : vector<8x384xf32> to vector<8x128xf32>
    %137 = arith.addf %136, %16 : vector<8x128xf32>
    %138 = arith.mulf %126, %137 : vector<8x128xf32>
    %139 = arith.addf %135, %138 : vector<8x128xf32>
    %140 = math.tanh %139 : vector<8x128xf32>
    %cst_45 = arith.constant 1.000000e+00 : f32
    %141 = vector.broadcast %cst_45 : f32 to vector<8x128xf32>
    %142 = arith.subf %141, %134 : vector<8x128xf32>
    %143 = arith.mulf %142, %140 : vector<8x128xf32>
    %144 = arith.mulf %134, %59 : vector<8x128xf32>
    %145 = arith.addf %143, %144 : vector<8x128xf32>
    %146 = vector.shape_cast %113 : vector<8x1xi1> to vector<8x1xi1>
    %147 = vector.broadcast %146 : vector<8x1xi1> to vector<8x128xi1>
    %148 = arith.select %147, %145, %59 : vector<8x128xi1>, vector<8x128xf32>
    %149 = vector.shape_cast %113 : vector<8x1xi1> to vector<8x1xi1>
    %150 = vector.broadcast %149 : vector<8x1xi1> to vector<8x128xi1>
    %151 = arith.select %150, %148, %21 : vector<8x128xi1>, vector<8x128xf32>
    %152 = arith.index_cast %c1_i32 : i32 to index
    %c0_46 = arith.constant 0 : index
    %c0_47 = arith.constant 0 : index
    %153 = vector.load %arg9[%152, %c0_46, %c0_47] : memref<8x8x128xf32, #tpu.memory_space<vmem>>, vector<1x8x128xf32>
    %154 = vector.shape_cast %153 : vector<1x8x128xf32> to vector<8x128xf32>
    %155 = vector.shape_cast %151 : vector<8x128xf32> to vector<1x8x128xf32>
    tpu.vector_store %arg9[%152, %c0_46, %c0_47], %155 {strides = array<i32>} : memref<8x8x128xf32, #tpu.memory_space<vmem>>, vector<1x8x128xf32>,
    %156 = vector.broadcast %111 : i32 to vector<8x1xi32>
    %157 = arith.cmpi sgt, %20, %156 : vector<8x1xi32>
    %158 = arith.index_cast %111 : i32 to index
    %c0_48 = arith.constant 0 : index
    %c0_49 = arith.constant 0 : index
    %159 = vector.load %arg11[%158, %c0_48, %c0_49] : memref<8x8x384xf32, #tpu.memory_space<vmem>>, vector<1x8x384xf32>
    %160 = vector.shape_cast %159 : vector<1x8x384xf32> to vector<8x384xf32>
    %161 = arith.truncf %103 : vector<8x128xf32> to vector<8x128xbf16>
    %cst_50 = arith.constant dense<0.000000e+00> : vector<8x384xf32>
    %162 = tpu.matmul %161, %13, %cst_50 {dimension_numbers = #tpu.dot_dimension_numbers<[1], [0], [0], [1], [0, 0, 1, 1], [], []>} : vector<8x128xbf16>, vector<128x384xbf16>, vector<8x384xf32> -> vector<8x384xf32>
    %163 = vector.extract_strided_slice %160 {offsets = [0, 0], sizes = [8, 128], strides = [1, 1]} : vector<8x384xf32> to vector<8x128xf32>
    %164 = vector.extract_strided_slice %162 {offsets = [0, 0], sizes = [8, 128], strides = [1, 1]} : vector<8x384xf32> to vector<8x128xf32>
    %165 = arith.addf %163, %164 : vector<8x128xf32>
    %166 = arith.negf %165 : vector<8x128xf32>
    %167 = math.exp %166 : vector<8x128xf32>
    %cst_51 = arith.constant 1.000000e+00 : f32
    %168 = vector.broadcast %cst_51 : f32 to vector<8x128xf32>
    %169 = arith.addf %168, %167 : vector<8x128xf32>
    %170 = arith.divf %168, %169 : vector<8x128xf32>
    %171 = vector.extract_strided_slice %160 {offsets = [0, 128], sizes = [8, 128], strides = [1, 1]} : vector<8x384xf32> to vector<8x128xf32>
    %172 = vector.extract_strided_slice %162 {offsets = [0, 128], sizes = [8, 128], strides = [1, 1]} : vector<8x384xf32> to vector<8x128xf32>
    %173 = arith.addf %171, %172 : vector<8x128xf32>
    %174 = arith.negf %173 : vector<8x128xf32>
    %175 = math.exp %174 : vector<8x128xf32>
    %cst_52 = arith.constant 1.000000e+00 : f32
    %176 = vector.broadcast %cst_52 : f32 to vector<8x128xf32>
    %177 = arith.addf %176, %175 : vector<8x128xf32>
    %178 = arith.divf %176, %177 : vector<8x128xf32>
    %179 = vector.extract_strided_slice %160 {offsets = [0, 256], sizes = [8, 128], strides = [1, 1]} : vector<8x384xf32> to vector<8x128xf32>
    %180 = vector.extract_strided_slice %162 {offsets = [0, 256], sizes = [8, 128], strides = [1, 1]} : vector<8x384xf32> to vector<8x128xf32>
    %181 = arith.addf %180, %19 : vector<8x128xf32>
    %182 = arith.mulf %170, %181 : vector<8x128xf32>
    %183 = arith.addf %179, %182 : vector<8x128xf32>
    %184 = math.tanh %183 : vector<8x128xf32>
    %cst_53 = arith.constant 1.000000e+00 : f32
    %185 = vector.broadcast %cst_53 : f32 to vector<8x128xf32>
    %186 = arith.subf %185, %178 : vector<8x128xf32>
    %187 = arith.mulf %186, %184 : vector<8x128xf32>
    %188 = arith.mulf %178, %103 : vector<8x128xf32>
    %189 = arith.addf %187, %188 : vector<8x128xf32>
    %190 = vector.shape_cast %157 : vector<8x1xi1> to vector<8x1xi1>
    %191 = vector.broadcast %190 : vector<8x1xi1> to vector<8x128xi1>
    %192 = arith.select %191, %189, %103 : vector<8x128xi1>, vector<8x128xf32>
    %193 = vector.shape_cast %157 : vector<8x1xi1> to vector<8x1xi1>
    %194 = vector.broadcast %193 : vector<8x1xi1> to vector<8x128xi1>
    %195 = arith.select %194, %192, %21 : vector<8x128xi1>, vector<8x128xf32>
    %196 = arith.index_cast %111 : i32 to index
    %c0_54 = arith.constant 0 : index
    %c0_55 = arith.constant 0 : index
    %197 = vector.load %arg12[%196, %c0_54, %c0_55] : memref<8x8x128xf32, #tpu.memory_space<vmem>>, vector<1x8x128xf32>
    %198 = vector.shape_cast %197 : vector<1x8x128xf32> to vector<8x128xf32>
    %199 = vector.shape_cast %195 : vector<8x128xf32> to vector<1x8x128xf32>
    tpu.vector_store %arg12[%196, %c0_54, %c0_55], %199 {strides = array<i32>} : memref<8x8x128xf32, #tpu.memory_space<vmem>>, vector<1x8x128xf32>,
    %c2_i32 = arith.constant 2 : i32
    %c7_i32_56 = arith.constant 7 : i32
    %200 = arith.subi %c7_i32_56, %c2_i32 : i32
    %201 = vector.broadcast %c2_i32 : i32 to vector<8x1xi32>
    %202 = arith.cmpi sgt, %20, %201 : vector<8x1xi32>
    %203 = arith.index_cast %c2_i32 : i32 to index
    %c0_57 = arith.constant 0 : index
    %c0_58 = arith.constant 0 : index
    %204 = vector.load %arg10[%203, %c0_57, %c0_58] : memref<8x8x384xf32, #tpu.memory_space<vmem>>, vector<1x8x384xf32>
    %205 = vector.shape_cast %204 : vector<1x8x384xf32> to vector<8x384xf32>
    %206 = arith.truncf %148 : vector<8x128xf32> to vector<8x128xbf16>
    %cst_59 = arith.constant dense<0.000000e+00> : vector<8x384xf32>
    %207 = tpu.matmul %206, %12, %cst_59 {dimension_numbers = #tpu.dot_dimension_numbers<[1], [0], [0], [1], [0, 0, 1, 1], [], []>} : vector<8x128xbf16>, vector<128x384xbf16>, vector<8x384xf32> -> vector<8x384xf32>
    %208 = vector.extract_strided_slice %205 {offsets = [0, 0], sizes = [8, 128], strides = [1, 1]} : vector<8x384xf32> to vector<8x128xf32>
    %209 = vector.extract_strided_slice %207 {offsets = [0, 0], sizes = [8, 128], strides = [1, 1]} : vector<8x384xf32> to vector<8x128xf32>
    %210 = arith.addf %208, %209 : vector<8x128xf32>
    %211 = arith.negf %210 : vector<8x128xf32>
    %212 = math.exp %211 : vector<8x128xf32>
    %cst_60 = arith.constant 1.000000e+00 : f32
    %213 = vector.broadcast %cst_60 : f32 to vector<8x128xf32>
    %214 = arith.addf %213, %212 : vector<8x128xf32>
    %215 = arith.divf %213, %214 : vector<8x128xf32>
    %216 = vector.extract_strided_slice %205 {offsets = [0, 128], sizes = [8, 128], strides = [1, 1]} : vector<8x384xf32> to vector<8x128xf32>
    %217 = vector.extract_strided_slice %207 {offsets = [0, 128], sizes = [8, 128], strides = [1, 1]} : vector<8x384xf32> to vector<8x128xf32>
    %218 = arith.addf %216, %217 : vector<8x128xf32>
    %219 = arith.negf %218 : vector<8x128xf32>
    %220 = math.exp %219 : vector<8x128xf32>
    %cst_61 = arith.constant 1.000000e+00 : f32
    %221 = vector.broadcast %cst_61 : f32 to vector<8x128xf32>
    %222 = arith.addf %221, %220 : vector<8x128xf32>
    %223 = arith.divf %221, %222 : vector<8x128xf32>
    %224 = vector.extract_strided_slice %205 {offsets = [0, 256], sizes = [8, 128], strides = [1, 1]} : vector<8x384xf32> to vector<8x128xf32>
    %225 = vector.extract_strided_slice %207 {offsets = [0, 256], sizes = [8, 128], strides = [1, 1]} : vector<8x384xf32> to vector<8x128xf32>
    %226 = arith.addf %225, %16 : vector<8x128xf32>
    %227 = arith.mulf %215, %226 : vector<8x128xf32>
    %228 = arith.addf %224, %227 : vector<8x128xf32>
    %229 = math.tanh %228 : vector<8x128xf32>
    %cst_62 = arith.constant 1.000000e+00 : f32
    %230 = vector.broadcast %cst_62 : f32 to vector<8x128xf32>
    %231 = arith.subf %230, %223 : vector<8x128xf32>
    %232 = arith.mulf %231, %229 : vector<8x128xf32>
    %233 = arith.mulf %223, %148 : vector<8x128xf32>
    %234 = arith.addf %232, %233 : vector<8x128xf32>
    %235 = vector.shape_cast %202 : vector<8x1xi1> to vector<8x1xi1>
    %236 = vector.broadcast %235 : vector<8x1xi1> to vector<8x128xi1>
    %237 = arith.select %236, %234, %148 : vector<8x128xi1>, vector<8x128xf32>
    %238 = vector.shape_cast %202 : vector<8x1xi1> to vector<8x1xi1>
    %239 = vector.broadcast %238 : vector<8x1xi1> to vector<8x128xi1>
    %240 = arith.select %239, %237, %21 : vector<8x128xi1>, vector<8x128xf32>
    %241 = arith.index_cast %c2_i32 : i32 to index
    %c0_63 = arith.constant 0 : index
    %c0_64 = arith.constant 0 : index
    %242 = vector.load %arg9[%241, %c0_63, %c0_64] : memref<8x8x128xf32, #tpu.memory_space<vmem>>, vector<1x8x128xf32>
    %243 = vector.shape_cast %242 : vector<1x8x128xf32> to vector<8x128xf32>
    %244 = vector.shape_cast %240 : vector<8x128xf32> to vector<1x8x128xf32>
    tpu.vector_store %arg9[%241, %c0_63, %c0_64], %244 {strides = array<i32>} : memref<8x8x128xf32, #tpu.memory_space<vmem>>, vector<1x8x128xf32>,
    %245 = vector.broadcast %200 : i32 to vector<8x1xi32>
    %246 = arith.cmpi sgt, %20, %245 : vector<8x1xi32>
    %247 = arith.index_cast %200 : i32 to index
    %c0_65 = arith.constant 0 : index
    %c0_66 = arith.constant 0 : index
    %248 = vector.load %arg11[%247, %c0_65, %c0_66] : memref<8x8x384xf32, #tpu.memory_space<vmem>>, vector<1x8x384xf32>
    %249 = vector.shape_cast %248 : vector<1x8x384xf32> to vector<8x384xf32>
    %250 = arith.truncf %192 : vector<8x128xf32> to vector<8x128xbf16>
    %cst_67 = arith.constant dense<0.000000e+00> : vector<8x384xf32>
    %251 = tpu.matmul %250, %13, %cst_67 {dimension_numbers = #tpu.dot_dimension_numbers<[1], [0], [0], [1], [0, 0, 1, 1], [], []>} : vector<8x128xbf16>, vector<128x384xbf16>, vector<8x384xf32> -> vector<8x384xf32>
    %252 = vector.extract_strided_slice %249 {offsets = [0, 0], sizes = [8, 128], strides = [1, 1]} : vector<8x384xf32> to vector<8x128xf32>
    %253 = vector.extract_strided_slice %251 {offsets = [0, 0], sizes = [8, 128], strides = [1, 1]} : vector<8x384xf32> to vector<8x128xf32>
    %254 = arith.addf %252, %253 : vector<8x128xf32>
    %255 = arith.negf %254 : vector<8x128xf32>
    %256 = math.exp %255 : vector<8x128xf32>
    %cst_68 = arith.constant 1.000000e+00 : f32
    %257 = vector.broadcast %cst_68 : f32 to vector<8x128xf32>
    %258 = arith.addf %257, %256 : vector<8x128xf32>
    %259 = arith.divf %257, %258 : vector<8x128xf32>
    %260 = vector.extract_strided_slice %249 {offsets = [0, 128], sizes = [8, 128], strides = [1, 1]} : vector<8x384xf32> to vector<8x128xf32>
    %261 = vector.extract_strided_slice %251 {offsets = [0, 128], sizes = [8, 128], strides = [1, 1]} : vector<8x384xf32> to vector<8x128xf32>
    %262 = arith.addf %260, %261 : vector<8x128xf32>
    %263 = arith.negf %262 : vector<8x128xf32>
    %264 = math.exp %263 : vector<8x128xf32>
    %cst_69 = arith.constant 1.000000e+00 : f32
    %265 = vector.broadcast %cst_69 : f32 to vector<8x128xf32>
    %266 = arith.addf %265, %264 : vector<8x128xf32>
    %267 = arith.divf %265, %266 : vector<8x128xf32>
    %268 = vector.extract_strided_slice %249 {offsets = [0, 256], sizes = [8, 128], strides = [1, 1]} : vector<8x384xf32> to vector<8x128xf32>
    %269 = vector.extract_strided_slice %251 {offsets = [0, 256], sizes = [8, 128], strides = [1, 1]} : vector<8x384xf32> to vector<8x128xf32>
    %270 = arith.addf %269, %19 : vector<8x128xf32>
    %271 = arith.mulf %259, %270 : vector<8x128xf32>
    %272 = arith.addf %268, %271 : vector<8x128xf32>
    %273 = math.tanh %272 : vector<8x128xf32>
    %cst_70 = arith.constant 1.000000e+00 : f32
    %274 = vector.broadcast %cst_70 : f32 to vector<8x128xf32>
    %275 = arith.subf %274, %267 : vector<8x128xf32>
    %276 = arith.mulf %275, %273 : vector<8x128xf32>
    %277 = arith.mulf %267, %192 : vector<8x128xf32>
    %278 = arith.addf %276, %277 : vector<8x128xf32>
    %279 = vector.shape_cast %246 : vector<8x1xi1> to vector<8x1xi1>
    %280 = vector.broadcast %279 : vector<8x1xi1> to vector<8x128xi1>
    %281 = arith.select %280, %278, %192 : vector<8x128xi1>, vector<8x128xf32>
    %282 = vector.shape_cast %246 : vector<8x1xi1> to vector<8x1xi1>
    %283 = vector.broadcast %282 : vector<8x1xi1> to vector<8x128xi1>
    %284 = arith.select %283, %281, %21 : vector<8x128xi1>, vector<8x128xf32>
    %285 = arith.index_cast %200 : i32 to index
    %c0_71 = arith.constant 0 : index
    %c0_72 = arith.constant 0 : index
    %286 = vector.load %arg12[%285, %c0_71, %c0_72] : memref<8x8x128xf32, #tpu.memory_space<vmem>>, vector<1x8x128xf32>
    %287 = vector.shape_cast %286 : vector<1x8x128xf32> to vector<8x128xf32>
    %288 = vector.shape_cast %284 : vector<8x128xf32> to vector<1x8x128xf32>
    tpu.vector_store %arg12[%285, %c0_71, %c0_72], %288 {strides = array<i32>} : memref<8x8x128xf32, #tpu.memory_space<vmem>>, vector<1x8x128xf32>,
    %c3_i32 = arith.constant 3 : i32
    %c7_i32_73 = arith.constant 7 : i32
    %289 = arith.subi %c7_i32_73, %c3_i32 : i32
    %290 = vector.broadcast %c3_i32 : i32 to vector<8x1xi32>
    %291 = arith.cmpi sgt, %20, %290 : vector<8x1xi32>
    %292 = arith.index_cast %c3_i32 : i32 to index
    %c0_74 = arith.constant 0 : index
    %c0_75 = arith.constant 0 : index
    %293 = vector.load %arg10[%292, %c0_74, %c0_75] : memref<8x8x384xf32, #tpu.memory_space<vmem>>, vector<1x8x384xf32>
    %294 = vector.shape_cast %293 : vector<1x8x384xf32> to vector<8x384xf32>
    %295 = arith.truncf %237 : vector<8x128xf32> to vector<8x128xbf16>
    %cst_76 = arith.constant dense<0.000000e+00> : vector<8x384xf32>
    %296 = tpu.matmul %295, %12, %cst_76 {dimension_numbers = #tpu.dot_dimension_numbers<[1], [0], [0], [1], [0, 0, 1, 1], [], []>} : vector<8x128xbf16>, vector<128x384xbf16>, vector<8x384xf32> -> vector<8x384xf32>
    %297 = vector.extract_strided_slice %294 {offsets = [0, 0], sizes = [8, 128], strides = [1, 1]} : vector<8x384xf32> to vector<8x128xf32>
    %298 = vector.extract_strided_slice %296 {offsets = [0, 0], sizes = [8, 128], strides = [1, 1]} : vector<8x384xf32> to vector<8x128xf32>
    %299 = arith.addf %297, %298 : vector<8x128xf32>
    %300 = arith.negf %299 : vector<8x128xf32>
    %301 = math.exp %300 : vector<8x128xf32>
    %cst_77 = arith.constant 1.000000e+00 : f32
    %302 = vector.broadcast %cst_77 : f32 to vector<8x128xf32>
    %303 = arith.addf %302, %301 : vector<8x128xf32>
    %304 = arith.divf %302, %303 : vector<8x128xf32>
    %305 = vector.extract_strided_slice %294 {offsets = [0, 128], sizes = [8, 128], strides = [1, 1]} : vector<8x384xf32> to vector<8x128xf32>
    %306 = vector.extract_strided_slice %296 {offsets = [0, 128], sizes = [8, 128], strides = [1, 1]} : vector<8x384xf32> to vector<8x128xf32>
    %307 = arith.addf %305, %306 : vector<8x128xf32>
    %308 = arith.negf %307 : vector<8x128xf32>
    %309 = math.exp %308 : vector<8x128xf32>
    %cst_78 = arith.constant 1.000000e+00 : f32
    %310 = vector.broadcast %cst_78 : f32 to vector<8x128xf32>
    %311 = arith.addf %310, %309 : vector<8x128xf32>
    %312 = arith.divf %310, %311 : vector<8x128xf32>
    %313 = vector.extract_strided_slice %294 {offsets = [0, 256], sizes = [8, 128], strides = [1, 1]} : vector<8x384xf32> to vector<8x128xf32>
    %314 = vector.extract_strided_slice %296 {offsets = [0, 256], sizes = [8, 128], strides = [1, 1]} : vector<8x384xf32> to vector<8x128xf32>
    %315 = arith.addf %314, %16 : vector<8x128xf32>
    %316 = arith.mulf %304, %315 : vector<8x128xf32>
    %317 = arith.addf %313, %316 : vector<8x128xf32>
    %318 = math.tanh %317 : vector<8x128xf32>
    %cst_79 = arith.constant 1.000000e+00 : f32
    %319 = vector.broadcast %cst_79 : f32 to vector<8x128xf32>
    %320 = arith.subf %319, %312 : vector<8x128xf32>
    %321 = arith.mulf %320, %318 : vector<8x128xf32>
    %322 = arith.mulf %312, %237 : vector<8x128xf32>
    %323 = arith.addf %321, %322 : vector<8x128xf32>
    %324 = vector.shape_cast %291 : vector<8x1xi1> to vector<8x1xi1>
    %325 = vector.broadcast %324 : vector<8x1xi1> to vector<8x128xi1>
    %326 = arith.select %325, %323, %237 : vector<8x128xi1>, vector<8x128xf32>
    %327 = vector.shape_cast %291 : vector<8x1xi1> to vector<8x1xi1>
    %328 = vector.broadcast %327 : vector<8x1xi1> to vector<8x128xi1>
    %329 = arith.select %328, %326, %21 : vector<8x128xi1>, vector<8x128xf32>
    %330 = arith.index_cast %c3_i32 : i32 to index
    %c0_80 = arith.constant 0 : index
    %c0_81 = arith.constant 0 : index
    %331 = vector.load %arg9[%330, %c0_80, %c0_81] : memref<8x8x128xf32, #tpu.memory_space<vmem>>, vector<1x8x128xf32>
    %332 = vector.shape_cast %331 : vector<1x8x128xf32> to vector<8x128xf32>
    %333 = vector.shape_cast %329 : vector<8x128xf32> to vector<1x8x128xf32>
    tpu.vector_store %arg9[%330, %c0_80, %c0_81], %333 {strides = array<i32>} : memref<8x8x128xf32, #tpu.memory_space<vmem>>, vector<1x8x128xf32>,
    %334 = vector.broadcast %289 : i32 to vector<8x1xi32>
    %335 = arith.cmpi sgt, %20, %334 : vector<8x1xi32>
    %336 = arith.index_cast %289 : i32 to index
    %c0_82 = arith.constant 0 : index
    %c0_83 = arith.constant 0 : index
    %337 = vector.load %arg11[%336, %c0_82, %c0_83] : memref<8x8x384xf32, #tpu.memory_space<vmem>>, vector<1x8x384xf32>
    %338 = vector.shape_cast %337 : vector<1x8x384xf32> to vector<8x384xf32>
    %339 = arith.truncf %281 : vector<8x128xf32> to vector<8x128xbf16>
    %cst_84 = arith.constant dense<0.000000e+00> : vector<8x384xf32>
    %340 = tpu.matmul %339, %13, %cst_84 {dimension_numbers = #tpu.dot_dimension_numbers<[1], [0], [0], [1], [0, 0, 1, 1], [], []>} : vector<8x128xbf16>, vector<128x384xbf16>, vector<8x384xf32> -> vector<8x384xf32>
    %341 = vector.extract_strided_slice %338 {offsets = [0, 0], sizes = [8, 128], strides = [1, 1]} : vector<8x384xf32> to vector<8x128xf32>
    %342 = vector.extract_strided_slice %340 {offsets = [0, 0], sizes = [8, 128], strides = [1, 1]} : vector<8x384xf32> to vector<8x128xf32>
    %343 = arith.addf %341, %342 : vector<8x128xf32>
    %344 = arith.negf %343 : vector<8x128xf32>
    %345 = math.exp %344 : vector<8x128xf32>
    %cst_85 = arith.constant 1.000000e+00 : f32
    %346 = vector.broadcast %cst_85 : f32 to vector<8x128xf32>
    %347 = arith.addf %346, %345 : vector<8x128xf32>
    %348 = arith.divf %346, %347 : vector<8x128xf32>
    %349 = vector.extract_strided_slice %338 {offsets = [0, 128], sizes = [8, 128], strides = [1, 1]} : vector<8x384xf32> to vector<8x128xf32>
    %350 = vector.extract_strided_slice %340 {offsets = [0, 128], sizes = [8, 128], strides = [1, 1]} : vector<8x384xf32> to vector<8x128xf32>
    %351 = arith.addf %349, %350 : vector<8x128xf32>
    %352 = arith.negf %351 : vector<8x128xf32>
    %353 = math.exp %352 : vector<8x128xf32>
    %cst_86 = arith.constant 1.000000e+00 : f32
    %354 = vector.broadcast %cst_86 : f32 to vector<8x128xf32>
    %355 = arith.addf %354, %353 : vector<8x128xf32>
    %356 = arith.divf %354, %355 : vector<8x128xf32>
    %357 = vector.extract_strided_slice %338 {offsets = [0, 256], sizes = [8, 128], strides = [1, 1]} : vector<8x384xf32> to vector<8x128xf32>
    %358 = vector.extract_strided_slice %340 {offsets = [0, 256], sizes = [8, 128], strides = [1, 1]} : vector<8x384xf32> to vector<8x128xf32>
    %359 = arith.addf %358, %19 : vector<8x128xf32>
    %360 = arith.mulf %348, %359 : vector<8x128xf32>
    %361 = arith.addf %357, %360 : vector<8x128xf32>
    %362 = math.tanh %361 : vector<8x128xf32>
    %cst_87 = arith.constant 1.000000e+00 : f32
    %363 = vector.broadcast %cst_87 : f32 to vector<8x128xf32>
    %364 = arith.subf %363, %356 : vector<8x128xf32>
    %365 = arith.mulf %364, %362 : vector<8x128xf32>
    %366 = arith.mulf %356, %281 : vector<8x128xf32>
    %367 = arith.addf %365, %366 : vector<8x128xf32>
    %368 = vector.shape_cast %335 : vector<8x1xi1> to vector<8x1xi1>
    %369 = vector.broadcast %368 : vector<8x1xi1> to vector<8x128xi1>
    %370 = arith.select %369, %367, %281 : vector<8x128xi1>, vector<8x128xf32>
    %371 = vector.shape_cast %335 : vector<8x1xi1> to vector<8x1xi1>
    %372 = vector.broadcast %371 : vector<8x1xi1> to vector<8x128xi1>
    %373 = arith.select %372, %370, %21 : vector<8x128xi1>, vector<8x128xf32>
    %374 = arith.index_cast %289 : i32 to index
    %c0_88 = arith.constant 0 : index
    %c0_89 = arith.constant 0 : index
    %375 = vector.load %arg12[%374, %c0_88, %c0_89] : memref<8x8x128xf32, #tpu.memory_space<vmem>>, vector<1x8x128xf32>
    %376 = vector.shape_cast %375 : vector<1x8x128xf32> to vector<8x128xf32>
    %377 = vector.shape_cast %373 : vector<8x128xf32> to vector<1x8x128xf32>
    tpu.vector_store %arg12[%374, %c0_88, %c0_89], %377 {strides = array<i32>} : memref<8x8x128xf32, #tpu.memory_space<vmem>>, vector<1x8x128xf32>,
    %c4_i32 = arith.constant 4 : i32
    %c7_i32_90 = arith.constant 7 : i32
    %378 = arith.subi %c7_i32_90, %c4_i32 : i32
    %379 = vector.broadcast %c4_i32 : i32 to vector<8x1xi32>
    %380 = arith.cmpi sgt, %20, %379 : vector<8x1xi32>
    %381 = arith.index_cast %c4_i32 : i32 to index
    %c0_91 = arith.constant 0 : index
    %c0_92 = arith.constant 0 : index
    %382 = vector.load %arg10[%381, %c0_91, %c0_92] : memref<8x8x384xf32, #tpu.memory_space<vmem>>, vector<1x8x384xf32>
    %383 = vector.shape_cast %382 : vector<1x8x384xf32> to vector<8x384xf32>
    %384 = arith.truncf %326 : vector<8x128xf32> to vector<8x128xbf16>
    %cst_93 = arith.constant dense<0.000000e+00> : vector<8x384xf32>
    %385 = tpu.matmul %384, %12, %cst_93 {dimension_numbers = #tpu.dot_dimension_numbers<[1], [0], [0], [1], [0, 0, 1, 1], [], []>} : vector<8x128xbf16>, vector<128x384xbf16>, vector<8x384xf32> -> vector<8x384xf32>
    %386 = vector.extract_strided_slice %383 {offsets = [0, 0], sizes = [8, 128], strides = [1, 1]} : vector<8x384xf32> to vector<8x128xf32>
    %387 = vector.extract_strided_slice %385 {offsets = [0, 0], sizes = [8, 128], strides = [1, 1]} : vector<8x384xf32> to vector<8x128xf32>
    %388 = arith.addf %386, %387 : vector<8x128xf32>
    %389 = arith.negf %388 : vector<8x128xf32>
    %390 = math.exp %389 : vector<8x128xf32>
    %cst_94 = arith.constant 1.000000e+00 : f32
    %391 = vector.broadcast %cst_94 : f32 to vector<8x128xf32>
    %392 = arith.addf %391, %390 : vector<8x128xf32>
    %393 = arith.divf %391, %392 : vector<8x128xf32>
    %394 = vector.extract_strided_slice %383 {offsets = [0, 128], sizes = [8, 128], strides = [1, 1]} : vector<8x384xf32> to vector<8x128xf32>
    %395 = vector.extract_strided_slice %385 {offsets = [0, 128], sizes = [8, 128], strides = [1, 1]} : vector<8x384xf32> to vector<8x128xf32>
    %396 = arith.addf %394, %395 : vector<8x128xf32>
    %397 = arith.negf %396 : vector<8x128xf32>
    %398 = math.exp %397 : vector<8x128xf32>
    %cst_95 = arith.constant 1.000000e+00 : f32
    %399 = vector.broadcast %cst_95 : f32 to vector<8x128xf32>
    %400 = arith.addf %399, %398 : vector<8x128xf32>
    %401 = arith.divf %399, %400 : vector<8x128xf32>
    %402 = vector.extract_strided_slice %383 {offsets = [0, 256], sizes = [8, 128], strides = [1, 1]} : vector<8x384xf32> to vector<8x128xf32>
    %403 = vector.extract_strided_slice %385 {offsets = [0, 256], sizes = [8, 128], strides = [1, 1]} : vector<8x384xf32> to vector<8x128xf32>
    %404 = arith.addf %403, %16 : vector<8x128xf32>
    %405 = arith.mulf %393, %404 : vector<8x128xf32>
    %406 = arith.addf %402, %405 : vector<8x128xf32>
    %407 = math.tanh %406 : vector<8x128xf32>
    %cst_96 = arith.constant 1.000000e+00 : f32
    %408 = vector.broadcast %cst_96 : f32 to vector<8x128xf32>
    %409 = arith.subf %408, %401 : vector<8x128xf32>
    %410 = arith.mulf %409, %407 : vector<8x128xf32>
    %411 = arith.mulf %401, %326 : vector<8x128xf32>
    %412 = arith.addf %410, %411 : vector<8x128xf32>
    %413 = vector.shape_cast %380 : vector<8x1xi1> to vector<8x1xi1>
    %414 = vector.broadcast %413 : vector<8x1xi1> to vector<8x128xi1>
    %415 = arith.select %414, %412, %326 : vector<8x128xi1>, vector<8x128xf32>
    %416 = vector.shape_cast %380 : vector<8x1xi1> to vector<8x1xi1>
    %417 = vector.broadcast %416 : vector<8x1xi1> to vector<8x128xi1>
    %418 = arith.select %417, %415, %21 : vector<8x128xi1>, vector<8x128xf32>
    %419 = arith.index_cast %c4_i32 : i32 to index
    %c0_97 = arith.constant 0 : index
    %c0_98 = arith.constant 0 : index
    %420 = vector.load %arg9[%419, %c0_97, %c0_98] : memref<8x8x128xf32, #tpu.memory_space<vmem>>, vector<1x8x128xf32>
    %421 = vector.shape_cast %420 : vector<1x8x128xf32> to vector<8x128xf32>
    %422 = vector.shape_cast %418 : vector<8x128xf32> to vector<1x8x128xf32>
    tpu.vector_store %arg9[%419, %c0_97, %c0_98], %422 {strides = array<i32>} : memref<8x8x128xf32, #tpu.memory_space<vmem>>, vector<1x8x128xf32>,
    %423 = vector.broadcast %378 : i32 to vector<8x1xi32>
    %424 = arith.cmpi sgt, %20, %423 : vector<8x1xi32>
    %425 = arith.index_cast %378 : i32 to index
    %c0_99 = arith.constant 0 : index
    %c0_100 = arith.constant 0 : index
    %426 = vector.load %arg11[%425, %c0_99, %c0_100] : memref<8x8x384xf32, #tpu.memory_space<vmem>>, vector<1x8x384xf32>
    %427 = vector.shape_cast %426 : vector<1x8x384xf32> to vector<8x384xf32>
    %428 = arith.truncf %370 : vector<8x128xf32> to vector<8x128xbf16>
    %cst_101 = arith.constant dense<0.000000e+00> : vector<8x384xf32>
    %429 = tpu.matmul %428, %13, %cst_101 {dimension_numbers = #tpu.dot_dimension_numbers<[1], [0], [0], [1], [0, 0, 1, 1], [], []>} : vector<8x128xbf16>, vector<128x384xbf16>, vector<8x384xf32> -> vector<8x384xf32>
    %430 = vector.extract_strided_slice %427 {offsets = [0, 0], sizes = [8, 128], strides = [1, 1]} : vector<8x384xf32> to vector<8x128xf32>
    %431 = vector.extract_strided_slice %429 {offsets = [0, 0], sizes = [8, 128], strides = [1, 1]} : vector<8x384xf32> to vector<8x128xf32>
    %432 = arith.addf %430, %431 : vector<8x128xf32>
    %433 = arith.negf %432 : vector<8x128xf32>
    %434 = math.exp %433 : vector<8x128xf32>
    %cst_102 = arith.constant 1.000000e+00 : f32
    %435 = vector.broadcast %cst_102 : f32 to vector<8x128xf32>
    %436 = arith.addf %435, %434 : vector<8x128xf32>
    %437 = arith.divf %435, %436 : vector<8x128xf32>
    %438 = vector.extract_strided_slice %427 {offsets = [0, 128], sizes = [8, 128], strides = [1, 1]} : vector<8x384xf32> to vector<8x128xf32>
    %439 = vector.extract_strided_slice %429 {offsets = [0, 128], sizes = [8, 128], strides = [1, 1]} : vector<8x384xf32> to vector<8x128xf32>
    %440 = arith.addf %438, %439 : vector<8x128xf32>
    %441 = arith.negf %440 : vector<8x128xf32>
    %442 = math.exp %441 : vector<8x128xf32>
    %cst_103 = arith.constant 1.000000e+00 : f32
    %443 = vector.broadcast %cst_103 : f32 to vector<8x128xf32>
    %444 = arith.addf %443, %442 : vector<8x128xf32>
    %445 = arith.divf %443, %444 : vector<8x128xf32>
    %446 = vector.extract_strided_slice %427 {offsets = [0, 256], sizes = [8, 128], strides = [1, 1]} : vector<8x384xf32> to vector<8x128xf32>
    %447 = vector.extract_strided_slice %429 {offsets = [0, 256], sizes = [8, 128], strides = [1, 1]} : vector<8x384xf32> to vector<8x128xf32>
    %448 = arith.addf %447, %19 : vector<8x128xf32>
    %449 = arith.mulf %437, %448 : vector<8x128xf32>
    %450 = arith.addf %446, %449 : vector<8x128xf32>
    %451 = math.tanh %450 : vector<8x128xf32>
    %cst_104 = arith.constant 1.000000e+00 : f32
    %452 = vector.broadcast %cst_104 : f32 to vector<8x128xf32>
    %453 = arith.subf %452, %445 : vector<8x128xf32>
    %454 = arith.mulf %453, %451 : vector<8x128xf32>
    %455 = arith.mulf %445, %370 : vector<8x128xf32>
    %456 = arith.addf %454, %455 : vector<8x128xf32>
    %457 = vector.shape_cast %424 : vector<8x1xi1> to vector<8x1xi1>
    %458 = vector.broadcast %457 : vector<8x1xi1> to vector<8x128xi1>
    %459 = arith.select %458, %456, %370 : vector<8x128xi1>, vector<8x128xf32>
    %460 = vector.shape_cast %424 : vector<8x1xi1> to vector<8x1xi1>
    %461 = vector.broadcast %460 : vector<8x1xi1> to vector<8x128xi1>
    %462 = arith.select %461, %459, %21 : vector<8x128xi1>, vector<8x128xf32>
    %463 = arith.index_cast %378 : i32 to index
    %c0_105 = arith.constant 0 : index
    %c0_106 = arith.constant 0 : index
    %464 = vector.load %arg12[%463, %c0_105, %c0_106] : memref<8x8x128xf32, #tpu.memory_space<vmem>>, vector<1x8x128xf32>
    %465 = vector.shape_cast %464 : vector<1x8x128xf32> to vector<8x128xf32>
    %466 = vector.shape_cast %462 : vector<8x128xf32> to vector<1x8x128xf32>
    tpu.vector_store %arg12[%463, %c0_105, %c0_106], %466 {strides = array<i32>} : memref<8x8x128xf32, #tpu.memory_space<vmem>>, vector<1x8x128xf32>,
    %c5_i32 = arith.constant 5 : i32
    %c7_i32_107 = arith.constant 7 : i32
    %467 = arith.subi %c7_i32_107, %c5_i32 : i32
    %468 = vector.broadcast %c5_i32 : i32 to vector<8x1xi32>
    %469 = arith.cmpi sgt, %20, %468 : vector<8x1xi32>
    %470 = arith.index_cast %c5_i32 : i32 to index
    %c0_108 = arith.constant 0 : index
    %c0_109 = arith.constant 0 : index
    %471 = vector.load %arg10[%470, %c0_108, %c0_109] : memref<8x8x384xf32, #tpu.memory_space<vmem>>, vector<1x8x384xf32>
    %472 = vector.shape_cast %471 : vector<1x8x384xf32> to vector<8x384xf32>
    %473 = arith.truncf %415 : vector<8x128xf32> to vector<8x128xbf16>
    %cst_110 = arith.constant dense<0.000000e+00> : vector<8x384xf32>
    %474 = tpu.matmul %473, %12, %cst_110 {dimension_numbers = #tpu.dot_dimension_numbers<[1], [0], [0], [1], [0, 0, 1, 1], [], []>} : vector<8x128xbf16>, vector<128x384xbf16>, vector<8x384xf32> -> vector<8x384xf32>
    %475 = vector.extract_strided_slice %472 {offsets = [0, 0], sizes = [8, 128], strides = [1, 1]} : vector<8x384xf32> to vector<8x128xf32>
    %476 = vector.extract_strided_slice %474 {offsets = [0, 0], sizes = [8, 128], strides = [1, 1]} : vector<8x384xf32> to vector<8x128xf32>
    %477 = arith.addf %475, %476 : vector<8x128xf32>
    %478 = arith.negf %477 : vector<8x128xf32>
    %479 = math.exp %478 : vector<8x128xf32>
    %cst_111 = arith.constant 1.000000e+00 : f32
    %480 = vector.broadcast %cst_111 : f32 to vector<8x128xf32>
    %481 = arith.addf %480, %479 : vector<8x128xf32>
    %482 = arith.divf %480, %481 : vector<8x128xf32>
    %483 = vector.extract_strided_slice %472 {offsets = [0, 128], sizes = [8, 128], strides = [1, 1]} : vector<8x384xf32> to vector<8x128xf32>
    %484 = vector.extract_strided_slice %474 {offsets = [0, 128], sizes = [8, 128], strides = [1, 1]} : vector<8x384xf32> to vector<8x128xf32>
    %485 = arith.addf %483, %484 : vector<8x128xf32>
    %486 = arith.negf %485 : vector<8x128xf32>
    %487 = math.exp %486 : vector<8x128xf32>
    %cst_112 = arith.constant 1.000000e+00 : f32
    %488 = vector.broadcast %cst_112 : f32 to vector<8x128xf32>
    %489 = arith.addf %488, %487 : vector<8x128xf32>
    %490 = arith.divf %488, %489 : vector<8x128xf32>
    %491 = vector.extract_strided_slice %472 {offsets = [0, 256], sizes = [8, 128], strides = [1, 1]} : vector<8x384xf32> to vector<8x128xf32>
    %492 = vector.extract_strided_slice %474 {offsets = [0, 256], sizes = [8, 128], strides = [1, 1]} : vector<8x384xf32> to vector<8x128xf32>
    %493 = arith.addf %492, %16 : vector<8x128xf32>
    %494 = arith.mulf %482, %493 : vector<8x128xf32>
    %495 = arith.addf %491, %494 : vector<8x128xf32>
    %496 = math.tanh %495 : vector<8x128xf32>
    %cst_113 = arith.constant 1.000000e+00 : f32
    %497 = vector.broadcast %cst_113 : f32 to vector<8x128xf32>
    %498 = arith.subf %497, %490 : vector<8x128xf32>
    %499 = arith.mulf %498, %496 : vector<8x128xf32>
    %500 = arith.mulf %490, %415 : vector<8x128xf32>
    %501 = arith.addf %499, %500 : vector<8x128xf32>
    %502 = vector.shape_cast %469 : vector<8x1xi1> to vector<8x1xi1>
    %503 = vector.broadcast %502 : vector<8x1xi1> to vector<8x128xi1>
    %504 = arith.select %503, %501, %415 : vector<8x128xi1>, vector<8x128xf32>
    %505 = vector.shape_cast %469 : vector<8x1xi1> to vector<8x1xi1>
    %506 = vector.broadcast %505 : vector<8x1xi1> to vector<8x128xi1>
    %507 = arith.select %506, %504, %21 : vector<8x128xi1>, vector<8x128xf32>
    %508 = arith.index_cast %c5_i32 : i32 to index
    %c0_114 = arith.constant 0 : index
    %c0_115 = arith.constant 0 : index
    %509 = vector.load %arg9[%508, %c0_114, %c0_115] : memref<8x8x128xf32, #tpu.memory_space<vmem>>, vector<1x8x128xf32>
    %510 = vector.shape_cast %509 : vector<1x8x128xf32> to vector<8x128xf32>
    %511 = vector.shape_cast %507 : vector<8x128xf32> to vector<1x8x128xf32>
    tpu.vector_store %arg9[%508, %c0_114, %c0_115], %511 {strides = array<i32>} : memref<8x8x128xf32, #tpu.memory_space<vmem>>, vector<1x8x128xf32>,
    %512 = vector.broadcast %467 : i32 to vector<8x1xi32>
    %513 = arith.cmpi sgt, %20, %512 : vector<8x1xi32>
    %514 = arith.index_cast %467 : i32 to index
    %c0_116 = arith.constant 0 : index
    %c0_117 = arith.constant 0 : index
    %515 = vector.load %arg11[%514, %c0_116, %c0_117] : memref<8x8x384xf32, #tpu.memory_space<vmem>>, vector<1x8x384xf32>
    %516 = vector.shape_cast %515 : vector<1x8x384xf32> to vector<8x384xf32>
    %517 = arith.truncf %459 : vector<8x128xf32> to vector<8x128xbf16>
    %cst_118 = arith.constant dense<0.000000e+00> : vector<8x384xf32>
    %518 = tpu.matmul %517, %13, %cst_118 {dimension_numbers = #tpu.dot_dimension_numbers<[1], [0], [0], [1], [0, 0, 1, 1], [], []>} : vector<8x128xbf16>, vector<128x384xbf16>, vector<8x384xf32> -> vector<8x384xf32>
    %519 = vector.extract_strided_slice %516 {offsets = [0, 0], sizes = [8, 128], strides = [1, 1]} : vector<8x384xf32> to vector<8x128xf32>
    %520 = vector.extract_strided_slice %518 {offsets = [0, 0], sizes = [8, 128], strides = [1, 1]} : vector<8x384xf32> to vector<8x128xf32>
    %521 = arith.addf %519, %520 : vector<8x128xf32>
    %522 = arith.negf %521 : vector<8x128xf32>
    %523 = math.exp %522 : vector<8x128xf32>
    %cst_119 = arith.constant 1.000000e+00 : f32
    %524 = vector.broadcast %cst_119 : f32 to vector<8x128xf32>
    %525 = arith.addf %524, %523 : vector<8x128xf32>
    %526 = arith.divf %524, %525 : vector<8x128xf32>
    %527 = vector.extract_strided_slice %516 {offsets = [0, 128], sizes = [8, 128], strides = [1, 1]} : vector<8x384xf32> to vector<8x128xf32>
    %528 = vector.extract_strided_slice %518 {offsets = [0, 128], sizes = [8, 128], strides = [1, 1]} : vector<8x384xf32> to vector<8x128xf32>
    %529 = arith.addf %527, %528 : vector<8x128xf32>
    %530 = arith.negf %529 : vector<8x128xf32>
    %531 = math.exp %530 : vector<8x128xf32>
    %cst_120 = arith.constant 1.000000e+00 : f32
    %532 = vector.broadcast %cst_120 : f32 to vector<8x128xf32>
    %533 = arith.addf %532, %531 : vector<8x128xf32>
    %534 = arith.divf %532, %533 : vector<8x128xf32>
    %535 = vector.extract_strided_slice %516 {offsets = [0, 256], sizes = [8, 128], strides = [1, 1]} : vector<8x384xf32> to vector<8x128xf32>
    %536 = vector.extract_strided_slice %518 {offsets = [0, 256], sizes = [8, 128], strides = [1, 1]} : vector<8x384xf32> to vector<8x128xf32>
    %537 = arith.addf %536, %19 : vector<8x128xf32>
    %538 = arith.mulf %526, %537 : vector<8x128xf32>
    %539 = arith.addf %535, %538 : vector<8x128xf32>
    %540 = math.tanh %539 : vector<8x128xf32>
    %cst_121 = arith.constant 1.000000e+00 : f32
    %541 = vector.broadcast %cst_121 : f32 to vector<8x128xf32>
    %542 = arith.subf %541, %534 : vector<8x128xf32>
    %543 = arith.mulf %542, %540 : vector<8x128xf32>
    %544 = arith.mulf %534, %459 : vector<8x128xf32>
    %545 = arith.addf %543, %544 : vector<8x128xf32>
    %546 = vector.shape_cast %513 : vector<8x1xi1> to vector<8x1xi1>
    %547 = vector.broadcast %546 : vector<8x1xi1> to vector<8x128xi1>
    %548 = arith.select %547, %545, %459 : vector<8x128xi1>, vector<8x128xf32>
    %549 = vector.shape_cast %513 : vector<8x1xi1> to vector<8x1xi1>
    %550 = vector.broadcast %549 : vector<8x1xi1> to vector<8x128xi1>
    %551 = arith.select %550, %548, %21 : vector<8x128xi1>, vector<8x128xf32>
    %552 = arith.index_cast %467 : i32 to index
    %c0_122 = arith.constant 0 : index
    %c0_123 = arith.constant 0 : index
    %553 = vector.load %arg12[%552, %c0_122, %c0_123] : memref<8x8x128xf32, #tpu.memory_space<vmem>>, vector<1x8x128xf32>
    %554 = vector.shape_cast %553 : vector<1x8x128xf32> to vector<8x128xf32>
    %555 = vector.shape_cast %551 : vector<8x128xf32> to vector<1x8x128xf32>
    tpu.vector_store %arg12[%552, %c0_122, %c0_123], %555 {strides = array<i32>} : memref<8x8x128xf32, #tpu.memory_space<vmem>>, vector<1x8x128xf32>,
    %c6_i32 = arith.constant 6 : i32
    %c7_i32_124 = arith.constant 7 : i32
    %556 = arith.subi %c7_i32_124, %c6_i32 : i32
    %557 = vector.broadcast %c6_i32 : i32 to vector<8x1xi32>
    %558 = arith.cmpi sgt, %20, %557 : vector<8x1xi32>
    %559 = arith.index_cast %c6_i32 : i32 to index
    %c0_125 = arith.constant 0 : index
    %c0_126 = arith.constant 0 : index
    %560 = vector.load %arg10[%559, %c0_125, %c0_126] : memref<8x8x384xf32, #tpu.memory_space<vmem>>, vector<1x8x384xf32>
    %561 = vector.shape_cast %560 : vector<1x8x384xf32> to vector<8x384xf32>
    %562 = arith.truncf %504 : vector<8x128xf32> to vector<8x128xbf16>
    %cst_127 = arith.constant dense<0.000000e+00> : vector<8x384xf32>
    %563 = tpu.matmul %562, %12, %cst_127 {dimension_numbers = #tpu.dot_dimension_numbers<[1], [0], [0], [1], [0, 0, 1, 1], [], []>} : vector<8x128xbf16>, vector<128x384xbf16>, vector<8x384xf32> -> vector<8x384xf32>
    %564 = vector.extract_strided_slice %561 {offsets = [0, 0], sizes = [8, 128], strides = [1, 1]} : vector<8x384xf32> to vector<8x128xf32>
    %565 = vector.extract_strided_slice %563 {offsets = [0, 0], sizes = [8, 128], strides = [1, 1]} : vector<8x384xf32> to vector<8x128xf32>
    %566 = arith.addf %564, %565 : vector<8x128xf32>
    %567 = arith.negf %566 : vector<8x128xf32>
    %568 = math.exp %567 : vector<8x128xf32>
    %cst_128 = arith.constant 1.000000e+00 : f32
    %569 = vector.broadcast %cst_128 : f32 to vector<8x128xf32>
    %570 = arith.addf %569, %568 : vector<8x128xf32>
    %571 = arith.divf %569, %570 : vector<8x128xf32>
    %572 = vector.extract_strided_slice %561 {offsets = [0, 128], sizes = [8, 128], strides = [1, 1]} : vector<8x384xf32> to vector<8x128xf32>
    %573 = vector.extract_strided_slice %563 {offsets = [0, 128], sizes = [8, 128], strides = [1, 1]} : vector<8x384xf32> to vector<8x128xf32>
    %574 = arith.addf %572, %573 : vector<8x128xf32>
    %575 = arith.negf %574 : vector<8x128xf32>
    %576 = math.exp %575 : vector<8x128xf32>
    %cst_129 = arith.constant 1.000000e+00 : f32
    %577 = vector.broadcast %cst_129 : f32 to vector<8x128xf32>
    %578 = arith.addf %577, %576 : vector<8x128xf32>
    %579 = arith.divf %577, %578 : vector<8x128xf32>
    %580 = vector.extract_strided_slice %561 {offsets = [0, 256], sizes = [8, 128], strides = [1, 1]} : vector<8x384xf32> to vector<8x128xf32>
    %581 = vector.extract_strided_slice %563 {offsets = [0, 256], sizes = [8, 128], strides = [1, 1]} : vector<8x384xf32> to vector<8x128xf32>
    %582 = arith.addf %581, %16 : vector<8x128xf32>
    %583 = arith.mulf %571, %582 : vector<8x128xf32>
    %584 = arith.addf %580, %583 : vector<8x128xf32>
    %585 = math.tanh %584 : vector<8x128xf32>
    %cst_130 = arith.constant 1.000000e+00 : f32
    %586 = vector.broadcast %cst_130 : f32 to vector<8x128xf32>
    %587 = arith.subf %586, %579 : vector<8x128xf32>
    %588 = arith.mulf %587, %585 : vector<8x128xf32>
    %589 = arith.mulf %579, %504 : vector<8x128xf32>
    %590 = arith.addf %588, %589 : vector<8x128xf32>
    %591 = vector.shape_cast %558 : vector<8x1xi1> to vector<8x1xi1>
    %592 = vector.broadcast %591 : vector<8x1xi1> to vector<8x128xi1>
    %593 = arith.select %592, %590, %504 : vector<8x128xi1>, vector<8x128xf32>
    %594 = vector.shape_cast %558 : vector<8x1xi1> to vector<8x1xi1>
    %595 = vector.broadcast %594 : vector<8x1xi1> to vector<8x128xi1>
    %596 = arith.select %595, %593, %21 : vector<8x128xi1>, vector<8x128xf32>
    %597 = arith.index_cast %c6_i32 : i32 to index
    %c0_131 = arith.constant 0 : index
    %c0_132 = arith.constant 0 : index
    %598 = vector.load %arg9[%597, %c0_131, %c0_132] : memref<8x8x128xf32, #tpu.memory_space<vmem>>, vector<1x8x128xf32>
    %599 = vector.shape_cast %598 : vector<1x8x128xf32> to vector<8x128xf32>
    %600 = vector.shape_cast %596 : vector<8x128xf32> to vector<1x8x128xf32>
    tpu.vector_store %arg9[%597, %c0_131, %c0_132], %600 {strides = array<i32>} : memref<8x8x128xf32, #tpu.memory_space<vmem>>, vector<1x8x128xf32>,
    %601 = vector.broadcast %556 : i32 to vector<8x1xi32>
    %602 = arith.cmpi sgt, %20, %601 : vector<8x1xi32>
    %603 = arith.index_cast %556 : i32 to index
    %c0_133 = arith.constant 0 : index
    %c0_134 = arith.constant 0 : index
    %604 = vector.load %arg11[%603, %c0_133, %c0_134] : memref<8x8x384xf32, #tpu.memory_space<vmem>>, vector<1x8x384xf32>
    %605 = vector.shape_cast %604 : vector<1x8x384xf32> to vector<8x384xf32>
    %606 = arith.truncf %548 : vector<8x128xf32> to vector<8x128xbf16>
    %cst_135 = arith.constant dense<0.000000e+00> : vector<8x384xf32>
    %607 = tpu.matmul %606, %13, %cst_135 {dimension_numbers = #tpu.dot_dimension_numbers<[1], [0], [0], [1], [0, 0, 1, 1], [], []>} : vector<8x128xbf16>, vector<128x384xbf16>, vector<8x384xf32> -> vector<8x384xf32>
    %608 = vector.extract_strided_slice %605 {offsets = [0, 0], sizes = [8, 128], strides = [1, 1]} : vector<8x384xf32> to vector<8x128xf32>
    %609 = vector.extract_strided_slice %607 {offsets = [0, 0], sizes = [8, 128], strides = [1, 1]} : vector<8x384xf32> to vector<8x128xf32>
    %610 = arith.addf %608, %609 : vector<8x128xf32>
    %611 = arith.negf %610 : vector<8x128xf32>
    %612 = math.exp %611 : vector<8x128xf32>
    %cst_136 = arith.constant 1.000000e+00 : f32
    %613 = vector.broadcast %cst_136 : f32 to vector<8x128xf32>
    %614 = arith.addf %613, %612 : vector<8x128xf32>
    %615 = arith.divf %613, %614 : vector<8x128xf32>
    %616 = vector.extract_strided_slice %605 {offsets = [0, 128], sizes = [8, 128], strides = [1, 1]} : vector<8x384xf32> to vector<8x128xf32>
    %617 = vector.extract_strided_slice %607 {offsets = [0, 128], sizes = [8, 128], strides = [1, 1]} : vector<8x384xf32> to vector<8x128xf32>
    %618 = arith.addf %616, %617 : vector<8x128xf32>
    %619 = arith.negf %618 : vector<8x128xf32>
    %620 = math.exp %619 : vector<8x128xf32>
    %cst_137 = arith.constant 1.000000e+00 : f32
    %621 = vector.broadcast %cst_137 : f32 to vector<8x128xf32>
    %622 = arith.addf %621, %620 : vector<8x128xf32>
    %623 = arith.divf %621, %622 : vector<8x128xf32>
    %624 = vector.extract_strided_slice %605 {offsets = [0, 256], sizes = [8, 128], strides = [1, 1]} : vector<8x384xf32> to vector<8x128xf32>
    %625 = vector.extract_strided_slice %607 {offsets = [0, 256], sizes = [8, 128], strides = [1, 1]} : vector<8x384xf32> to vector<8x128xf32>
    %626 = arith.addf %625, %19 : vector<8x128xf32>
    %627 = arith.mulf %615, %626 : vector<8x128xf32>
    %628 = arith.addf %624, %627 : vector<8x128xf32>
    %629 = math.tanh %628 : vector<8x128xf32>
    %cst_138 = arith.constant 1.000000e+00 : f32
    %630 = vector.broadcast %cst_138 : f32 to vector<8x128xf32>
    %631 = arith.subf %630, %623 : vector<8x128xf32>
    %632 = arith.mulf %631, %629 : vector<8x128xf32>
    %633 = arith.mulf %623, %548 : vector<8x128xf32>
    %634 = arith.addf %632, %633 : vector<8x128xf32>
    %635 = vector.shape_cast %602 : vector<8x1xi1> to vector<8x1xi1>
    %636 = vector.broadcast %635 : vector<8x1xi1> to vector<8x128xi1>
    %637 = arith.select %636, %634, %548 : vector<8x128xi1>, vector<8x128xf32>
    %638 = vector.shape_cast %602 : vector<8x1xi1> to vector<8x1xi1>
    %639 = vector.broadcast %638 : vector<8x1xi1> to vector<8x128xi1>
    %640 = arith.select %639, %637, %21 : vector<8x128xi1>, vector<8x128xf32>
    %641 = arith.index_cast %556 : i32 to index
    %c0_139 = arith.constant 0 : index
    %c0_140 = arith.constant 0 : index
    %642 = vector.load %arg12[%641, %c0_139, %c0_140] : memref<8x8x128xf32, #tpu.memory_space<vmem>>, vector<1x8x128xf32>
    %643 = vector.shape_cast %642 : vector<1x8x128xf32> to vector<8x128xf32>
    %644 = vector.shape_cast %640 : vector<8x128xf32> to vector<1x8x128xf32>
    tpu.vector_store %arg12[%641, %c0_139, %c0_140], %644 {strides = array<i32>} : memref<8x8x128xf32, #tpu.memory_space<vmem>>, vector<1x8x128xf32>,
    %c7_i32_141 = arith.constant 7 : i32
    %c7_i32_142 = arith.constant 7 : i32
    %645 = arith.subi %c7_i32_142, %c7_i32_141 : i32
    %646 = vector.broadcast %c7_i32_141 : i32 to vector<8x1xi32>
    %647 = arith.cmpi sgt, %20, %646 : vector<8x1xi32>
    %648 = arith.index_cast %c7_i32_141 : i32 to index
    %c0_143 = arith.constant 0 : index
    %c0_144 = arith.constant 0 : index
    %649 = vector.load %arg10[%648, %c0_143, %c0_144] : memref<8x8x384xf32, #tpu.memory_space<vmem>>, vector<1x8x384xf32>
    %650 = vector.shape_cast %649 : vector<1x8x384xf32> to vector<8x384xf32>
    %651 = arith.truncf %593 : vector<8x128xf32> to vector<8x128xbf16>
    %cst_145 = arith.constant dense<0.000000e+00> : vector<8x384xf32>
    %652 = tpu.matmul %651, %12, %cst_145 {dimension_numbers = #tpu.dot_dimension_numbers<[1], [0], [0], [1], [0, 0, 1, 1], [], []>} : vector<8x128xbf16>, vector<128x384xbf16>, vector<8x384xf32> -> vector<8x384xf32>
    %653 = vector.extract_strided_slice %650 {offsets = [0, 0], sizes = [8, 128], strides = [1, 1]} : vector<8x384xf32> to vector<8x128xf32>
    %654 = vector.extract_strided_slice %652 {offsets = [0, 0], sizes = [8, 128], strides = [1, 1]} : vector<8x384xf32> to vector<8x128xf32>
    %655 = arith.addf %653, %654 : vector<8x128xf32>
    %656 = arith.negf %655 : vector<8x128xf32>
    %657 = math.exp %656 : vector<8x128xf32>
    %cst_146 = arith.constant 1.000000e+00 : f32
    %658 = vector.broadcast %cst_146 : f32 to vector<8x128xf32>
    %659 = arith.addf %658, %657 : vector<8x128xf32>
    %660 = arith.divf %658, %659 : vector<8x128xf32>
    %661 = vector.extract_strided_slice %650 {offsets = [0, 128], sizes = [8, 128], strides = [1, 1]} : vector<8x384xf32> to vector<8x128xf32>
    %662 = vector.extract_strided_slice %652 {offsets = [0, 128], sizes = [8, 128], strides = [1, 1]} : vector<8x384xf32> to vector<8x128xf32>
    %663 = arith.addf %661, %662 : vector<8x128xf32>
    %664 = arith.negf %663 : vector<8x128xf32>
    %665 = math.exp %664 : vector<8x128xf32>
    %cst_147 = arith.constant 1.000000e+00 : f32
    %666 = vector.broadcast %cst_147 : f32 to vector<8x128xf32>
    %667 = arith.addf %666, %665 : vector<8x128xf32>
    %668 = arith.divf %666, %667 : vector<8x128xf32>
    %669 = vector.extract_strided_slice %650 {offsets = [0, 256], sizes = [8, 128], strides = [1, 1]} : vector<8x384xf32> to vector<8x128xf32>
    %670 = vector.extract_strided_slice %652 {offsets = [0, 256], sizes = [8, 128], strides = [1, 1]} : vector<8x384xf32> to vector<8x128xf32>
    %671 = arith.addf %670, %16 : vector<8x128xf32>
    %672 = arith.mulf %660, %671 : vector<8x128xf32>
    %673 = arith.addf %669, %672 : vector<8x128xf32>
    %674 = math.tanh %673 : vector<8x128xf32>
    %cst_148 = arith.constant 1.000000e+00 : f32
    %675 = vector.broadcast %cst_148 : f32 to vector<8x128xf32>
    %676 = arith.subf %675, %668 : vector<8x128xf32>
    %677 = arith.mulf %676, %674 : vector<8x128xf32>
    %678 = arith.mulf %668, %593 : vector<8x128xf32>
    %679 = arith.addf %677, %678 : vector<8x128xf32>
    %680 = vector.shape_cast %647 : vector<8x1xi1> to vector<8x1xi1>
    %681 = vector.broadcast %680 : vector<8x1xi1> to vector<8x128xi1>
    %682 = arith.select %681, %679, %593 : vector<8x128xi1>, vector<8x128xf32>
    %683 = vector.shape_cast %647 : vector<8x1xi1> to vector<8x1xi1>
    %684 = vector.broadcast %683 : vector<8x1xi1> to vector<8x128xi1>
    %685 = arith.select %684, %682, %21 : vector<8x128xi1>, vector<8x128xf32>
    %686 = arith.index_cast %c7_i32_141 : i32 to index
    %c0_149 = arith.constant 0 : index
    %c0_150 = arith.constant 0 : index
    %687 = vector.load %arg9[%686, %c0_149, %c0_150] : memref<8x8x128xf32, #tpu.memory_space<vmem>>, vector<1x8x128xf32>
    %688 = vector.shape_cast %687 : vector<1x8x128xf32> to vector<8x128xf32>
    %689 = vector.shape_cast %685 : vector<8x128xf32> to vector<1x8x128xf32>
    tpu.vector_store %arg9[%686, %c0_149, %c0_150], %689 {strides = array<i32>} : memref<8x8x128xf32, #tpu.memory_space<vmem>>, vector<1x8x128xf32>,
    %690 = vector.broadcast %645 : i32 to vector<8x1xi32>
    %691 = arith.cmpi sgt, %20, %690 : vector<8x1xi32>
    %692 = arith.index_cast %645 : i32 to index
    %c0_151 = arith.constant 0 : index
    %c0_152 = arith.constant 0 : index
    %693 = vector.load %arg11[%692, %c0_151, %c0_152] : memref<8x8x384xf32, #tpu.memory_space<vmem>>, vector<1x8x384xf32>
    %694 = vector.shape_cast %693 : vector<1x8x384xf32> to vector<8x384xf32>
    %695 = arith.truncf %637 : vector<8x128xf32> to vector<8x128xbf16>
    %cst_153 = arith.constant dense<0.000000e+00> : vector<8x384xf32>
    %696 = tpu.matmul %695, %13, %cst_153 {dimension_numbers = #tpu.dot_dimension_numbers<[1], [0], [0], [1], [0, 0, 1, 1], [], []>} : vector<8x128xbf16>, vector<128x384xbf16>, vector<8x384xf32> -> vector<8x384xf32>
    %697 = vector.extract_strided_slice %694 {offsets = [0, 0], sizes = [8, 128], strides = [1, 1]} : vector<8x384xf32> to vector<8x128xf32>
    %698 = vector.extract_strided_slice %696 {offsets = [0, 0], sizes = [8, 128], strides = [1, 1]} : vector<8x384xf32> to vector<8x128xf32>
    %699 = arith.addf %697, %698 : vector<8x128xf32>
    %700 = arith.negf %699 : vector<8x128xf32>
    %701 = math.exp %700 : vector<8x128xf32>
    %cst_154 = arith.constant 1.000000e+00 : f32
    %702 = vector.broadcast %cst_154 : f32 to vector<8x128xf32>
    %703 = arith.addf %702, %701 : vector<8x128xf32>
    %704 = arith.divf %702, %703 : vector<8x128xf32>
    %705 = vector.extract_strided_slice %694 {offsets = [0, 128], sizes = [8, 128], strides = [1, 1]} : vector<8x384xf32> to vector<8x128xf32>
    %706 = vector.extract_strided_slice %696 {offsets = [0, 128], sizes = [8, 128], strides = [1, 1]} : vector<8x384xf32> to vector<8x128xf32>
    %707 = arith.addf %705, %706 : vector<8x128xf32>
    %708 = arith.negf %707 : vector<8x128xf32>
    %709 = math.exp %708 : vector<8x128xf32>
    %cst_155 = arith.constant 1.000000e+00 : f32
    %710 = vector.broadcast %cst_155 : f32 to vector<8x128xf32>
    %711 = arith.addf %710, %709 : vector<8x128xf32>
    %712 = arith.divf %710, %711 : vector<8x128xf32>
    %713 = vector.extract_strided_slice %694 {offsets = [0, 256], sizes = [8, 128], strides = [1, 1]} : vector<8x384xf32> to vector<8x128xf32>
    %714 = vector.extract_strided_slice %696 {offsets = [0, 256], sizes = [8, 128], strides = [1, 1]} : vector<8x384xf32> to vector<8x128xf32>
    %715 = arith.addf %714, %19 : vector<8x128xf32>
    %716 = arith.mulf %704, %715 : vector<8x128xf32>
    %717 = arith.addf %713, %716 : vector<8x128xf32>
    %718 = math.tanh %717 : vector<8x128xf32>
    %cst_156 = arith.constant 1.000000e+00 : f32
    %719 = vector.broadcast %cst_156 : f32 to vector<8x128xf32>
    %720 = arith.subf %719, %712 : vector<8x128xf32>
    %721 = arith.mulf %720, %718 : vector<8x128xf32>
    %722 = arith.mulf %712, %637 : vector<8x128xf32>
    %723 = arith.addf %721, %722 : vector<8x128xf32>
    %724 = vector.shape_cast %691 : vector<8x1xi1> to vector<8x1xi1>
    %725 = vector.broadcast %724 : vector<8x1xi1> to vector<8x128xi1>
    %726 = arith.select %725, %723, %637 : vector<8x128xi1>, vector<8x128xf32>
    %727 = vector.shape_cast %691 : vector<8x1xi1> to vector<8x1xi1>
    %728 = vector.broadcast %727 : vector<8x1xi1> to vector<8x128xi1>
    %729 = arith.select %728, %726, %21 : vector<8x128xi1>, vector<8x128xf32>
    %730 = arith.index_cast %645 : i32 to index
    %c0_157 = arith.constant 0 : index
    %c0_158 = arith.constant 0 : index
    %731 = vector.load %arg12[%730, %c0_157, %c0_158] : memref<8x8x128xf32, #tpu.memory_space<vmem>>, vector<1x8x128xf32>
    %732 = vector.shape_cast %731 : vector<1x8x128xf32> to vector<8x128xf32>
    %733 = vector.shape_cast %729 : vector<8x128xf32> to vector<1x8x128xf32>
    tpu.vector_store %arg12[%730, %c0_157, %c0_158], %733 {strides = array<i32>} : memref<8x8x128xf32, #tpu.memory_space<vmem>>, vector<1x8x128xf32>,
    %c8_i32 = arith.constant 8 : i32
    %c0_159 = arith.constant 0 : index
    %c0_160 = arith.constant 0 : index
    %c0_161 = arith.constant 0 : index
    %734 = vector.load %arg9[%c0_159, %c0_160, %c0_161] : memref<8x8x128xf32, #tpu.memory_space<vmem>>, vector<8x8x128xf32>
    %c0_162 = arith.constant 0 : index
    %c0_163 = arith.constant 0 : index
    %c0_164 = arith.constant 0 : index
    %735 = vector.load %arg12[%c0_162, %c0_163, %c0_164] : memref<8x8x128xf32, #tpu.memory_space<vmem>>, vector<8x8x128xf32>
    %736 = arith.addf %734, %735 : vector<8x8x128xf32>
    %cst_165 = arith.constant 5.000000e-01 : f32
    %737 = vector.broadcast %cst_165 : f32 to vector<8x8x128xf32>
    %738 = arith.mulf %736, %737 : vector<8x8x128xf32>
    %739 = arith.mulf %738, %738 : vector<8x8x128xf32>
    %cst_166 = arith.constant dense<0.000000e+00> : vector<8x8xf32>
    %740 = vector.multi_reduction <add>, %739, %cst_166 [2] : vector<8x8x128xf32> to vector<8x8xf32>
    %741 = vector.shape_cast %740 : vector<8x8xf32> to vector<8x8x1xf32>
    %742 = math.sqrt %741 : vector<8x8x1xf32>
    %cst_167 = arith.constant 9.99999993E-9 : f32
    %743 = vector.broadcast %cst_167 : f32 to vector<8x8x1xf32>
    %744 = arith.addf %742, %743 : vector<8x8x1xf32>
    %745 = tpu.reciprocal %744 {approx = true} : vector<8x8x1xf32> -> vector<8x8x1xf32>
    %746 = vector.broadcast %745 : vector<8x8x1xf32> to vector<8x8x128xf32>
    %747 = arith.mulf %738, %746 : vector<8x8x128xf32>
    %c0_168 = arith.constant 0 : index
    %c0_169 = arith.constant 0 : index
    %c0_170 = arith.constant 0 : index
    %748 = vector.load %arg9[%c0_168, %c0_169, %c0_170] : memref<8x8x128xf32, #tpu.memory_space<vmem>>, vector<8x8x128xf32>
    tpu.vector_store %arg9[%c0_168, %c0_169, %c0_170], %747 {strides = array<i32>} : memref<8x8x128xf32, #tpu.memory_space<vmem>>, vector<8x8x128xf32>,
    return
  }
  func.func @transform_0(%arg0: i32) -> (i32, i32, i32) {
    %c0_i32 = arith.constant 0 : i32
    %c0_i32_0 = arith.constant 0 : i32
    %c0_i32_1 = arith.constant 0 : i32
    return %c0_i32, %arg0, %c0_i32_0 : i32, i32, i32
  }
  func.func @transform_1(%arg0: i32) -> (i32, i32) {
    %c0_i32 = arith.constant 0 : i32
    %c0_i32_0 = arith.constant 0 : i32
    return %arg0, %c0_i32 : i32, i32
  }
  func.func @transform_2(%arg0: i32) -> (i32, i32) {
    %c0_i32 = arith.constant 0 : i32
    %c0_i32_0 = arith.constant 0 : i32
    %c0_i32_1 = arith.constant 0 : i32
    return %c0_i32, %c0_i32_0 : i32, i32
  }
  func.func @transform_3(%arg0: i32) -> (i32, i32) {
    %c0_i32 = arith.constant 0 : i32
    %c0_i32_0 = arith.constant 0 : i32
    %c0_i32_1 = arith.constant 0 : i32
    return %c0_i32, %c0_i32_0 : i32, i32
  }
  func.func @transform_4(%arg0: i32) -> (i32, i32) {
    %c0_i32 = arith.constant 0 : i32
    %c0_i32_0 = arith.constant 0 : i32
    %c0_i32_1 = arith.constant 0 : i32
    return %c0_i32, %c0_i32_0 : i32, i32
  }
  func.func @transform_5(%arg0: i32) -> (i32, i32) {
    %c0_i32 = arith.constant 0 : i32
    %c0_i32_0 = arith.constant 0 : i32
    %c0_i32_1 = arith.constant 0 : i32
    return %c0_i32, %c0_i32_0 : i32, i32
  }
  func.func @transform_6(%arg0: i32) -> (i32, i32) {
    %c0_i32 = arith.constant 0 : i32
    %c0_i32_0 = arith.constant 0 : i32
    %c0_i32_1 = arith.constant 0 : i32
    return %c0_i32, %c0_i32_0 : i32, i32
  }
  func.func @transform_7(%arg0: i32) -> (i32, i32) {
    %c0_i32 = arith.constant 0 : i32
    %c0_i32_0 = arith.constant 0 : i32
    %c0_i32_1 = arith.constant 0 : i32
    return %c0_i32, %c0_i32_0 : i32, i32
  }
  func.func @transform_8(%arg0: i32) -> (i32, i32, i32) {
    %c0_i32 = arith.constant 0 : i32
    %c0_i32_0 = arith.constant 0 : i32
    %c0_i32_1 = arith.constant 0 : i32
    return %c0_i32, %arg0, %c0_i32_0 : i32, i32, i32
  }
}

</mosaic_0001>

<bundles_post_ra>
// kernel: encoder_text_forward.1
= control target key start
LH: loop header
LB: loop body
LE: loop exit
PB: predicated region body
PF: predicated region fallthrough
CT: control target
= control target key end

     0   :  { %v5923_v1 = vmov 0   ;;  %vm4012_vm4 = vmmov 0   ;;  %s5912_s2 = inlined_call_operand.vmem [shape: bf16[128,768], index: 2, kind: input, shape index: {}]   ;;  %s5913_s0 = inlined_call_operand.vmem [shape: bf16[8,8,128], index: 0, kind: input, shape index: {}]   ;;  %s5914_s4 = inlined_call_operand.vmem [shape: bf16[128,384], index: 4, kind: input, shape index: {}]   ;;  %s5915_s6 = inlined_call_operand.vmem [shape: bf16[128,384], index: 6, kind: input, shape index: {}]   ;;  %s5916_s1 = inlined_call_operand.vmem [shape: s32[8,1], index: 1, kind: input, shape index: {}]   ;;  %s5917_s3 = inlined_call_operand.vmem [shape: f32[1,768], index: 3, kind: input, shape index: {}]   ;;  %s5918_s5 = inlined_call_operand.vmem [shape: f32[1,128], index: 5, kind: input, shape index: {}]   ;;  %s5919_s8 = inlined_call_operand.vmem [shape: f32[8,8,128], index: 8, kind: output, shape index: {}]   ;;  %s5920_s7 = inlined_call_operand.vmem [shape: f32[1,128], index: 7, kind: input, shape index: {}]  }
   0x1   :  { %v3584_v0 = vld [vmem:[%s5912_s2 + $0x4] ss:$24 sps:$4 sm:$0xff]   ;;  %414 = vmatprep.mubr.bf16.mxu0 %v5923_v1  ;;  %487 = vmatprep.mubr.bf16.mxu1 %v5923_v1  ;;  %v3588_v3 = vld [vmem:[%s5912_s2] ss:$24 sps:$4 sm:$0xff]   ;;  %v3590_v5 = vld [vmem:[%s5912_s2 + $0x34] ss:$24 sps:$4 sm:$0xff]  }
   0x2   :  { %v3586_v2 = vld [vmem:[%s5912_s2 + $0xc] ss:$24 sps:$4 sm:$0xff]   ;;  %3582 = vset.pattern.permute.xlu0 %v5923_v1  ;;  %3583 = vset.pattern.permute.xlu1 %v5923_v1  ;;  %v3589_v4 = vld [vmem:[%s5912_s2 + $0x8] ss:$24 sps:$4 sm:$0xff]   ;;  %v3592_v6 = vld [vmem:[%s5912_s2 + $0x3c] ss:$24 sps:$4 sm:$0xff]  }
   0x3   :  { %382 = vmatprep.subr.bf16.mxu0 %v3584_v0  ;;  %455 = vmatprep.subr.bf16.mxu1 %v3586_v2  ;;  %v3594_v7 = vld [vmem:[%s5912_s2 + $0x30] ss:$24 sps:$4 sm:$0xff]   ;;  %v3596_v9 = vld [vmem:[%s5912_s2 + $0x64] ss:$24 sps:$4 sm:$0xff]   ;;  %v3600_v11 = vld [vmem:[%s5912_s2 + $0x60] ss:$24 sps:$4 sm:$0xff]  }
   0x4   :  { %383 = vmatpush1.bf16.msra.mxu0 %v3588_v3  ;;  %456 = vmatpush1.bf16.msra.mxu1 %v3589_v4  ;;  %v3595_v8 = vld [vmem:[%s5912_s2 + $0x38] ss:$24 sps:$4 sm:$0xff]   ;;  %v3598_v10 = vld [vmem:[%s5912_s2 + $0x6c] ss:$24 sps:$4 sm:$0xff]   ;;  %v3601_v12 = vld [vmem:[%s5912_s2 + $0x68] ss:$24 sps:$4 sm:$0xff]  }
   0x5   :  { %384 = vmatprep.subr.bf16.mxu0 %v3590_v5  ;;  %457 = vmatprep.subr.bf16.mxu1 %v3592_v6  ;;  %v3602_v13 = vld [vmem:[%s5912_s2 + $0x94] ss:$24 sps:$4 sm:$0xff]   ;;  %v3606_v15 = vld [vmem:[%s5912_s2 + $0x90] ss:$24 sps:$4 sm:$0xff]   ;;  %v3608_v17 = vld [vmem:[%s5912_s2 + $0xc4] ss:$24 sps:$4 sm:$0xff]  }
   0x6   :  { %v3604_v14 = vld [vmem:[%s5912_s2 + $0x9c] ss:$24 sps:$4 sm:$0xff]   ;;  %v3607_v16 = vld [vmem:[%s5912_s2 + $0x98] ss:$24 sps:$4 sm:$0xff]   ;;  %v3610_v18 = vld [vmem:[%s5912_s2 + $0xcc] ss:$24 sps:$4 sm:$0xff]  }
   0x7   :  { %v3612_v19 = vld [vmem:[%s5912_s2 + $0xc0] ss:$24 sps:$4 sm:$0xff]   ;;  %v3614_v21 = vld [vmem:[%s5912_s2 + $0xf4] ss:$24 sps:$4 sm:$0xff]   ;;  %v3618_v23 = vld [vmem:[%s5912_s2 + $0xf0] ss:$24 sps:$4 sm:$0xff]  }
   0x8   :  { %385 = vmatpush1.bf16.msra.mxu0 %v3594_v7  ;;  %458 = vmatpush1.bf16.msra.mxu1 %v3595_v8  ;;  %v3613_v20 = vld [vmem:[%s5912_s2 + $0xc8] ss:$24 sps:$4 sm:$0xff]   ;;  %v3616_v22 = vld [vmem:[%s5912_s2 + $0xfc] ss:$24 sps:$4 sm:$0xff]   ;;  %v3619_v24 = vld [vmem:[%s5912_s2 + $0xf8] ss:$24 sps:$4 sm:$0xff]  }
   0x9   :  { %386 = vmatprep.subr.bf16.mxu0 %v3596_v9  ;;  %459 = vmatprep.subr.bf16.mxu1 %v3598_v10  ;;  %v3620_v25 = vld [vmem:[%s5912_s2 + $0x124] ss:$24 sps:$4 sm:$0xff]   ;;  %v3624_v27 = vld [vmem:[%s5912_s2 + $0x120] ss:$24 sps:$4 sm:$0xff]   ;;  %v3626_v29 = vld [vmem:[%s5912_s2 + $0x154] ss:$24 sps:$4 sm:$0xff]  }
   0xa   :  { %v3622_v26 = vld [vmem:[%s5912_s2 + $0x12c] ss:$24 sps:$4 sm:$0xff]   ;;  %v3625_v28 = vld [vmem:[%s5912_s2 + $0x128] ss:$24 sps:$4 sm:$0xff]   ;;  %v3628_v30 = vld [vmem:[%s5912_s2 + $0x15c] ss:$24 sps:$4 sm:$0xff]  }
   0xb   :  { %v3630_v31 = vld [vmem:[%s5912_s2 + $0x150] ss:$24 sps:$4 sm:$0xff]   ;;  %v3635_v33 = vld [vmem:[%s5912_s2 + $0x14] ss:$24 sps:$4 sm:$0xff]   ;;  %v4169_v35 = vld [vmem:[%s5913_s0] sm:$0xff]   ;;  %v5921_v9 = vmov 0.0  }
   0xc   :  { %387 = vmatpush1.bf16.msra.mxu0 %v3600_v11  ;;  %460 = vmatpush1.bf16.msra.mxu1 %v3601_v12  ;;  %v3631_v32 = vld [vmem:[%s5912_s2 + $0x158] ss:$24 sps:$4 sm:$0xff]   ;;  %v4177_v37 = vld [vmem:[%s5914_s4] ss:$12 sps:$4 sm:$0xff]   ;;  %v3641_v38 = vld [vmem:[%s5912_s2 + $0x44] ss:$24 sps:$4 sm:$0xff]  }
   0xd   :  { %388 = vmatprep.subr.bf16.mxu0 %v3602_v13  ;;  %461 = vmatprep.subr.bf16.mxu1 %v3604_v14  ;;  %v4164_v34 = vld [vmem:[%s5914_s4 + $0x4] ss:$12 sps:$4 sm:$0xff]   ;;  %v4186_v39 = vld [vmem:[%s5914_s4 + $0x1c] ss:$12 sps:$4 sm:$0xff]   ;;  %v3639_v40 = vld [vmem:[%s5912_s2 + $0x40] ss:$24 sps:$4 sm:$0xff]  }
   0xe   :  { %v3633_v36 = vld [vmem:[%s5912_s2 + $0x10] ss:$24 sps:$4 sm:$0xff]   ;;  %v4197_v41 = vld [vmem:[%s5914_s4 + $0x18] ss:$12 sps:$4 sm:$0xff]   ;;  %v3648_v42 = vld [vmem:[%s5912_s2 + $0x74] ss:$24 sps:$4 sm:$0xff]  }
   0xf   :  { %v4206_v43 = vld [vmem:[%s5914_s4 + $0x34] ss:$12 sps:$4 sm:$0xff]   ;;  %v4213_v44 = vld [vmem:[%s5913_s0 + $0x8] sm:$0xff]   ;;  %v4221_v46 = vld [vmem:[%s5914_s4 + $0x30] ss:$12 sps:$4 sm:$0xff]  }
  0x10   :  { %389 = vmatpush1.bf16.msra.mxu0 %v3606_v15  ;;  %462 = vmatpush1.bf16.msra.mxu1 %v3607_v16  ;;  %v3646_v45 = vld [vmem:[%s5912_s2 + $0x70] ss:$24 sps:$4 sm:$0xff]   ;;  %v3654_v47 = vld [vmem:[%s5912_s2 + $0xa4] ss:$24 sps:$4 sm:$0xff]   ;;  %v4231_v48 = vld [vmem:[%s5914_s4 + $0x4c] ss:$12 sps:$4 sm:$0xff]  }
  0x11   :  { %390 = vmatprep.subr.bf16.mxu0 %v3608_v17  ;;  %463 = vmatprep.subr.bf16.mxu1 %v3610_v18  ;;  %v3652_v49 = vld [vmem:[%s5912_s2 + $0xa0] ss:$24 sps:$4 sm:$0xff]   ;;  %v4241_v50 = vld [vmem:[%s5914_s4 + $0x48] ss:$12 sps:$4 sm:$0xff]   ;;  %v4251_v52 = vld [vmem:[%s5914_s4 + $0x64] ss:$12 sps:$4 sm:$0xff]  }
  0x12   :  { %v3661_v51 = vld [vmem:[%s5912_s2 + $0xd4] ss:$24 sps:$4 sm:$0xff]   ;;  %v3659_v54 = vld [vmem:[%s5912_s2 + $0xd0] ss:$24 sps:$4 sm:$0xff]   ;;  %v3667_v56 = vld [vmem:[%s5912_s2 + $0x104] ss:$24 sps:$4 sm:$0xff]  }
  0x13   :  { %v4258_v53 = vld [vmem:[%s5913_s0 + $0x10] sm:$0xff]   ;;  %v4267_v55 = vld [vmem:[%s5914_s4 + $0x60] ss:$12 sps:$4 sm:$0xff]   ;;  %v4276_v57 = vld [vmem:[%s5914_s4 + $0x7c] ss:$12 sps:$4 sm:$0xff]  }
  0x14   :  { %391 = vmatpush1.bf16.msra.mxu0 %v3612_v19  ;;  %464 = vmatpush1.bf16.msra.mxu1 %v3613_v20  ;;  %v3665_v58 = vld [vmem:[%s5912_s2 + $0x100] ss:$24 sps:$4 sm:$0xff]   ;;  %v3674_v60 = vld [vmem:[%s5912_s2 + $0x134] ss:$24 sps:$4 sm:$0xff]   ;;  %v3672_v63 = vld [vmem:[%s5912_s2 + $0x130] ss:$24 sps:$4 sm:$0xff]  }
  0x15   :  { %392 = vmatprep.subr.bf16.mxu0 %v3614_v21  ;;  %465 = vmatprep.subr.bf16.mxu1 %v3616_v22  ;;  %v4287_v59 = vld [vmem:[%s5914_s4 + $0x78] ss:$12 sps:$4 sm:$0xff]   ;;  %v4296_v61 = vld [vmem:[%s5914_s4 + $0x94] ss:$12 sps:$4 sm:$0xff]   ;;  %v4311_v0 = vld [vmem:[%s5914_s4 + $0x90] ss:$12 sps:$4 sm:$0xff]  }
  0x16   :  { %v4303_v62 = vld [vmem:[%s5913_s0 + $0x18] sm:$0xff]   ;;  %v4332_v5 = vld [vmem:[%s5914_s4 + $0xa8] ss:$12 sps:$4 sm:$0xff]   ;;  %v4338_v6 = vld [vmem:[%s5915_s6 + $0x4] ss:$12 sps:$4 sm:$0xff]  }
  0x17   :  { %v3680_v2 = vld [vmem:[%s5912_s2 + $0x164] ss:$24 sps:$4 sm:$0xff]   ;;  %v4321_v3 = vld [vmem:[%s5914_s4 + $0xac] ss:$12 sps:$4 sm:$0xff]   ;;  %5965 = vst [vmem:[#allocation6_spill] sm:$0xff] %v4332_v5  ;;  %5966 = vst [vmem:[#allocation7_spill] sm:$0xff] %v4338_v6 }
  0x18   :  { %393 = vmatpush1.bf16.msra.mxu0 %v3618_v23  ;;  %466 = vmatpush1.bf16.msra.mxu1 %v3619_v24  ;;  %5964 = vst [vmem:[#allocation5_spill] sm:$0xff] %v4321_v3  ;;  %v3678_v4 = vld [vmem:[%s5912_s2 + $0x160] ss:$24 sps:$4 sm:$0xff]   ;;  %v4345_v7 = vld [vmem:[%s5914_s4 + $0x8] ss:$12 sps:$4 sm:$0xff]  }
  0x19   :  { %394 = vmatprep.subr.bf16.mxu0 %v3620_v25  ;;  %467 = vmatprep.subr.bf16.mxu1 %v3622_v26  ;;  %v4351_v8 = vld [vmem:[%s5915_s6] ss:$12 sps:$4 sm:$0xff]   ;;  %v4358_v10 = vld [vmem:[%s5915_s6 + $0x1c] ss:$12 sps:$4 sm:$0xff]   ;;  %v4372_v12 = vld [vmem:[%s5915_s6 + $0x18] ss:$12 sps:$4 sm:$0xff]  }
  0x1a   :  { %v4365_v11 = vld [vmem:[%s5914_s4 + $0x20] ss:$12 sps:$4 sm:$0xff]   ;;  %v4386_v14 = vld [vmem:[%s5914_s4 + $0x38] ss:$12 sps:$4 sm:$0xff]   ;;  %v4393_v15 = vld [vmem:[%s5915_s6 + $0x30] ss:$12 sps:$4 sm:$0xff]  }
  0x1b   :  { %v4379_v13 = vld [vmem:[%s5915_s6 + $0x34] ss:$12 sps:$4 sm:$0xff]   ;;  %v4400_v16 = vld [vmem:[%s5915_s6 + $0x4c] ss:$12 sps:$4 sm:$0xff]   ;;  %v4415_v19 = vld [vmem:[%s5914_s4 + $0x50] ss:$12 sps:$4 sm:$0xff]  }
  0x1c   :  { %395 = vmatpush1.bf16.msra.mxu0 %v3624_v27  ;;  %468 = vmatpush1.bf16.msra.mxu1 %v3625_v28  ;;  %v4405_v17 = vld [vmem:[%s5916_s1] sm:$0xff]  ;;  %v4420_v20 = vld [vmem:[%s5915_s6 + $0x48] ss:$12 sps:$4 sm:$0xff]  }
  0x1d   :  { %396 = vmatprep.subr.bf16.mxu0 %v3626_v29  ;;  %469 = vmatprep.subr.bf16.mxu1 %v3628_v30  ;;  %vm728_vm0 = vcmp.gt.s32.totalorder %v4405_v17, 0  ;;  %vm970_vm1 = vcmp.gt.s32.totalorder %v4405_v17, 7  ;;  %v4428_v21 = vld [vmem:[%s5915_s6 + $0x64] ss:$12 sps:$4 sm:$0xff]   ;;  %v4437_v23 = vld [vmem:[%s5914_s4 + $0x68] ss:$12 sps:$4 sm:$0xff]  }
  0x1e   :  { %v963_v18 = vsel %vm728_vm0, 1, %v5923_v1  ;;  %v1206_v22 = vsel %vm970_vm1, 1, %v5923_v1  ;;  %v4442_v24 = vld [vmem:[%s5915_s6 + $0x60] ss:$12 sps:$4 sm:$0xff]   ;;  %vm1450_vm2 = vcmp.gt.s32.totalorder %v4405_v17, 2  ;;  %vm1686_vm3 = vcmp.gt.s32.totalorder %v4405_v17, 3 }
  0x1f   :  { %965 = vperm.xlu0 %3582, %v963_v18   ;;  %v4450_v25 = vld [vmem:[%s5915_s6 + $0x7c] ss:$12 sps:$4 sm:$0xff]   ;;  %v1559_v26 = vsel %vm1450_vm2, 1, %v5923_v1  ;;  %v4459_v27 = vld [vmem:[%s5914_s4 + $0x80] ss:$12 sps:$4 sm:$0xff]   ;;  %v1795_v30 = vsel %vm1686_vm3, 1, %v5923_v1 }
  0x20   :  { %397 = vmatpush1.bf16.msra.mxu0 %v3630_v31  ;;  %470 = vmatpush1.bf16.msra.mxu1 %v3631_v32  ;;  %v4464_v28 = vld [vmem:[%s5915_s6 + $0x78] ss:$12 sps:$4 sm:$0xff]   ;;  %v4472_v29 = vld [vmem:[%s5915_s6 + $0x94] ss:$12 sps:$4 sm:$0xff]   ;;  %v4486_v32 = vld [vmem:[%s5915_s6 + $0x90] ss:$12 sps:$4 sm:$0xff]  }
  0x21   :  { %528 = vmatprep.subr.bf16.mxu0 %v3635_v33  ;;  %860 = vmatprep.subr.bf16.mxu1 %v4164_v34  ;;  %v4481_v31 = vld [vmem:[%s5914_s4 + $0x98] ss:$12 sps:$4 sm:$0xff]   ;;  %vm1214_vm5 = vcmp.gt.s32.totalorder %v4405_v17, 1  ;;  %vm1332_vm6 = vcmp.gt.s32.totalorder %v4405_v17, 6  ;;  %vm1568_vm7 = vcmp.gt.s32.totalorder %v4405_v17, 5  ;;  %vm1804_vm8 = vcmp.gt.s32.totalorder %v4405_v17, 4 }
  0x22   :  { %v4493_v33 = vld [vmem:[%s5915_s6 + $0xac] ss:$12 sps:$4 sm:$0xff]  }
  0x23   :  { %415 = vmatmul.mubr.bf16.vlgmr.msra.gmra.mrb[0].mxu0 %v4169_v35  ;;  %488 = vmatmul.mubr.bf16.vlgmr.msra.gmra.mrb[0].mxu1 %v4169_v35 }
  0x24   :  { %529 = vmatpush1.bf16.msra.mxu0 %v3633_v36  ;;  %861 = vmatpush1.bf16.msra.mxu1 %v4177_v37  ;;  %v4506_v36 = vld [vmem:[%s5915_s6 + $0xa8] ss:$12 sps:$4 sm:$0xff]  }
  0x25   :  { %530 = vmatprep.subr.bf16.mxu0 %v3641_v38  ;;  %862 = vmatprep.subr.bf16.mxu1 %v4186_v39  ;;  %v4517_v38 = vld [vmem:[%s5915_s6 + $0x8] ss:$12 sps:$4 sm:$0xff]  }
  0x26   :  { %424 = vmatprep.mubr.bf16.mxu0 %v5923_v1  ;;  %497 = vmatprep.mubr.bf16.mxu1 %v5923_v1 }
  0x27   :  { %1208 = vperm.xlu0 %3582, %v1206_v22  }
  0x28   :  { %531 = vmatpush1.bf16.msra.mxu0 %v3639_v40  ;;  %863 = vmatpush1.bf16.msra.mxu1 %v4197_v41  ;;  %v4527_v40 = vld [vmem:[%s5915_s6 + $0x20] ss:$12 sps:$4 sm:$0xff]  }
  0x29   :  { %532 = vmatprep.subr.bf16.mxu0 %v3648_v42  ;;  %864 = vmatprep.subr.bf16.mxu1 %v4206_v43  ;;  %v4575_v42 = vld [vmem:[%s5915_s6 + $0x98] ss:$12 sps:$4 sm:$0xff]  }
  0x2b   :  { %425 = vmatmul.mubr.bf16.gmra.mrb[4].mxu0 %v4213_v44  ;;  %498 = vmatmul.mubr.bf16.gmra.mrb[4].mxu1 %v4213_v44 }
  0x2c   :  { %533 = vmatpush1.bf16.msra.mxu0 %v3646_v45  ;;  %865 = vmatpush1.bf16.msra.mxu1 %v4221_v46 }
  0x2d   :  { %534 = vmatprep.subr.bf16.mxu0 %v3654_v47  ;;  %866 = vmatprep.subr.bf16.mxu1 %v4231_v48 }
  0x2e   :  { %434 = vmatprep.mubr.bf16.mxu0 %v5923_v1  ;;  %507 = vmatprep.mubr.bf16.mxu1 %v5923_v1 }
  0x2f   :  { %1561 = vperm.xlu0 %3582, %v1559_v26  }
  0x30   :  { %535 = vmatpush1.bf16.msra.mxu0 %v3652_v49  ;;  %867 = vmatpush1.bf16.msra.mxu1 %v4241_v50 }
  0x31   :  { %536 = vmatprep.subr.bf16.mxu0 %v3661_v51  ;;  %868 = vmatprep.subr.bf16.mxu1 %v4251_v52 }
  0x33   :  { %435 = vmatmul.mubr.bf16.gmra.mrb[8].mxu0 %v4258_v53  ;;  %508 = vmatmul.mubr.bf16.gmra.mrb[8].mxu1 %v4258_v53 }
  0x34   :  { %537 = vmatpush1.bf16.msra.mxu0 %v3659_v54  ;;  %869 = vmatpush1.bf16.msra.mxu1 %v4267_v55  ;;  %v4624_v54 = vld [vmem:[%s5917_s3] sm:$0x3f] }
  0x35   :  { %538 = vmatprep.subr.bf16.mxu0 %v3667_v56  ;;  %870 = vmatprep.subr.bf16.mxu1 %v4276_v57 }
  0x36   :  { %444 = vmatprep.mubr.bf16.mxu0 %v5923_v1  ;;  %517 = vmatprep.mubr.bf16.mxu1 %v5923_v1 }
  0x37   :  { %1797 = vperm.xlu0 %3582, %v1795_v30  }
  0x38   :  { %539 = vmatpush1.bf16.msra.mxu0 %v3665_v58  ;;  %871 = vmatpush1.bf16.msra.mxu1 %v4287_v59 }
  0x39   :  { %540 = vmatprep.subr.bf16.mxu0 %v3674_v60  ;;  %872 = vmatprep.subr.bf16.mxu1 %v4296_v61 }
  0x3b   :  { %445 = vmatmul.mubr.bf16.gmra.mrb[12].mxu0 %v4303_v62  ;;  %518 = vmatmul.mubr.bf16.gmra.mrb[12].mxu1 %v4303_v62 }
  0x3c   :  { %541 = vmatpush1.bf16.msra.mxu0 %v3672_v63  ;;  %873 = vmatpush1.bf16.msra.mxu1 %v4311_v0  ;;  %v1677_v63 = vsel %vm1568_vm7, 1, %v5923_v1 }
  0x3d   :  { %542 = vmatprep.subr.bf16.mxu0 %v3680_v2  ;;  %874 = vmatprep.subr.bf16.mxu1 %v4321_v3 }
  0x3e   :  { %560 = vmatprep.mubr.bf16.mxu0 %v5923_v1  ;;  %892 = vmatprep.mubr.bf16.mxu1 %v5923_v1 }
  0x40   :  { %543 = vmatpush1.bf16.msra.mxu0 %v3678_v4  ;;  %875 = vmatpush1.bf16.msra.mxu1 %v4332_v5 }
  0x41   :  { %3259 = vmatprep.subr.bf16.mxu0 %v5921_v9  ;;  %1103 = vmatprep.subr.bf16.mxu1 %v4338_v6 }
  0x43   :  { %561 = vmatmul.mubr.bf16.vlgmr.msra.gmra.mrb[16].mxu0 %v4169_v35  ;;  %893 = vmatmul.mubr.bf16.vlgmr.msra.gmra.mrb[16].mxu1 %v5923_v1  ;;  %v4501_v35 = vld [vmem:[%s5914_s4 + $0xb0] ss:$12 sps:$4 sm:$0xff]  }
  0x44   :  { %3260 = vmatpush3.bf16.msra.mxu0 %v4345_v7  ;;  %1104 = vmatpush1.bf16.msra.mxu1 %v4351_v8  ;;  %5967 = vst [vmem:[#allocation8_spill] sm:$0xff] %v4501_v35 }
  0x45   :  { %3261 = vmatprep.subr.bf16.mxu0 %v5921_v9  ;;  %1105 = vmatprep.subr.bf16.mxu1 %v4358_v10 }
  0x46   :  { %570 = vmatprep.mubr.bf16.mxu0 %v5923_v1  ;;  %1135 = vmatprep.mubr.bf16.mxu1 %v5923_v1 }
  0x48   :  { %3262 = vmatpush3.bf16.msra.mxu0 %v4365_v11  ;;  %1106 = vmatpush1.bf16.msra.mxu1 %v4372_v12 }
  0x49   :  { %3263 = vmatprep.subr.bf16.mxu0 %v5921_v9  ;;  %1107 = vmatprep.subr.bf16.mxu1 %v4379_v13 }
  0x4b   :  { %571 = vmatmul.mubr.bf16.gmra.mrb[20].mxu0 %v4213_v44  ;;  %v88_v44 = vlaneseq }
  0x4c   :  { %3264 = vmatpush3.bf16.msra.mxu0 %v4386_v14  ;;  %1108 = vmatpush1.bf16.msra.mxu1 %v4393_v15 }
  0x4d   :  { %3265 = vmatprep.subr.bf16.mxu0 %v5921_v9  ;;  %1109 = vmatprep.subr.bf16.mxu1 %v4400_v16  ;;  %v4612_v45 = vshrl.u32 %v88_v44, 7 }
  0x4e   :  { %580 = vmatprep.mubr.bf16.mxu0 %v5923_v1 }
  0x4f   :  { %v102_v47 = vsub.s32 3, %v4612_v45  ;;  %v90_v49 = vsub.s32 0, %v4612_v45  ;;  %v98_v51 = vsub.s32 2, %v4612_v45  ;;  %v94_v56 = vsub.s32 1, %v4612_v45 }
  0x50   :  { %3266 = vmatpush3.bf16.msra.mxu0 %v4415_v19  ;;  %1110 = vmatpush1.bf16.msra.mxu1 %v4420_v20 }
  0x51   :  { %3267 = vmatprep.subr.bf16.mxu0 %v5921_v9  ;;  %1111 = vmatprep.subr.bf16.mxu1 %v4428_v21  ;;  %v4629_v58 = vrot.slane %v4624_v54, %v102_v47  ;;  %v4632_v60 = vrot.slane %v4624_v54, %v90_v49  ;;  %v4646_v26 = vrot.slane %v4624_v54, %v94_v56 }
  0x53   :  { %581 = vmatmul.mubr.bf16.gmra.mrb[24].mxu0 %v4258_v53  ;;  %v1441_v53 = vsel %vm1332_vm6, 1, %v5923_v1 }
  0x54   :  { %3268 = vmatpush3.bf16.msra.mxu0 %v4437_v23  ;;  %1112 = vmatpush1.bf16.msra.mxu1 %v4442_v24 }
  0x55   :  { %3269 = vmatprep.subr.bf16.mxu0 %v5921_v9  ;;  %1113 = vmatprep.subr.bf16.mxu1 %v4450_v25 }
  0x56   :  { %590 = vmatprep.mubr.bf16.mxu0 %v5923_v1 }
  0x58   :  { %3270 = vmatpush3.bf16.msra.mxu0 %v4459_v27  ;;  %1114 = vmatpush1.bf16.msra.mxu1 %v4464_v28 }
  0x59   :  { %3271 = vmatprep.subr.bf16.mxu0 %v5921_v9  ;;  %1115 = vmatprep.subr.bf16.mxu1 %v4472_v29 }
  0x5b   :  { %591 = vmatmul.mubr.bf16.gmra.mrb[28].mxu0 %v4303_v62  ;;  %v4635_v62 = vrot.slane %v4624_v54, %v98_v51 }
  0x5c   :  { %3272 = vmatpush3.bf16.msra.mxu0 %v4481_v31  ;;  %1116 = vmatpush1.bf16.msra.mxu1 %v4486_v32 }
  0x5d   :  { %3273 = vmatprep.subr.bf16.mxu0 %v5921_v9  ;;  %1117 = vmatprep.subr.bf16.mxu1 %v4493_v33 }
  0x5e   :  { %3275 = vmatprep.mubr.msk.bf16.mxu0 %vm4012_vm4, %v5921_v9 }
  0x60   :  { %3274 = vmatpush3.bf16.msra.mxu0 %v4501_v35  ;;  %1118 = vmatpush1.bf16.msra.mxu1 %v4506_v36 }
  0x61   :  { %3279 = vmatprep.subr.bf16.mxu0 %v5921_v9  ;;  %1220 = vmatprep.subr.bf16.mxu1 %v4164_v34  ;;  %v4539_v34 = vld [vmem:[%s5915_s6 + $0x38] ss:$12 sps:$4 sm:$0xff]  }
  0x63   :  { %3276 = vmatmul.mubr.bf16.vlgmr.msra.gmra.mrb[32].mxu0 %v5923_v1  ;;  %1136 = vmatmul.mubr.bf16.vlgmr.msra.gmra.mrb[20].mxu1 %v5923_v1 }
  0x64   :  { %3280 = vmatpush3.bf16.msra.mxu0 %v4517_v38  ;;  %3295 = vmatprep.mubr.msk.bf16.mxu0 %vm4012_vm4, %v5921_v9 }
  0x65   :  { %3281 = vmatprep.subr.bf16.mxu0 %v5921_v9  ;;  %1221 = vmatpush1.bf16.msra.mxu1 %v4177_v37  ;;  %v4548_v37 = vld [vmem:[%s5915_s6 + $0x50] ss:$12 sps:$4 sm:$0xff]  }
  0x66   :  { %1222 = vmatprep.subr.bf16.mxu1 %v4186_v39  ;;  %1252 = vmatprep.mubr.bf16.mxu1 %v5923_v1  ;;  %v4557_v39 = vld [vmem:[%s5915_s6 + $0x68] ss:$12 sps:$4 sm:$0xff]  }
  0x68   :  { %3282 = vmatpush3.bf16.msra.mxu0 %v4527_v40 }
  0x69   :  { %3283 = vmatprep.subr.bf16.mxu0 %v5921_v9  ;;  %1223 = vmatpush1.bf16.msra.mxu1 %v4197_v41  ;;  %v4566_v41 = vld [vmem:[%s5915_s6 + $0x80] ss:$12 sps:$4 sm:$0xff]  }
  0x6a   :  { %1224 = vmatprep.subr.bf16.mxu1 %v4206_v43  ;;  %v4584_v43 = vld [vmem:[%s5915_s6 + $0xb0] ss:$12 sps:$4 sm:$0xff]  }
  0x6c   :  { %3284 = vmatpush3.bf16.msra.mxu0 %v4539_v34 }
  0x6d   :  { %3285 = vmatprep.subr.bf16.mxu0 %v5921_v9  ;;  %1225 = vmatpush1.bf16.msra.mxu1 %v4221_v46  ;;  %v1323_v46 = vsel %vm1214_vm5, 1, %v5923_v1 }
  0x6e   :  { %1226 = vmatprep.subr.bf16.mxu1 %v4231_v48  ;;  %1325 = vperm.xlu1 %3583, %v1323_v46  }
  0x70   :  { %3286 = vmatpush3.bf16.msra.mxu0 %v4548_v37 }
  0x71   :  { %3287 = vmatprep.subr.bf16.mxu0 %v5921_v9  ;;  %1227 = vmatpush1.bf16.msra.mxu1 %v4241_v50 }
  0x72   :  { %1228 = vmatprep.subr.bf16.mxu1 %v4251_v52  ;;  %1443 = vperm.xlu1 %3583, %v1441_v53   ;;  %v1913_v53 = vsel %vm1804_vm8, 1, %v5923_v1 }
  0x74   :  { %3288 = vmatpush3.bf16.msra.mxu0 %v4557_v39 }
  0x75   :  { %3289 = vmatprep.subr.bf16.mxu0 %v5921_v9  ;;  %1229 = vmatpush1.bf16.msra.mxu1 %v4267_v55 }
  0x76   :  { %1230 = vmatprep.subr.bf16.mxu1 %v4276_v57  ;;  %1679 = vperm.xlu1 %3583, %v1677_v63  }
  0x78   :  { %3290 = vmatpush3.bf16.msra.mxu0 %v4566_v41 }
  0x79   :  { %3291 = vmatprep.subr.bf16.mxu0 %v5921_v9  ;;  %1231 = vmatpush1.bf16.msra.mxu1 %v4287_v59 }
  0x7a   :  { %1232 = vmatprep.subr.bf16.mxu1 %v4296_v61  ;;  %1915 = vperm.xlu1 %3583, %v1913_v53  }
  0x7c   :  { %3292 = vmatpush3.bf16.msra.mxu0 %v4575_v42 }
  0x7d   :  { %3293 = vmatprep.subr.bf16.mxu0 %v5921_v9  ;;  %1233 = vmatpush1.bf16.msra.mxu1 %v4311_v0 }
  0x7e   :  { %1234 = vmatprep.subr.bf16.mxu1 %v4321_v3 }
  0x80   :  { %3294 = vmatpush3.bf16.msra.mxu0 %v4584_v43 }
  0x81   :  { %3299 = vmatprep.subr.bf16.mxu0 %v5921_v9  ;;  %1235 = vmatpush1.bf16.msra.mxu1 %v4332_v5 }
  0x82   :  { %1338 = vmatprep.subr.bf16.mxu1 %v4338_v6 }
  0x83   :  { %3296 = vmatmul.mubr.bf16.vlgmr.msra.gmra.mrb[36].mxu0 %v5923_v1 }
  0x84   :  { %3300 = vmatpush3.bf16.msra.mxu0 %v4345_v7  ;;  %3315 = vmatprep.mubr.msk.bf16.mxu0 %vm4012_vm4, %v5921_v9 }
  0x85   :  { %3301 = vmatprep.subr.bf16.mxu0 %v5921_v9 }
  0x88   :  { %3302 = vmatpush3.bf16.msra.mxu0 %v4365_v11 }
  0x89   :  { %3303 = vmatprep.subr.bf16.mxu0 %v5921_v9 }
  0x8c   :  { %3304 = vmatpush3.bf16.msra.mxu0 %v4386_v14 }
  0x8d   :  { %3305 = vmatprep.subr.bf16.mxu0 %v5921_v9 }
  0x90   :  { %3306 = vmatpush3.bf16.msra.mxu0 %v4415_v19 }
  0x91   :  { %3307 = vmatprep.subr.bf16.mxu0 %v5921_v9 }
  0x94   :  { %3308 = vmatpush3.bf16.msra.mxu0 %v4437_v23 }
  0x95   :  { %3309 = vmatprep.subr.bf16.mxu0 %v5921_v9 }
  0x98   :  { %3310 = vmatpush3.bf16.msra.mxu0 %v4459_v27 }
  0x99   :  { %3311 = vmatprep.subr.bf16.mxu0 %v5921_v9 }
  0x9c   :  { %3312 = vmatpush3.bf16.msra.mxu0 %v4481_v31 }
  0x9d   :  { %3313 = vmatprep.subr.bf16.mxu0 %v5921_v9 }
  0xa0   :  { %3314 = vmatpush3.bf16.msra.mxu0 %v4501_v35 }
  0xa1   :  { %3319 = vmatprep.subr.bf16.mxu0 %v5921_v9 }
  0xf6   :  { %v4638_v2 = vpop.f32.mrb[0].mxu0  ;;  %v4640_v4 = vpop.f32.mrb[0].mxu1 }
  0xf7   :  { %v4643_v18 = vpop.f32.mrb[1].mxu0  ;;  %v491_v22 = vpop.f32.mrb[1].mxu1 }
  0xf8   :  { %v420_v30 = vpop.f32.mrb[2].mxu0  ;;  %v4649_v44 = vadd.f32 %v491_v22, %v4629_v58  ;;  %v493_v46 = vpop.f32.mrb[2].mxu1 }
  0xf9   :  { %v4652_v47 = vadd.f32 %v420_v30, %v4632_v60  ;;  %v422_v49 = vpop.f32.mrb[3].mxu0  ;;  %v4655_v51 = vadd.f32 %v493_v46, %v4635_v62  ;;  %v495_v17 = vpop.f32.mrb[3].mxu1 }
  0xfa   :  { %5968 = vst [vmem:[#allocation9_spill] sm:$0xff] %v4649_v44  ;;  %v4659_v9 = vadd.f32 %v422_v49, %v4646_v26  ;;  %v4662_v56 = vadd.f32 %v495_v17, %v4629_v58 }
  0xfb   :  { %5969 = vst [vmem:[#allocation10_spill] sm:$0xff] %v4652_v47  ;;  %5970 = vst [vmem:[#allocation11_spill] sm:$0xff] %v4655_v51 }
  0xfc   :  { %5971 = vst [vmem:[#allocation12_spill] sm:$0xff] %v4659_v9  ;;  %5972 = vst [vmem:[#allocation13_spill] sm:$0xff] %v4662_v56 }
  0xfe   :  { %v426_v22 = vpop.f32.mrb[4].mxu0  ;;  %v499_v44 = vpop.f32.mrb[4].mxu1 }
  0xff   :  { %v4665_v63 = vadd.f32 %v426_v22, %v4632_v60  ;;  %v428_v30 = vpop.f32.mrb[5].mxu0  ;;  %v4668_v47 = vadd.f32 %v499_v44, %v4635_v62  ;;  %v501_v46 = vpop.f32.mrb[5].mxu1 }
 0x100   :  { %v4671_v51 = vadd.f32 %v428_v30, %v4646_v26  ;;  %v430_v1 = vpop.f32.mrb[6].mxu0  ;;  %v4674_v49 = vadd.f32 %v501_v46, %v4629_v58  ;;  %v503_v17 = vpop.f32.mrb[6].mxu1 }
 0x101   :  { %5973 = vst [vmem:[#allocation14_spill] sm:$0xff] %v4665_v63  ;;  %5974 = vst [vmem:[#allocation15_spill] sm:$0xff] %v4668_v47  ;;  %v4677_v53 = vadd.f32 %v430_v1, %v4632_v60  ;;  %v432_v56 = vpop.f32.mrb[7].mxu0  ;;  %v4680_v22 = vadd.f32 %v503_v17, %v4635_v62  ;;  %v505_v63 = vpop.f32.mrb[7].mxu1 }
 0x102   :  { %5975 = vst [vmem:[#allocation16_spill] sm:$0xff] %v4671_v51  ;;  %5976 = vst [vmem:[#allocation17_spill] sm:$0xff] %v4674_v49  ;;  %v4683_v44 = vadd.f32 %v432_v56, %v4646_v26  ;;  %v4686_v47 = vadd.f32 %v505_v63, %v4629_v58 }
 0x103   :  { %5977 = vst [vmem:[#allocation18_spill] sm:$0xff] %v4677_v53  ;;  %5978 = vst [vmem:[#allocation19_spill] sm:$0xff] %v4680_v22 }
 0x104   :  { %5979 = vst [vmem:[#allocation20_spill] sm:$0xff] %v4683_v44  ;;  %5980 = vst [vmem:[#allocation21_spill] sm:$0xff] %v4686_v47 }
 0x106   :  { %v436_v30 = vpop.f32.mrb[8].mxu0  ;;  %v509_v51 = vpop.f32.mrb[8].mxu1 }
 0x107   :  { %v4689_v46 = vadd.f32 %v436_v30, %v4632_v60  ;;  %v438_v49 = vpop.f32.mrb[9].mxu0  ;;  %v4692_v1 = vadd.f32 %v509_v51, %v4635_v62  ;;  %v511_v53 = vpop.f32.mrb[9].mxu1 }
 0x108   :  { %v4695_v17 = vadd.f32 %v438_v49, %v4646_v26  ;;  %v440_v22 = vpop.f32.mrb[10].mxu0  ;;  %v4698_v56 = vadd.f32 %v511_v53, %v4629_v58  ;;  %v513_v44 = vpop.f32.mrb[10].mxu1 }
 0x109   :  { %5981 = vst [vmem:[#allocation22_spill] sm:$0xff] %v4689_v46  ;;  %5982 = vst [vmem:[#allocation23_spill] sm:$0xff] %v4692_v1  ;;  %v4701_v63 = vadd.f32 %v440_v22, %v4632_v60  ;;  %v442_v47 = vpop.f32.mrb[11].mxu0  ;;  %v4704_v30 = vadd.f32 %v513_v44, %v4635_v62  ;;  %v515_v46 = vpop.f32.mrb[11].mxu1  ;;  %v106_v44 = vsub.s32 4, %v4612_v45 }
 0x10a   :  { %5983 = vst [vmem:[#allocation24_spill] sm:$0xff] %v4695_v17  ;;  %5984 = vst [vmem:[#allocation25_spill] sm:$0xff] %v4698_v56  ;;  %v4707_v51 = vadd.f32 %v442_v47, %v4646_v26  ;;  %v4710_v1 = vadd.f32 %v515_v46, %v4629_v58 }
 0x10b   :  { %5985 = vst [vmem:[#allocation26_spill] sm:$0xff] %v4701_v63  ;;  %5986 = vst [vmem:[#allocation27_spill] sm:$0xff] %v4704_v30 }
 0x10c   :  { %5987 = vst [vmem:[#allocation28_spill] sm:$0xff] %v4707_v51  ;;  %5988 = vst [vmem:[#allocation29_spill] sm:$0xff] %v4710_v1  ;;  %v110_v1 = vsub.s32 5, %v4612_v45  ;;  %v419_v45 = vadd.f32 %v4643_v18, %v4646_v26 }
 0x10e   :  { %v446_v49 = vpop.f32.mrb[12].mxu0  ;;  %v519_v17 = vpop.f32.mrb[12].mxu1 }
 0x10f   :  { %v4713_v53 = vadd.f32 %v446_v49, %v4632_v60  ;;  %v448_v56 = vpop.f32.mrb[13].mxu0  ;;  %v4716_v22 = vadd.f32 %v519_v17, %v4635_v62  ;;  %v521_v63 = vpop.f32.mrb[13].mxu1 }
 0x110   :  { %v4720_v30 = vadd.f32 %v448_v56, %v4646_v26  ;;  %v450_v47 = vpop.f32.mrb[14].mxu0  ;;  %v4723_v51 = vadd.f32 %v521_v63, %v4629_v58  ;;  %v523_v46 = vpop.f32.mrb[14].mxu1  ;;  %v107_v56 = vrot.slane %v4624_v54, %v106_v44  ;;  %v417_v63 = vadd.f32 %v4638_v2, %v4632_v60 }
 0x111   :  { %5989 = vst [vmem:[#allocation30_spill] sm:$0xff] %v4713_v53  ;;  %5990 = vst [vmem:[#allocation31_spill] sm:$0xff] %v4716_v22  ;;  %v4727_v49 = vadd.f32 %v450_v47, %v4632_v60  ;;  %v452_v53 = vpop.f32.mrb[15].mxu0  ;;  %v4730_v17 = vadd.f32 %v523_v46, %v4635_v62  ;;  %v525_v22 = vpop.f32.mrb[15].mxu1 }
 0x112   :  { %5991 = vst [vmem:[#allocation32_spill] sm:$0xff] %v4720_v30  ;;  %5992 = vst [vmem:[#allocation33_spill] sm:$0xff] %v4723_v51  ;;  %v4733_v9 = vadd.f32 %v452_v53, %v4646_v26  ;;  %v4737_v30 = vrot.slane %v4624_v54, %v110_v1 }
 0x113   :  { %5993 = vst [vmem:[#allocation34_spill] sm:$0xff] %v4727_v49  ;;  %5994 = vst [vmem:[#allocation35_spill] sm:$0xff] %v4730_v17 }
 0x114   :  { %5995 = vst [vmem:[#allocation36_spill] sm:$0xff] %v4733_v9 }
 0x116   :  { %v562_v47 = vpop.f32.mrb[16].mxu0  ;;  %v894_v49 = vpop.f32.mrb[16].mxu1 }
 0x117   :  { %v4743_v51 = vadd.f32 %v562_v47, %v107_v56  ;;  %v941_v46 = vadd.f32 %v894_v49, %v417_v63  ;;  %v564_v17 = vpop.f32.mrb[17].mxu0  ;;  %v896_v6 = vpop.f32.mrb[17].mxu1 }
 0x118   :  { %v4746_v53 = vadd.f32 %v564_v17, %v4737_v30  ;;  %v948_v44 = vadd.f32 %v896_v6, %v419_v45  ;;  %v566_v9 = vpop.f32.mrb[18].mxu0  ;;  %v898_v54 = vpop.f32.mrb[18].mxu1 }
 0x119   :  { %5996 = vst [vmem:[#allocation37_spill] sm:$0xff] %v4743_v51  ;;  %v3040_v1 = vmul.f32 -1.442695, %v941_v46  ;;  %v4748_v35 = vadd.f32 %v566_v9, %v107_v56  ;;  %v568_v60 = vpop.f32.mrb[19].mxu0  ;;  %v899_v2 = vpop.f32.mrb[19].mxu1 }
 0x11a   :  { %5997 = vst [vmem:[#allocation38_spill] sm:$0xff] %v4746_v53  ;;  %v4751_v18 = vadd.f32 %v568_v60, %v4737_v30  ;;  %v3041_v46 = vmul.f32 -1.442695, %v948_v44 }
 0x11b   :  { %5998 = vst [vmem:[#allocation39_spill] sm:$0xff] %v4748_v35  ;;  %3724 = vpow2.f32 %v3040_v1 }
 0x11c   :  { %5999 = vst [vmem:[#allocation40_spill] sm:$0xff] %v4751_v18  ;;  %3726 = vpow2.f32 %v3041_v46 }
 0x11e   :  { %v572_v26 = vpop.f32.mrb[20].mxu0 }
 0x11f   :  { %v4753_v47 = vadd.f32 %v572_v26, %v107_v56  ;;  %v574_v49 = vpop.f32.mrb[21].mxu0 }
 0x120   :  { %v4756_v63 = vadd.f32 %v574_v49, %v4737_v30  ;;  %v576_v17 = vpop.f32.mrb[22].mxu0 }
 0x121   :  { %6000 = vst [vmem:[#allocation41_spill] sm:$0xff] %v4753_v47  ;;  %v4758_v6 = vadd.f32 %v576_v17, %v107_v56  ;;  %v578_v45 = vpop.f32.mrb[23].mxu0 }
 0x122   :  { %6001 = vst [vmem:[#allocation42_spill] sm:$0xff] %v4756_v63  ;;  %v4761_v9 = vadd.f32 %v578_v45, %v4737_v30 }
 0x123   :  { %6002 = vst [vmem:[#allocation43_spill] sm:$0xff] %v4758_v6 }
 0x124   :  { %6003 = vst [vmem:[#allocation44_spill] sm:$0xff] %v4761_v9 }
 0x125   :  { %v3725_v2 = vpop.eup %3724 }
 0x126   :  { %v582_v54 = vpop.f32.mrb[24].mxu0  ;;  %v945_v17 = vadd.f32 1.0, %v3725_v2 }
 0x127   :  { %v4763_v60 = vadd.f32 %v582_v54, %v107_v56  ;;  %v584_v1 = vpop.f32.mrb[25].mxu0 }
 0x128   :  { %v4766_v26 = vadd.f32 %v584_v1, %v4737_v30  ;;  %v586_v53 = vpop.f32.mrb[26].mxu0  ;;  %3728 = vrcp.f32 %v945_v17  ;;  %v3727_v1 = vpop.eup %3726 }
 0x129   :  { %6004 = vst [vmem:[#allocation45_spill] sm:$0xff] %v4763_v60  ;;  %v4768_v49 = vadd.f32 %v586_v53, %v107_v56  ;;  %v588_v51 = vpop.f32.mrb[27].mxu0  ;;  %v4783_v53 = vld [vmem:[%s5918_s5] ss:$0 sm:$0xff]  ;;  %v952_v2 = vadd.f32 1.0, %v3727_v1 }
 0x12a   :  { %6005 = vst [vmem:[#allocation46_spill] sm:$0xff] %v4766_v26  ;;  %v4771_v18 = vadd.f32 %v588_v51, %v4737_v30  ;;  %v526_v51 = vadd.f32 %v525_v22, %v4629_v58 }
 0x12b   :  { %6006 = vst [vmem:[#allocation47_spill] sm:$0xff] %v4768_v49  ;;  %3730 = vrcp.f32 %v952_v2 }
 0x12c   :  { %6007 = vst [vmem:[#allocation48_spill] sm:$0xff] %v4771_v18 }
 0x12e   :  { %v592_v45 = vpop.f32.mrb[28].mxu0 }
 0x12f   :  { %v4773_v44 = vadd.f32 %v592_v45, %v107_v56  ;;  %v594_v35 = vpop.f32.mrb[29].mxu0 }
 0x130   :  { %v4776_v54 = vadd.f32 %v594_v35, %v4737_v30  ;;  %v596_v46 = vpop.f32.mrb[30].mxu0 }
 0x131   :  { %6008 = vst [vmem:[#allocation49_spill] sm:$0xff] %v4773_v44  ;;  %v4778_v63 = vpop.f32.mrb[31].mxu0  ;;  %v597_v17 = vadd.f32 %v596_v46, %v107_v56  ;;  %v490_v44 = vadd.f32 %v4640_v4, %v4635_v62 }
 0x132   :  { %6009 = vst [vmem:[#allocation50_spill] sm:$0xff] %v4776_v54  ;;  %v3729_v60 = vpop.eup %3728 }
 0x135   :  { %v3731_v46 = vpop.eup %3730 }
 0x136   :  { %v935_v47 = vpop.f32.mrb[32].mxu0  ;;  %v1137_v45 = vpop.f32.mrb[20].mxu1 }
 0x137   :  { %v955_v9 = vadd.f32 %v4783_v53, %v935_v47  ;;  %v1184_v6 = vadd.f32 %v1137_v45, %v526_v51  ;;  %v3277_v35 = vpop.f32.mrb[33].mxu0  ;;  %v1139_v26 = vpop.f32.mrb[21].mxu1  ;;  %v959_v51 = vsub.f32 1.0, %v3731_v46 }
 0x138   :  { %v1191_v18 = vadd.f32 %v1139_v26, %v597_v17  ;;  %v938_v49 = vpop.f32.mrb[34].mxu0  ;;  %v1141_v54 = vpop.f32.mrb[22].mxu1 }
 0x139   :  { %v956_v5 = vmul.f32 %v3729_v60, %v955_v9  ;;  %v3066_v3 = vmul.f32 -1.442695, %v1184_v6  ;;  %v3278_v58 = vpop.f32.mrb[35].mxu0  ;;  %v1142_v22 = vpop.f32.mrb[23].mxu1  ;;  %v961_v49 = vmul.f32 0.0, %v3731_v46  ;;  %v6012_v6 = vmov 0  }
 0x13a   :  { %v3067_v47 = vmul.f32 -1.442695, %v1191_v18  ;;  %v4789_v35 = vpop.permute.xlu0 %965  ;;  %v6011_v18 = vmov 0.0   ;;  %v4815_v60 = vld [vmem:[%s5920_s7] ss:$0 sm:$0xff] }
 0x13b   :  { %v957_v56 = vadd.f32 %v956_v5, %v490_v44  ;;  %3732 = vpow2.f32 %v3066_v3  ;;  %6010 = vst [vmem:[#allocation51_spill] sm:$0xff] %v4789_v35  ;;  %vm967_vm9 = vcmp.eq.s32.totalorder %v4789_v35, 1 }
 0x13c   :  { %vm3068_vm10 = vmpackc.low %vm967_vm9, %vm967_vm9 }
 0x13d   :  { %3734 = vtanh.f32 %v957_v56  ;;  %v599_v56 = vadd.f32 %v4778_v63, %v4737_v30 }
 0x13e   :  { %3736 = vpow2.f32 %v3067_v47 }
 0x145   :  { %v3733_v1 = vpop.eup %3732 }
 0x146   :  { %v1188_v62 = vadd.f32 1.0, %v3733_v1 }
 0x147   :  { %v3735_v45 = vpop.eup %3734 }
 0x148   :  { %v960_v26 = vmul.f32 %v3735_v45, %v959_v51  ;;  %3738 = vrcp.f32 %v1188_v62  ;;  %v3737_v9 = vpop.eup %3736 }
 0x149   :  { %v1195_v44 = vadd.f32 1.0, %v3737_v9  ;;  %v4864_v9 = vld [vmem:[%s5914_s4] ss:$12 sps:$4 sm:$0xff]  }
 0x14a   :  { %v962_v4 = vadd.f32 %v961_v49, %v960_v26  ;;  %v4842_v49 = vpop.permute.xlu0 %1208 }
 0x14b   :  { %3740 = vrcp.f32 %v1195_v44  ;;  %6013 = vst [vmem:[#allocation52_spill] sm:$0xff] %v4842_v49  ;;  %vm1210_vm11 = vcmp.eq.s32.totalorder %v4842_v49, 1  ;;  %v4871_v44 = vld [vmem:[%s5914_s4 + $0x1c] ss:$12 sps:$4 sm:$0xff]  }
 0x14c   :  { %v4797_v3 = vsel %vm967_vm9, %v962_v4, 0.0  ;;  %v3069_v5 = vpack.c.bf16 %v962_v4, %v962_v4  ;;  %vm3077_vm12 = vmpackc.low %vm1210_vm11, %vm1210_vm11  ;;  %v6048_v49 = vld [vmem:[#allocation18_spill] sm:$0xff] }
 0x14d   :  { %969 = vst [vmem:[%s5919_s8] sm:$0xff] %v4797_v3 }
 0x14e   :  { %3070 = vmatmul.mubr.msk.bf16.vlgmr.msra.gmra.mrb[24].mxu1 %vm3068_vm10, %v3069_v5  ;;  %3316 = vmatmul.mubr.msk.bf16.vlgmr.msra.gmra.mrb[40].mxu0 %vm3068_vm10, %v3069_v5  ;;  %v4854_v5 = vld [vmem:[%s5914_s4 + $0x4] ss:$12 sps:$4 sm:$0xff]  }
 0x14f   :  { %1339 = vmatpush1.bf16.msra.mxu1 %v4351_v8  ;;  %3320 = vmatpush3.bf16.msra.mxu0 %v4517_v38 }
 0x150   :  { %1340 = vmatprep.subr.bf16.mxu1 %v4358_v10  ;;  %3321 = vmatprep.subr.bf16.mxu0 %v6011_v18 }
 0x151   :  { %1370 = vmatprep.mubr.bf16.mxu1 %v6012_v6  ;;  %3335 = vmatprep.mubr.msk.bf16.mxu0 %vm4012_vm4, %v6011_v18 }
 0x152   :  { %v3739_v58 = vpop.eup %3738 }
 0x153   :  { %1341 = vmatpush1.bf16.msra.mxu1 %v4372_v12  ;;  %3322 = vmatpush3.bf16.msra.mxu0 %v4527_v40 }
 0x154   :  { %1342 = vmatprep.subr.bf16.mxu1 %v4379_v13  ;;  %3323 = vmatprep.subr.bf16.mxu0 %v6011_v18 }
 0x155   :  { %v3741_v30 = vpop.eup %3740 }
 0x156   :  { %v1178_v54 = vpop.f32.mrb[36].mxu0  ;;  %v1202_v63 = vsub.f32 1.0, %v3741_v30  ;;  %v1204_v45 = vmul.f32 0.0, %v3741_v30 }
 0x157   :  { %v1198_v2 = vadd.f32 %v4815_v60, %v1178_v54  ;;  %v3297_v17 = vpop.f32.mrb[37].mxu0  ;;  %1343 = vmatpush1.bf16.msra.mxu1 %v4393_v15  ;;  %3324 = vmatpush3.bf16.msra.mxu0 %v4539_v34  ;;  %v4881_v54 = vld [vmem:[%s5914_s4 + $0x18] ss:$12 sps:$4 sm:$0xff]  }
 0x158   :  { %v1181_v22 = vpop.f32.mrb[38].mxu0  ;;  %1344 = vmatprep.subr.bf16.mxu1 %v4400_v16  ;;  %3325 = vmatprep.subr.bf16.mxu0 %v6011_v18 }
 0x159   :  { %v1199_v46 = vmul.f32 %v3739_v58, %v1198_v2  ;;  %v3298_v47 = vpop.f32.mrb[39].mxu0  ;;  %v4895_v2 = vld [vmem:[%s5914_s4 + $0x30] ss:$12 sps:$4 sm:$0xff]  }
 0x15b   :  { %v1200_v1 = vadd.f32 %v1199_v46, %v599_v56  ;;  %1345 = vmatpush1.bf16.msra.mxu1 %v4420_v20  ;;  %3326 = vmatpush3.bf16.msra.mxu0 %v4548_v37 }
 0x15c   :  { %1346 = vmatprep.subr.bf16.mxu1 %v4428_v21  ;;  %3327 = vmatprep.subr.bf16.mxu0 %v6011_v18 }
 0x15d   :  { %3742 = vtanh.f32 %v1200_v1 }
 0x15f   :  { %1347 = vmatpush1.bf16.msra.mxu1 %v4442_v24  ;;  %3328 = vmatpush3.bf16.msra.mxu0 %v4557_v39 }
 0x160   :  { %1348 = vmatprep.subr.bf16.mxu1 %v4450_v25  ;;  %3329 = vmatprep.subr.bf16.mxu0 %v6011_v18 }
 0x163   :  { %1349 = vmatpush1.bf16.msra.mxu1 %v4464_v28  ;;  %3330 = vmatpush3.bf16.msra.mxu0 %v4566_v41 }
 0x164   :  { %1350 = vmatprep.subr.bf16.mxu1 %v4472_v29  ;;  %3331 = vmatprep.subr.bf16.mxu0 %v6011_v18 }
 0x167   :  { %v3743_v51 = vpop.eup %3742  ;;  %1351 = vmatpush1.bf16.msra.mxu1 %v4486_v32  ;;  %3332 = vmatpush3.bf16.msra.mxu0 %v4575_v42 }
 0x168   :  { %1352 = vmatprep.subr.bf16.mxu1 %v4493_v33  ;;  %3333 = vmatprep.subr.bf16.mxu0 %v6011_v18  ;;  %v1203_v26 = vmul.f32 %v3743_v51, %v1202_v63 }
 0x16a   :  { %v4845_v62 = vadd.f32 %v1204_v45, %v1203_v26 }
 0x16b   :  { %1353 = vmatpush1.bf16.msra.mxu1 %v4506_v36  ;;  %3334 = vmatpush3.bf16.msra.mxu0 %v4584_v43 }
 0x16c   :  { %v3078_v4 = vpack.c.bf16 %v4845_v62, %v4845_v62  ;;  %1456 = vmatprep.subr.bf16.mxu1 %v4854_v5  ;;  %3339 = vmatprep.subr.bf16.mxu0 %v6011_v18 }
 0x16e   :  { %3079 = vmatmul.mubr.msk.bf16.vlgmr.msra.gmra.mrb[28].mxu1 %vm3077_vm12, %v3078_v4  ;;  %3336 = vmatmul.mubr.msk.bf16.vlgmr.msra.gmra.mrb[44].mxu0 %vm3077_vm12, %v3078_v4 }
 0x16f   :  { %1457 = vmatpush1.bf16.msra.mxu1 %v4864_v9  ;;  %3340 = vmatpush3.bf16.msra.mxu0 %v4345_v7  ;;  %v4888_v7 = vld [vmem:[%s5914_s4 + $0x34] ss:$12 sps:$4 sm:$0xff]  }
 0x170   :  { %1458 = vmatprep.subr.bf16.mxu1 %v4871_v44  ;;  %3341 = vmatprep.subr.bf16.mxu0 %v6011_v18 }
 0x171   :  { %1488 = vmatprep.mubr.bf16.mxu1 %v6012_v6  ;;  %3355 = vmatprep.mubr.msk.bf16.mxu0 %vm4012_vm4, %v6011_v18 }
 0x173   :  { %1459 = vmatpush1.bf16.msra.mxu1 %v4881_v54  ;;  %3342 = vmatpush3.bf16.msra.mxu0 %v4365_v11 }
 0x174   :  { %1460 = vmatprep.subr.bf16.mxu1 %v4888_v7  ;;  %3343 = vmatprep.subr.bf16.mxu0 %v6011_v18 }
 0x177   :  { %1461 = vmatpush1.bf16.msra.mxu1 %v4895_v2  ;;  %3344 = vmatpush3.bf16.msra.mxu0 %v4386_v14 }
 0x178   :  { %1462 = vmatprep.subr.bf16.mxu1 %v4231_v48  ;;  %3345 = vmatprep.subr.bf16.mxu0 %v6011_v18  ;;  %v6014_v48 = vld [vmem:[#allocation5_spill] sm:$0xff] }
 0x17b   :  { %1463 = vmatpush1.bf16.msra.mxu1 %v4241_v50  ;;  %3346 = vmatpush3.bf16.msra.mxu0 %v4415_v19  ;;  %v6015_v50 = vld [vmem:[#allocation6_spill] sm:$0xff]  ;;  %v6019_v19 = vld [vmem:[#allocation12_spill] sm:$0xff] }
 0x17c   :  { %1464 = vmatprep.subr.bf16.mxu1 %v4251_v52  ;;  %3347 = vmatprep.subr.bf16.mxu0 %v6011_v18  ;;  %v6016_v52 = vld [vmem:[#allocation8_spill] sm:$0xff] }
 0x17f   :  { %1465 = vmatpush1.bf16.msra.mxu1 %v4267_v55  ;;  %3348 = vmatpush3.bf16.msra.mxu0 %v4437_v23  ;;  %v6017_v55 = vld [vmem:[#allocation7_spill] sm:$0xff] }
 0x180   :  { %1466 = vmatprep.subr.bf16.mxu1 %v4276_v57  ;;  %3349 = vmatprep.subr.bf16.mxu0 %v6011_v18 }
 0x183   :  { %1467 = vmatpush1.bf16.msra.mxu1 %v4287_v59  ;;  %3350 = vmatpush3.bf16.msra.mxu0 %v4459_v27 }
 0x184   :  { %1468 = vmatprep.subr.bf16.mxu1 %v4296_v61  ;;  %3351 = vmatprep.subr.bf16.mxu0 %v6011_v18  ;;  %v6018_v61 = vld [vmem:[#allocation10_spill] sm:$0xff] }
 0x187   :  { %1469 = vmatpush1.bf16.msra.mxu1 %v4311_v0  ;;  %3352 = vmatpush3.bf16.msra.mxu0 %v4481_v31 }
 0x188   :  { %1470 = vmatprep.subr.bf16.mxu1 %v6014_v48  ;;  %3353 = vmatprep.subr.bf16.mxu0 %v6011_v18 }
 0x18b   :  { %1471 = vmatpush1.bf16.msra.mxu1 %v6015_v50  ;;  %3354 = vmatpush3.bf16.msra.mxu0 %v6016_v52  ;;  %v6020_v50 = vld [vmem:[#allocation11_spill] sm:$0xff] }
 0x18c   :  { %1574 = vmatprep.subr.bf16.mxu1 %v6017_v55  ;;  %3359 = vmatprep.subr.bf16.mxu0 %v6011_v18 }
 0x221   :  { %v1254_v57 = vpop.f32.mrb[24].mxu1  ;;  %v1295_v59 = vpop.f32.mrb[40].mxu0 }
 0x222   :  { %v1301_v11 = vadd.f32 %v1254_v57, %v6018_v61  ;;  %v1256_v14 = vpop.f32.mrb[25].mxu1  ;;  %v3317_v0 = vpop.f32.mrb[41].mxu0  ;;  %v1315_v26 = vadd.f32 %v4783_v53, %v1295_v59 }
 0x223   :  { %v1308_v17 = vadd.f32 %v1256_v14, %v6019_v19  ;;  %v1258_v58 = vpop.f32.mrb[26].mxu1  ;;  %v1298_v22 = vpop.f32.mrb[42].mxu0 }
 0x224   :  { %v3074_v56 = vmul.f32 -1.442695, %v1301_v11  ;;  %v1259_v46 = vpop.f32.mrb[27].mxu1  ;;  %v3318_v47 = vpop.f32.mrb[43].mxu0  ;;  %v6021_v11 = vld [vmem:[#allocation33_spill] sm:$0xff] }
 0x225   :  { %v3075_v1 = vmul.f32 -1.442695, %v1308_v17  ;;  %v6022_v17 = vld [vmem:[#allocation49_spill] sm:$0xff] }
 0x226   :  { %3744 = vpow2.f32 %v3074_v56 }
 0x227   :  { %3746 = vpow2.f32 %v3075_v1 }
 0x230   :  { %v3745_v30 = vpop.eup %3744 }
 0x231   :  { %v1305_v63 = vadd.f32 1.0, %v3745_v30  ;;  %v3747_v51 = vpop.eup %3746 }
 0x232   :  { %v1312_v45 = vadd.f32 1.0, %v3747_v51 }
 0x233   :  { %3748 = vrcp.f32 %v1305_v63 }
 0x234   :  { %3750 = vrcp.f32 %v1312_v45  ;;  %v4927_v45 = vpop.permute.xlu1 %1325 }
 0x235   :  { %6023 = vst [vmem:[#allocation5_spill] sm:$0xff] %v4927_v45  ;;  %vm1327_vm13 = vcmp.eq.s32.totalorder %v4927_v45, 1 }
 0x23d   :  { %v3749_v4 = vpop.eup %3748 }
 0x23e   :  { %v1316_v48 = vmul.f32 %v3749_v4, %v1315_v26  ;;  %v3751_v59 = vpop.eup %3750 }
 0x23f   :  { %v1319_v63 = vsub.f32 1.0, %v3751_v59  ;;  %v1321_v4 = vmul.f32 %v3751_v59, %v4797_v3  ;;  %v6036_v59 = vld [vmem:[#allocation16_spill] sm:$0xff] }
 0x240   :  { %v1317_v55 = vadd.f32 %v1316_v48, %v6020_v50 }
 0x241   :  { %v1372_v57 = vpop.f32.mrb[28].mxu1  ;;  %v1413_v61 = vpop.f32.mrb[44].mxu0 }
 0x242   :  { %3752 = vtanh.f32 %v1317_v55  ;;  %v1419_v14 = vadd.f32 %v1372_v57, %v6021_v11  ;;  %v1374_v0 = vpop.f32.mrb[29].mxu1  ;;  %v3337_v19 = vpop.f32.mrb[45].mxu0 }
 0x243   :  { %v1426_v58 = vadd.f32 %v1374_v0, %v6022_v17  ;;  %v1376_v22 = vpop.f32.mrb[30].mxu1  ;;  %v1416_v56 = vpop.f32.mrb[46].mxu0  ;;  %v5084_v19 = vld [vmem:[%s5914_s4 + $0x90] ss:$12 sps:$4 sm:$0xff]   ;;  %v5098_v17 = vld [vmem:[%s5914_s4 + $0xa8] ss:$12 sps:$4 sm:$0xff]  }
 0x244   :  { %v3083_v46 = vmul.f32 -1.442695, %v1419_v14  ;;  %v1377_v47 = vpop.f32.mrb[31].mxu1  ;;  %v3338_v1 = vpop.f32.mrb[47].mxu0  ;;  %6031 = vst [vmem:[#allocation33_spill] sm:$0xff] %v5084_v19  ;;  %v6035_v56 = vld [vmem:[#allocation14_spill] sm:$0xff] }
 0x245   :  { %v3084_v30 = vmul.f32 -1.442695, %v1426_v58 }
 0x246   :  { %3754 = vpow2.f32 %v3083_v46 }
 0x247   :  { %3756 = vpow2.f32 %v3084_v30 }
 0x24c   :  { %v3753_v51 = vpop.eup %3752 }
 0x24d   :  { %v1320_v26 = vmul.f32 %v3753_v51, %v1319_v63 }
 0x24f   :  { %v1322_v48 = vadd.f32 %v1321_v4, %v1320_v26 }
 0x250   :  { %v3755_v50 = vpop.eup %3754 }
 0x251   :  { %v1423_v55 = vadd.f32 1.0, %v3755_v50  ;;  %v4934_v57 = vsel %vm1327_vm13, %v1322_v48, %v4797_v3  ;;  %v1329_v11 = vsel %vm1327_vm13, %v1322_v48, 0.0  ;;  %v3757_v3 = vpop.eup %3756 }
 0x252   :  { %3076 = vst [vmem:[%s5919_s8 + $0x8] sm:$0xff] %v1329_v11  ;;  %v1455_v14 = vpack.c.bf16 %v4934_v57, %v4934_v57  ;;  %v1430_v0 = vadd.f32 1.0, %v3757_v3 }
 0x253   :  { %3758 = vrcp.f32 %v1423_v55 }
 0x254   :  { %1489 = vmatmul.mubr.bf16.vlgmr.msra.gmra.mrb[32].mxu1 %v1455_v14  ;;  %3356 = vmatmul.mubr.bf16.vlgmr.msra.gmra.mrb[48].mxu0 %v1455_v14  ;;  %3760 = vrcp.f32 %v1430_v0 }
 0x255   :  { %1575 = vmatpush1.bf16.msra.mxu1 %v4351_v8  ;;  %3360 = vmatpush3.bf16.msra.mxu0 %v4517_v38  ;;  %v1433_v8 = vadd.f32 %v4815_v60, %v1413_v61  ;;  %v5070_v61 = vld [vmem:[%s5914_s4 + $0x78] ss:$12 sps:$4 sm:$0xff]  }
 0x256   :  { %1576 = vmatprep.subr.bf16.mxu1 %v4358_v10  ;;  %3361 = vmatprep.subr.bf16.mxu0 %v6011_v18  ;;  %6029 = vst [vmem:[#allocation12_spill] sm:$0xff] %v5070_v61 }
 0x257   :  { %1606 = vmatprep.mubr.bf16.mxu1 %v6012_v6  ;;  %3375 = vmatprep.mubr.msk.bf16.mxu0 %vm4012_vm4, %v6011_v18 }
 0x259   :  { %1577 = vmatpush1.bf16.msra.mxu1 %v4372_v12  ;;  %3362 = vmatpush3.bf16.msra.mxu0 %v4527_v40  ;;  %v6024_v12 = vld [vmem:[#allocation50_spill] sm:$0xff] }
 0x25a   :  { %1578 = vmatprep.subr.bf16.mxu1 %v4379_v13  ;;  %3363 = vmatprep.subr.bf16.mxu0 %v6011_v18  ;;  %6033 = vst [vmem:[#allocation50_spill] sm:$0xff] %v5098_v17 }
 0x25d   :  { %v3759_v10 = vpop.eup %3758  ;;  %1579 = vmatpush1.bf16.msra.mxu1 %v4393_v15  ;;  %3364 = vmatpush3.bf16.msra.mxu0 %v4539_v34  ;;  %v5024_v34 = vld [vmem:[%s5914_s4 + $0x38] ss:$12 sps:$4 sm:$0xff]  }
 0x25e   :  { %v1434_v38 = vmul.f32 %v3759_v10, %v1433_v8  ;;  %1580 = vmatprep.subr.bf16.mxu1 %v4400_v16  ;;  %3365 = vmatprep.subr.bf16.mxu0 %v6011_v18  ;;  %v3761_v13 = vpop.eup %3760  ;;  %v6037_v10 = vld [vmem:[#allocation15_spill] sm:$0xff] }
 0x25f   :  { %v1437_v15 = vsub.f32 1.0, %v3761_v13 }
 0x260   :  { %v1435_v40 = vadd.f32 %v1434_v38, %v6024_v12 }
 0x261   :  { %1581 = vmatpush1.bf16.msra.mxu1 %v4420_v20  ;;  %3366 = vmatpush3.bf16.msra.mxu0 %v4548_v37  ;;  %v4975_v20 = vsel %vm1210_vm11, %v4845_v62, 0.0  ;;  %v5030_v37 = vld [vmem:[%s5914_s4 + $0x4c] ss:$12 sps:$4 sm:$0xff]   ;;  %v5063_v62 = vld [vmem:[%s5914_s4 + $0x7c] ss:$12 sps:$4 sm:$0xff]  }
 0x262   :  { %3762 = vtanh.f32 %v1435_v40  ;;  %1582 = vmatprep.subr.bf16.mxu1 %v4428_v21  ;;  %3367 = vmatprep.subr.bf16.mxu0 %v6011_v18  ;;  %6025 = vst [vmem:[#allocation6_spill] sm:$0xff] %v4975_v20  ;;  %6028 = vst [vmem:[#allocation10_spill] sm:$0xff] %v5063_v62 }
 0x265   :  { %1583 = vmatpush1.bf16.msra.mxu1 %v4442_v24  ;;  %3368 = vmatpush3.bf16.msra.mxu0 %v4557_v39  ;;  %v1439_v24 = vmul.f32 %v3761_v13, %v4975_v20  ;;  %v5037_v39 = vld [vmem:[%s5914_s4 + $0x48] ss:$12 sps:$4 sm:$0xff]   ;;  %v6038_v13 = vld [vmem:[#allocation29_spill] sm:$0xff] }
 0x266   :  { %1584 = vmatprep.subr.bf16.mxu1 %v4450_v25  ;;  %3369 = vmatprep.subr.bf16.mxu0 %v6011_v18  ;;  %v4982_v25 = vpop.permute.xlu1 %1443 }
 0x267   :  { %6026 = vst [vmem:[#allocation8_spill] sm:$0xff] %v4982_v25  ;;  %vm1445_vm14 = vcmp.eq.s32.totalorder %v4982_v25, 1 }
 0x269   :  { %1585 = vmatpush1.bf16.msra.mxu1 %v4464_v28  ;;  %3370 = vmatpush3.bf16.msra.mxu0 %v4566_v41  ;;  %v5043_v41 = vld [vmem:[%s5914_s4 + $0x50] ss:$12 sps:$4 sm:$0xff]  }
 0x26a   :  { %1586 = vmatprep.subr.bf16.mxu1 %v4472_v29  ;;  %3371 = vmatprep.subr.bf16.mxu0 %v6011_v18 }
 0x26c   :  { %v3763_v16 = vpop.eup %3762 }
 0x26d   :  { %v1438_v21 = vmul.f32 %v3763_v16, %v1437_v15  ;;  %1587 = vmatpush1.bf16.msra.mxu1 %v4486_v32  ;;  %3372 = vmatpush3.bf16.msra.mxu0 %v4575_v42  ;;  %v5049_v42 = vld [vmem:[%s5914_s4 + $0x64] ss:$12 sps:$4 sm:$0xff]  }
 0x26e   :  { %1588 = vmatprep.subr.bf16.mxu1 %v4493_v33  ;;  %3373 = vmatprep.subr.bf16.mxu0 %v6011_v18  ;;  %v5003_v33 = vld [vmem:[%s5914_s4 + $0x8] ss:$12 sps:$4 sm:$0xff]  }
 0x26f   :  { %v4984_v28 = vadd.f32 %v1439_v24, %v1438_v21  ;;  %v6039_v24 = vld [vmem:[#allocation47_spill] sm:$0xff] }
 0x271   :  { %6027 = vst [vmem:[#allocation7_spill] sm:$0xff] %v4984_v28  ;;  %v4991_v29 = vsel %vm1445_vm14, %v4984_v28, %v4975_v20  ;;  %1589 = vmatpush1.bf16.msra.mxu1 %v4506_v36  ;;  %3374 = vmatpush3.bf16.msra.mxu0 %v4584_v43  ;;  %v5015_v36 = vld [vmem:[%s5914_s4 + $0x20] ss:$12 sps:$4 sm:$0xff]  }
 0x272   :  { %v1573_v32 = vpack.c.bf16 %v4991_v29, %v4991_v29  ;;  %1692 = vmatprep.subr.bf16.mxu1 %v4854_v5  ;;  %3379 = vmatprep.subr.bf16.mxu0 %v6011_v18  ;;  %v5056_v43 = vld [vmem:[%s5914_s4 + $0x60] ss:$12 sps:$4 sm:$0xff]  }
 0x274   :  { %1607 = vmatmul.mubr.bf16.vlgmr.msra.gmra.mrb[36].mxu1 %v1573_v32  ;;  %3376 = vmatmul.mubr.bf16.vlgmr.msra.gmra.mrb[52].mxu0 %v1573_v32 }
 0x275   :  { %1693 = vmatpush1.bf16.msra.mxu1 %v4864_v9  ;;  %3380 = vmatpush3.bf16.msra.mxu0 %v5003_v33 }
 0x276   :  { %1694 = vmatprep.subr.bf16.mxu1 %v4871_v44  ;;  %3381 = vmatprep.subr.bf16.mxu0 %v6011_v18 }
 0x277   :  { %1724 = vmatprep.mubr.bf16.mxu1 %v6012_v6  ;;  %3395 = vmatprep.mubr.msk.bf16.mxu0 %vm4012_vm4, %v6011_v18 }
 0x279   :  { %1695 = vmatpush1.bf16.msra.mxu1 %v4881_v54  ;;  %3382 = vmatpush3.bf16.msra.mxu0 %v5015_v36 }
 0x27a   :  { %1696 = vmatprep.subr.bf16.mxu1 %v4888_v7  ;;  %3383 = vmatprep.subr.bf16.mxu0 %v6011_v18 }
 0x27d   :  { %1697 = vmatpush1.bf16.msra.mxu1 %v4895_v2  ;;  %3384 = vmatpush3.bf16.msra.mxu0 %v5024_v34 }
 0x27e   :  { %1698 = vmatprep.subr.bf16.mxu1 %v5030_v37  ;;  %3385 = vmatprep.subr.bf16.mxu0 %v6011_v18 }
 0x281   :  { %1699 = vmatpush1.bf16.msra.mxu1 %v5037_v39  ;;  %3386 = vmatpush3.bf16.msra.mxu0 %v5043_v41 }
 0x282   :  { %1700 = vmatprep.subr.bf16.mxu1 %v5049_v42  ;;  %3387 = vmatprep.subr.bf16.mxu0 %v6011_v18 }
 0x285   :  { %1701 = vmatpush1.bf16.msra.mxu1 %v5056_v43  ;;  %3388 = vmatpush3.bf16.msra.mxu0 %v4437_v23  ;;  %v5077_v23 = vld [vmem:[%s5914_s4 + $0x94] ss:$12 sps:$4 sm:$0xff]  }
 0x286   :  { %1702 = vmatprep.subr.bf16.mxu1 %v5063_v62  ;;  %3389 = vmatprep.subr.bf16.mxu0 %v6011_v18  ;;  %6030 = vst [vmem:[#allocation11_spill] sm:$0xff] %v5077_v23 }
 0x289   :  { %1703 = vmatpush1.bf16.msra.mxu1 %v5070_v61  ;;  %3390 = vmatpush3.bf16.msra.mxu0 %v4459_v27  ;;  %v5091_v27 = vld [vmem:[%s5914_s4 + $0xac] ss:$12 sps:$4 sm:$0xff]  }
 0x28a   :  { %1704 = vmatprep.subr.bf16.mxu1 %v5077_v23  ;;  %3391 = vmatprep.subr.bf16.mxu0 %v6011_v18  ;;  %6032 = vst [vmem:[#allocation49_spill] sm:$0xff] %v5091_v27 }
 0x28d   :  { %1705 = vmatpush1.bf16.msra.mxu1 %v5084_v19  ;;  %3392 = vmatpush3.bf16.msra.mxu0 %v4481_v31  ;;  %v5105_v31 = vld [vmem:[%s5915_s6 + $0x4] ss:$12 sps:$4 sm:$0xff]  }
 0x28e   :  { %1706 = vmatprep.subr.bf16.mxu1 %v5091_v27  ;;  %3393 = vmatprep.subr.bf16.mxu0 %v6011_v18  ;;  %6034 = vst [vmem:[#allocation53_spill] sm:$0xff] %v5105_v31 }
 0x291   :  { %1707 = vmatpush1.bf16.msra.mxu1 %v5098_v17  ;;  %3394 = vmatpush3.bf16.msra.mxu0 %v6016_v52 }
 0x292   :  { %1810 = vmatprep.subr.bf16.mxu1 %v5105_v31  ;;  %3399 = vmatprep.subr.bf16.mxu0 %v6011_v18 }
 0x327   :  { %v1490_v58 = vpop.f32.mrb[32].mxu1  ;;  %v1531_v22 = vpop.f32.mrb[48].mxu0 }
 0x328   :  { %v1537_v46 = vadd.f32 %v1490_v58, %v6035_v56  ;;  %v1492_v47 = vpop.f32.mrb[33].mxu1  ;;  %v3357_v1 = vpop.f32.mrb[49].mxu0  ;;  %v1551_v3 = vadd.f32 %v4783_v53, %v1531_v22 }
 0x329   :  { %v1544_v30 = vadd.f32 %v1492_v47, %v6036_v59  ;;  %v1494_v63 = vpop.f32.mrb[34].mxu1  ;;  %v1534_v51 = vpop.f32.mrb[50].mxu0 }
 0x32a   :  { %v3085_v52 = vmul.f32 -1.442695, %v1537_v46  ;;  %v1495_v26 = vpop.f32.mrb[35].mxu1  ;;  %v3358_v4 = vpop.f32.mrb[51].mxu0 }
 0x32b   :  { %v3086_v48 = vmul.f32 -1.442695, %v1544_v30  ;;  %v5116_v26 = vpop.permute.xlu0 %1561 }
 0x32c   :  { %3764 = vpow2.f32 %v3085_v52  ;;  %6040 = vst [vmem:[#allocation14_spill] sm:$0xff] %v5116_v26  ;;  %vm1563_vm15 = vcmp.eq.s32.totalorder %v5116_v26, 1  ;;  %v6049_v26 = vld [vmem:[#allocation20_spill] sm:$0xff] }
 0x32d   :  { %3766 = vpow2.f32 %v3086_v48 }
 0x336   :  { %v3765_v50 = vpop.eup %3764 }
 0x337   :  { %v1541_v55 = vadd.f32 1.0, %v3765_v50  ;;  %v3767_v11 = vpop.eup %3766 }
 0x338   :  { %v1548_v14 = vadd.f32 1.0, %v3767_v11 }
 0x339   :  { %3768 = vrcp.f32 %v1541_v55 }
 0x33a   :  { %3770 = vrcp.f32 %v1548_v14  ;;  %v5132_v14 = vld [vmem:[%s5915_s6] ss:$12 sps:$4 sm:$0xff]  }
 0x343   :  { %v3769_v0 = vpop.eup %3768 }
 0x344   :  { %v1552_v8 = vmul.f32 %v3769_v0, %v1551_v3  ;;  %v3771_v22 = vpop.eup %3770  ;;  %v5138_v3 = vld [vmem:[%s5915_s6 + $0x8] ss:$12 sps:$4 sm:$0xff]  }
 0x345   :  { %v1555_v30 = vsub.f32 1.0, %v3771_v22  ;;  %v1557_v51 = vmul.f32 %v3771_v22, %v4934_v57  ;;  %v5219_v22 = vld [vmem:[%s5915_s6 + $0x68] ss:$12 sps:$4 sm:$0xff]  }
 0x346   :  { %v1553_v38 = vadd.f32 %v1552_v8, %v6037_v10  ;;  %v5154_v8 = vld [vmem:[%s5915_s6 + $0x18] ss:$12 sps:$4 sm:$0xff]   ;;  %v5160_v10 = vld [vmem:[%s5915_s6 + $0x20] ss:$12 sps:$4 sm:$0xff]  }
 0x347   :  { %v1608_v12 = vpop.f32.mrb[36].mxu1  ;;  %v1649_v40 = vpop.f32.mrb[52].mxu0 }
 0x348   :  { %3772 = vtanh.f32 %v1553_v38  ;;  %v1655_v15 = vadd.f32 %v1608_v12, %v6038_v13  ;;  %v1610_v16 = vpop.f32.mrb[37].mxu1  ;;  %v3377_v21 = vpop.f32.mrb[53].mxu0  ;;  %v5166_v12 = vld [vmem:[%s5915_s6 + $0x34] ss:$12 sps:$4 sm:$0xff]   ;;  %v1669_v13 = vadd.f32 %v4815_v60, %v1649_v40  ;;  %v5186_v40 = vld [vmem:[%s5915_s6 + $0x4c] ss:$12 sps:$4 sm:$0xff]  }
 0x349   :  { %v1662_v32 = vadd.f32 %v1610_v16, %v6039_v24  ;;  %v1612_v58 = vpop.f32.mrb[38].mxu1  ;;  %v1652_v56 = vpop.f32.mrb[54].mxu0  ;;  %v5174_v16 = vld [vmem:[%s5915_s6 + $0x30] ss:$12 sps:$4 sm:$0xff]   ;;  %v5180_v21 = vld [vmem:[%s5915_s6 + $0x38] ss:$12 sps:$4 sm:$0xff]  }
 0x34a   :  { %v3088_v46 = vmul.f32 -1.442695, %v1655_v15  ;;  %v1613_v47 = vpop.f32.mrb[39].mxu1  ;;  %v3378_v1 = vpop.f32.mrb[55].mxu0  ;;  %v5194_v56 = vld [vmem:[%s5915_s6 + $0x48] ss:$12 sps:$4 sm:$0xff]  }
 0x34b   :  { %v3089_v59 = vmul.f32 -1.442695, %v1662_v32  ;;  %v6042_v32 = vld [vmem:[#allocation48_spill] sm:$0xff]  ;;  %v5206_v47 = vld [vmem:[%s5915_s6 + $0x64] ss:$12 sps:$4 sm:$0xff]  }
 0x34c   :  { %3774 = vpow2.f32 %v3088_v46  ;;  %v5200_v46 = vld [vmem:[%s5915_s6 + $0x50] ss:$12 sps:$4 sm:$0xff]   ;;  %v5213_v1 = vld [vmem:[%s5915_s6 + $0x60] ss:$12 sps:$4 sm:$0xff]  }
 0x34d   :  { %3776 = vpow2.f32 %v3089_v59  ;;  %v5225_v59 = vld [vmem:[%s5915_s6 + $0x7c] ss:$12 sps:$4 sm:$0xff]  }
 0x352   :  { %v3773_v63 = vpop.eup %3772 }
 0x353   :  { %v1556_v52 = vmul.f32 %v3773_v63, %v1555_v30  ;;  %v5232_v63 = vld [vmem:[%s5915_s6 + $0x78] ss:$12 sps:$4 sm:$0xff]  }
 0x355   :  { %v5118_v4 = vadd.f32 %v1557_v51, %v1556_v52  ;;  %v5238_v51 = vld [vmem:[%s5915_s6 + $0x80] ss:$12 sps:$4 sm:$0xff]  }
 0x356   :  { %v3775_v48 = vpop.eup %3774  ;;  %v5244_v52 = vld [vmem:[%s5915_s6 + $0x94] ss:$12 sps:$4 sm:$0xff]  }
 0x357   :  { %6041 = vst [vmem:[#allocation16_spill] sm:$0xff] %v5118_v4  ;;  %v1659_v50 = vadd.f32 1.0, %v3775_v48  ;;  %v5125_v55 = vsel %vm1563_vm15, %v5118_v4, %v4934_v57  ;;  %v5144_v57 = vld [vmem:[%s5915_s6 + $0x1c] ss:$12 sps:$4 sm:$0xff]   ;;  %v3777_v0 = vpop.eup %3776 }
 0x358   :  { %v1691_v11 = vpack.c.bf16 %v5125_v55, %v5125_v55  ;;  %v1666_v38 = vadd.f32 1.0, %v3777_v0  ;;  %v5252_v0 = vld [vmem:[%s5915_s6 + $0x90] ss:$12 sps:$4 sm:$0xff]  }
 0x359   :  { %3778 = vrcp.f32 %v1659_v50 }
 0x35a   :  { %1725 = vmatmul.mubr.bf16.vlgmr.msra.gmra.mrb[40].mxu1 %v1691_v11  ;;  %3396 = vmatmul.mubr.bf16.vlgmr.msra.gmra.mrb[56].mxu0 %v1691_v11  ;;  %3780 = vrcp.f32 %v1666_v38  ;;  %v5258_v38 = vld [vmem:[%s5915_s6 + $0x98] ss:$12 sps:$4 sm:$0xff]  }
 0x35b   :  { %1811 = vmatpush1.bf16.msra.mxu1 %v5132_v14  ;;  %3400 = vmatpush3.bf16.msra.mxu0 %v5138_v3 }
 0x35c   :  { %1812 = vmatprep.subr.bf16.mxu1 %v5144_v57  ;;  %3401 = vmatprep.subr.bf16.mxu0 %v6011_v18 }
 0x35d   :  { %1842 = vmatprep.mubr.bf16.mxu1 %v6012_v6  ;;  %3415 = vmatprep.mubr.msk.bf16.mxu0 %vm4012_vm4, %v6011_v18 }
 0x35f   :  { %1813 = vmatpush1.bf16.msra.mxu1 %v5154_v8  ;;  %3402 = vmatpush3.bf16.msra.mxu0 %v5160_v10 }
 0x360   :  { %1814 = vmatprep.subr.bf16.mxu1 %v5166_v12  ;;  %3403 = vmatprep.subr.bf16.mxu0 %v6011_v18 }
 0x363   :  { %v3779_v15 = vpop.eup %3778  ;;  %1815 = vmatpush1.bf16.msra.mxu1 %v5174_v16  ;;  %3404 = vmatpush3.bf16.msra.mxu0 %v5180_v21 }
 0x364   :  { %v1670_v24 = vmul.f32 %v3779_v15, %v1669_v13  ;;  %1816 = vmatprep.subr.bf16.mxu1 %v5186_v40  ;;  %3405 = vmatprep.subr.bf16.mxu0 %v6011_v18  ;;  %v3781_v30 = vpop.eup %3780  ;;  %v5264_v15 = vld [vmem:[%s5915_s6 + $0xac] ss:$12 sps:$4 sm:$0xff]  }
 0x365   :  { %v1673_v48 = vsub.f32 1.0, %v3781_v30  ;;  %v1675_v11 = vmul.f32 %v3781_v30, %v4991_v29  ;;  %v5282_v30 = vld [vmem:[%s5915_s6 + $0xb0] ss:$12 sps:$4 sm:$0xff]  }
 0x366   :  { %v1671_v58 = vadd.f32 %v1670_v24, %v6042_v32  ;;  %v5268_v24 = vpop.permute.xlu1 %1679 }
 0x367   :  { %1817 = vmatpush1.bf16.msra.mxu1 %v5194_v56  ;;  %3406 = vmatpush3.bf16.msra.mxu0 %v5200_v46  ;;  %6043 = vst [vmem:[#allocation15_spill] sm:$0xff] %v5268_v24  ;;  %vm1681_vm0 = vcmp.eq.s32.totalorder %v5268_v24, 1 }
 0x368   :  { %3782 = vtanh.f32 %v1671_v58  ;;  %1818 = vmatprep.subr.bf16.mxu1 %v5206_v47  ;;  %3407 = vmatprep.subr.bf16.mxu0 %v6011_v18  ;;  %v5276_v58 = vld [vmem:[%s5915_s6 + $0xa8] ss:$12 sps:$4 sm:$0xff]  }
 0x36b   :  { %1819 = vmatpush1.bf16.msra.mxu1 %v5213_v1  ;;  %3408 = vmatpush3.bf16.msra.mxu0 %v5219_v22 }
 0x36c   :  { %1820 = vmatprep.subr.bf16.mxu1 %v5225_v59  ;;  %3409 = vmatprep.subr.bf16.mxu0 %v6011_v18 }
 0x36f   :  { %1821 = vmatpush1.bf16.msra.mxu1 %v5232_v63  ;;  %3410 = vmatpush3.bf16.msra.mxu0 %v5238_v51 }
 0x370   :  { %1822 = vmatprep.subr.bf16.mxu1 %v5244_v52  ;;  %3411 = vmatprep.subr.bf16.mxu0 %v6011_v18 }
 0x372   :  { %v3783_v50 = vpop.eup %3782 }
 0x373   :  { %1823 = vmatpush1.bf16.msra.mxu1 %v5252_v0  ;;  %3412 = vmatpush3.bf16.msra.mxu0 %v5258_v38  ;;  %v1674_v13 = vmul.f32 %v3783_v50, %v1673_v48 }
 0x374   :  { %1824 = vmatprep.subr.bf16.mxu1 %v5264_v15  ;;  %3413 = vmatprep.subr.bf16.mxu0 %v6011_v18 }
 0x375   :  { %v5270_v32 = vadd.f32 %v1675_v11, %v1674_v13  ;;  %v5327_v11 = vld [vmem:[%s5914_s4 + $0x80] ss:$12 sps:$4 sm:$0xff]   ;;  %v5336_v13 = vld [vmem:[%s5914_s4 + $0x98] ss:$12 sps:$4 sm:$0xff]  }
 0x376   :  { %6045 = vst [vmem:[#allocation47_spill] sm:$0xff] %v5327_v11  ;;  %6046 = vst [vmem:[#allocation48_spill] sm:$0xff] %v5336_v13 }
 0x377   :  { %6044 = vst [vmem:[#allocation29_spill] sm:$0xff] %v5270_v32  ;;  %1825 = vmatpush1.bf16.msra.mxu1 %v5276_v58  ;;  %3414 = vmatpush3.bf16.msra.mxu0 %v5282_v30  ;;  %v5289_v48 = vsel %vm1681_vm0, %v5270_v32, %v4991_v29  ;;  %v5318_v29 = vld [vmem:[%s5914_s4 + $0x68] ss:$12 sps:$4 sm:$0xff]  }
 0x378   :  { %v1809_v50 = vpack.c.bf16 %v5289_v48, %v5289_v48  ;;  %1927 = vmatprep.subr.bf16.mxu1 %v4854_v5  ;;  %3419 = vmatprep.subr.bf16.mxu0 %v6011_v18 }
 0x37a   :  { %1843 = vmatmul.mubr.bf16.vlgmr.msra.gmra.mrb[44].mxu1 %v1809_v50  ;;  %3416 = vmatmul.mubr.bf16.vlgmr.msra.gmra.mrb[60].mxu0 %v1809_v50  ;;  %v5345_v50 = vld [vmem:[%s5914_s4 + $0xb0] ss:$12 sps:$4 sm:$0xff]  }
 0x37b   :  { %1928 = vmatpush1.bf16.msra.mxu1 %v4864_v9  ;;  %3420 = vmatpush3.bf16.msra.mxu0 %v5003_v33  ;;  %6047 = vst [vmem:[#allocation54_spill] sm:$0xff] %v5345_v50 }
 0x37c   :  { %1929 = vmatprep.subr.bf16.mxu1 %v4871_v44  ;;  %3421 = vmatprep.subr.bf16.mxu0 %v6011_v18 }
 0x37d   :  { %1959 = vmatprep.mubr.bf16.mxu1 %v6012_v6  ;;  %3435 = vmatprep.mubr.msk.bf16.mxu0 %vm4012_vm4, %v6011_v18 }
 0x37f   :  { %1930 = vmatpush1.bf16.msra.mxu1 %v4881_v54  ;;  %3422 = vmatpush3.bf16.msra.mxu0 %v5015_v36 }
 0x380   :  { %1931 = vmatprep.subr.bf16.mxu1 %v4888_v7  ;;  %3423 = vmatprep.subr.bf16.mxu0 %v6011_v18 }
 0x383   :  { %1932 = vmatpush1.bf16.msra.mxu1 %v4895_v2  ;;  %3424 = vmatpush3.bf16.msra.mxu0 %v5024_v34 }
 0x384   :  { %1933 = vmatprep.subr.bf16.mxu1 %v5030_v37  ;;  %3425 = vmatprep.subr.bf16.mxu0 %v6011_v18 }
 0x387   :  { %1934 = vmatpush1.bf16.msra.mxu1 %v5037_v39  ;;  %3426 = vmatpush3.bf16.msra.mxu0 %v5043_v41 }
 0x388   :  { %1935 = vmatprep.subr.bf16.mxu1 %v5049_v42  ;;  %3427 = vmatprep.subr.bf16.mxu0 %v6011_v18 }
 0x38b   :  { %1936 = vmatpush1.bf16.msra.mxu1 %v5056_v43  ;;  %3428 = vmatpush3.bf16.msra.mxu0 %v5318_v29 }
 0x38c   :  { %1937 = vmatprep.subr.bf16.mxu1 %v5063_v62  ;;  %3429 = vmatprep.subr.bf16.mxu0 %v6011_v18 }
 0x38f   :  { %1938 = vmatpush1.bf16.msra.mxu1 %v5070_v61  ;;  %3430 = vmatpush3.bf16.msra.mxu0 %v5327_v11 }
 0x390   :  { %1939 = vmatprep.subr.bf16.mxu1 %v5077_v23  ;;  %3431 = vmatprep.subr.bf16.mxu0 %v6011_v18 }
 0x393   :  { %1940 = vmatpush1.bf16.msra.mxu1 %v5084_v19  ;;  %3432 = vmatpush3.bf16.msra.mxu0 %v5336_v13 }
 0x394   :  { %1941 = vmatprep.subr.bf16.mxu1 %v5091_v27  ;;  %3433 = vmatprep.subr.bf16.mxu0 %v6011_v18 }
 0x397   :  { %1942 = vmatpush1.bf16.msra.mxu1 %v5098_v17  ;;  %3434 = vmatpush3.bf16.msra.mxu0 %v5345_v50 }
 0x398   :  { %2039 = vmatprep.subr.bf16.mxu1 %v5105_v31  ;;  %3439 = vmatprep.subr.bf16.mxu0 %v6011_v18 }
 0x42d   :  { %v1726_v20 = vpop.f32.mrb[40].mxu1  ;;  %v1767_v35 = vpop.f32.mrb[56].mxu0 }
 0x42e   :  { %v1773_v45 = vadd.f32 %v1726_v20, %v6048_v49  ;;  %v1728_v25 = vpop.f32.mrb[41].mxu1  ;;  %v3397_v28 = vpop.f32.mrb[57].mxu0  ;;  %v1787_v61 = vadd.f32 %v4783_v53, %v1767_v35 }
 0x42f   :  { %v1780_v4 = vadd.f32 %v1728_v25, %v6049_v26  ;;  %v1730_v32 = vpop.f32.mrb[42].mxu1  ;;  %v1770_v24 = vpop.f32.mrb[58].mxu0  ;;  %v6050_v28 = vld [vmem:[#allocation19_spill] sm:$0xff] }
 0x430   :  { %v3090_v17 = vmul.f32 -1.442695, %v1773_v45  ;;  %v1731_v27 = vpop.f32.mrb[43].mxu1  ;;  %v3398_v13 = vpop.f32.mrb[59].mxu0  ;;  %v6051_v45 = vld [vmem:[#allocation25_spill] sm:$0xff] }
 0x431   :  { %v3091_v19 = vmul.f32 -1.442695, %v1780_v4 }
 0x432   :  { %3784 = vpow2.f32 %v3090_v17 }
 0x433   :  { %3786 = vpow2.f32 %v3091_v19  ;;  %v6052_v19 = vld [vmem:[#allocation45_spill] sm:$0xff] }
 0x43c   :  { %v3785_v50 = vpop.eup %3784 }
 0x43d   :  { %v1777_v31 = vadd.f32 1.0, %v3785_v50  ;;  %v3787_v23 = vpop.eup %3786 }
 0x43e   :  { %v1784_v11 = vadd.f32 1.0, %v3787_v23 }
 0x43f   :  { %3788 = vrcp.f32 %v1777_v31 }
 0x440   :  { %3790 = vrcp.f32 %v1784_v11 }
 0x449   :  { %v3789_v49 = vpop.eup %3788 }
 0x44a   :  { %v1788_v20 = vmul.f32 %v3789_v49, %v1787_v61  ;;  %v3791_v53 = vpop.eup %3790  ;;  %v5356_v49 = vpop.permute.xlu0 %1797 }
 0x44b   :  { %v1791_v61 = vsub.f32 1.0, %v3791_v53  ;;  %vm1799_vm1 = vcmp.eq.s32.totalorder %v5356_v49, 1  ;;  %v5549_v49 = vld [vmem:[%s5914_s4] ss:$12 sps:$4 sm:$0xff]  }
 0x44c   :  { %v1789_v25 = vadd.f32 %v1788_v20, %v6050_v28  ;;  %v1793_v20 = vmul.f32 %v3791_v53, %v5125_v55 }
 0x44d   :  { %v1844_v26 = vpop.f32.mrb[44].mxu1  ;;  %v1885_v24 = vpop.f32.mrb[60].mxu0 }
 0x44e   :  { %3792 = vtanh.f32 %v1789_v25  ;;  %v1891_v27 = vadd.f32 %v1844_v26, %v6051_v45  ;;  %v1846_v17 = vpop.f32.mrb[45].mxu1  ;;  %v3417_v4 = vpop.f32.mrb[61].mxu0 }
 0x44f   :  { %v1898_v32 = vadd.f32 %v1846_v17, %v6052_v19  ;;  %v1848_v13 = vpop.f32.mrb[46].mxu1  ;;  %v1888_v31 = vpop.f32.mrb[62].mxu0  ;;  %v1905_v4 = vadd.f32 %v4815_v60, %v1885_v24 }
 0x450   :  { %v3093_v50 = vmul.f32 -1.442695, %v1891_v27  ;;  %v1849_v23 = vpop.f32.mrb[47].mxu1  ;;  %v3418_v62 = vpop.f32.mrb[63].mxu0  ;;  %v6053_v13 = vld [vmem:[#allocation46_spill] sm:$0xff] }
 0x451   :  { %v3094_v35 = vmul.f32 -1.442695, %v1898_v32  ;;  %v5399_v23 = vpop.permute.xlu1 %1915 }
 0x452   :  { %3794 = vpow2.f32 %v3093_v50  ;;  %vm1917_vm2 = vcmp.eq.s32.totalorder %v5399_v23, 1 }
 0x453   :  { %3796 = vpow2.f32 %v3094_v35 }
 0x458   :  { %v3793_v11 = vpop.eup %3792 }
 0x459   :  { %v1792_v28 = vmul.f32 %v3793_v11, %v1791_v61 }
 0x45b   :  { %v5359_v25 = vadd.f32 %v1793_v20, %v1792_v28  ;;  %v6061_v28 = vld [vmem:[#allocation50_spill] sm:$0xff] }
 0x45c   :  { %v3795_v26 = vpop.eup %3794 }
 0x45d   :  { %v1895_v45 = vadd.f32 1.0, %v3795_v26  ;;  %v5366_v62 = vsel %vm1799_vm1, %v5359_v25, %v5125_v55  ;;  %v3797_v17 = vpop.eup %3796  ;;  %v6062_v26 = vld [vmem:[#allocation54_spill] sm:$0xff] }
 0x45e   :  { %v1926_v27 = vpack.c.bf16 %v5366_v62, %v5366_v62  ;;  %v1902_v55 = vadd.f32 1.0, %v3797_v17 }
 0x45f   :  { %3798 = vrcp.f32 %v1895_v45  ;;  %v6063_v45 = vld [vmem:[#allocation53_spill] sm:$0xff] }
 0x460   :  { %1960 = vmatmul.mubr.bf16.vlgmr.msra.gmra.mrb[48].mxu1 %v1926_v27  ;;  %3436 = vmatmul.mubr.bf16.vlgmr.msra.gmra.mrb[64].mxu0 %v1926_v27  ;;  %3800 = vrcp.f32 %v1902_v55  ;;  %v6064_v55 = vld [vmem:[#allocation22_spill] sm:$0xff] }
 0x461   :  { %2040 = vmatpush1.bf16.msra.mxu1 %v5132_v14  ;;  %3440 = vmatpush3.bf16.msra.mxu0 %v5138_v3 }
 0x462   :  { %2041 = vmatprep.subr.bf16.mxu1 %v5144_v57  ;;  %3441 = vmatprep.subr.bf16.mxu0 %v6011_v18 }
 0x463   :  { %2071 = vmatprep.mubr.bf16.mxu1 %v6012_v6  ;;  %3455 = vmatprep.mubr.msk.bf16.mxu0 %vm4012_vm4, %v6011_v18 }
 0x465   :  { %2042 = vmatpush1.bf16.msra.mxu1 %v5154_v8  ;;  %3442 = vmatpush3.bf16.msra.mxu0 %v5160_v10 }
 0x466   :  { %2043 = vmatprep.subr.bf16.mxu1 %v5166_v12  ;;  %3443 = vmatprep.subr.bf16.mxu0 %v6011_v18 }
 0x469   :  { %v3799_v19 = vpop.eup %3798  ;;  %2044 = vmatpush1.bf16.msra.mxu1 %v5174_v16  ;;  %3444 = vmatpush3.bf16.msra.mxu0 %v5180_v21 }
 0x46a   :  { %v1906_v32 = vmul.f32 %v3799_v19, %v1905_v4  ;;  %2045 = vmatprep.subr.bf16.mxu1 %v5186_v40  ;;  %3445 = vmatprep.subr.bf16.mxu0 %v6011_v18  ;;  %v3801_v60 = vpop.eup %3800 }
 0x46b   :  { %v1909_v24 = vsub.f32 1.0, %v3801_v60  ;;  %v1911_v53 = vmul.f32 %v3801_v60, %v5289_v48 }
 0x46c   :  { %v1907_v31 = vadd.f32 %v1906_v32, %v6053_v13  ;;  %v6065_v13 = vld [vmem:[#allocation24_spill] sm:$0xff] }
 0x46d   :  { %2046 = vmatpush1.bf16.msra.mxu1 %v5194_v56  ;;  %3446 = vmatpush3.bf16.msra.mxu0 %v5200_v46 }
 0x46e   :  { %3802 = vtanh.f32 %v1907_v31  ;;  %2047 = vmatprep.subr.bf16.mxu1 %v5206_v47  ;;  %3447 = vmatprep.subr.bf16.mxu0 %v6011_v18 }
 0x471   :  { %2048 = vmatpush1.bf16.msra.mxu1 %v5213_v1  ;;  %3448 = vmatpush3.bf16.msra.mxu0 %v5219_v22 }
 0x472   :  { %2049 = vmatprep.subr.bf16.mxu1 %v5225_v59  ;;  %3449 = vmatprep.subr.bf16.mxu0 %v6011_v18 }
 0x475   :  { %2050 = vmatpush1.bf16.msra.mxu1 %v5232_v63  ;;  %3450 = vmatpush3.bf16.msra.mxu0 %v5238_v51 }
 0x476   :  { %2051 = vmatprep.subr.bf16.mxu1 %v5244_v52  ;;  %3451 = vmatprep.subr.bf16.mxu0 %v6011_v18 }
 0x478   :  { %v3803_v50 = vpop.eup %3802 }
 0x479   :  { %2052 = vmatpush1.bf16.msra.mxu1 %v5252_v0  ;;  %3452 = vmatpush3.bf16.msra.mxu0 %v5258_v38  ;;  %v1910_v35 = vmul.f32 %v3803_v50, %v1909_v24 }
 0x47a   :  { %2053 = vmatprep.subr.bf16.mxu1 %v5264_v15  ;;  %3453 = vmatprep.subr.bf16.mxu0 %v6011_v18 }
 0x47b   :  { %v5406_v61 = vadd.f32 %v1911_v53, %v1910_v35 }
 0x47d   :  { %2054 = vmatpush1.bf16.msra.mxu1 %v5276_v58  ;;  %3454 = vmatpush3.bf16.msra.mxu0 %v5282_v30  ;;  %v5415_v11 = vsel %vm1917_vm2, %v5406_v61, %v5289_v48  ;;  %v6060_v48 = vld [vmem:[#allocation49_spill] sm:$0xff] }
 0x47e   :  { %v2038_v20 = vpack.c.bf16 %v5415_v11, %v5415_v11  ;;  %2151 = vmatprep.subr.bf16.mxu1 %v4854_v5  ;;  %3459 = vmatprep.subr.bf16.mxu0 %v6011_v18  ;;  %v6054_v5 = vld [vmem:[#allocation10_spill] sm:$0xff] }
 0x480   :  { %2072 = vmatmul.mubr.bf16.vlgmr.msra.gmra.mrb[52].mxu1 %v2038_v20  ;;  %3456 = vmatmul.mubr.bf16.vlgmr.msra.gmra.mrb[68].mxu0 %v2038_v20 }
 0x481   :  { %2152 = vmatpush1.bf16.msra.mxu1 %v4864_v9  ;;  %3460 = vmatpush3.bf16.msra.mxu0 %v5003_v33  ;;  %v6055_v9 = vld [vmem:[#allocation12_spill] sm:$0xff] }
 0x482   :  { %2153 = vmatprep.subr.bf16.mxu1 %v4871_v44  ;;  %3461 = vmatprep.subr.bf16.mxu0 %v6011_v18  ;;  %v6056_v44 = vld [vmem:[#allocation47_spill] sm:$0xff] }
 0x483   :  { %2183 = vmatprep.mubr.bf16.mxu1 %v6012_v6  ;;  %3475 = vmatprep.mubr.msk.bf16.mxu0 %vm4012_vm4, %v6011_v18 }
 0x485   :  { %2154 = vmatpush1.bf16.msra.mxu1 %v4881_v54  ;;  %3462 = vmatpush3.bf16.msra.mxu0 %v5015_v36  ;;  %v6057_v54 = vld [vmem:[#allocation11_spill] sm:$0xff] }
 0x486   :  { %2155 = vmatprep.subr.bf16.mxu1 %v4888_v7  ;;  %3463 = vmatprep.subr.bf16.mxu0 %v6011_v18  ;;  %v6058_v7 = vld [vmem:[#allocation33_spill] sm:$0xff] }
 0x489   :  { %2156 = vmatpush1.bf16.msra.mxu1 %v4895_v2  ;;  %3464 = vmatpush3.bf16.msra.mxu0 %v5024_v34  ;;  %v6059_v2 = vld [vmem:[#allocation48_spill] sm:$0xff] }
 0x48a   :  { %2157 = vmatprep.subr.bf16.mxu1 %v5030_v37  ;;  %3465 = vmatprep.subr.bf16.mxu0 %v6011_v18 }
 0x48d   :  { %2158 = vmatpush1.bf16.msra.mxu1 %v5037_v39  ;;  %3466 = vmatpush3.bf16.msra.mxu0 %v5043_v41 }
 0x48e   :  { %2159 = vmatprep.subr.bf16.mxu1 %v5049_v42  ;;  %3467 = vmatprep.subr.bf16.mxu0 %v6011_v18 }
 0x491   :  { %2160 = vmatpush1.bf16.msra.mxu1 %v5056_v43  ;;  %3468 = vmatpush3.bf16.msra.mxu0 %v5318_v29 }
 0x492   :  { %2161 = vmatprep.subr.bf16.mxu1 %v6054_v5  ;;  %3469 = vmatprep.subr.bf16.mxu0 %v6011_v18 }
 0x495   :  { %2162 = vmatpush1.bf16.msra.mxu1 %v6055_v9  ;;  %3470 = vmatpush3.bf16.msra.mxu0 %v6056_v44 }
 0x496   :  { %2163 = vmatprep.subr.bf16.mxu1 %v6057_v54  ;;  %3471 = vmatprep.subr.bf16.mxu0 %v6011_v18 }
 0x499   :  { %2164 = vmatpush1.bf16.msra.mxu1 %v6058_v7  ;;  %3472 = vmatpush3.bf16.msra.mxu0 %v6059_v2 }
 0x49a   :  { %2165 = vmatprep.subr.bf16.mxu1 %v6060_v48  ;;  %3473 = vmatprep.subr.bf16.mxu0 %v6011_v18 }
 0x49d   :  { %2166 = vmatpush1.bf16.msra.mxu1 %v6061_v28  ;;  %3474 = vmatpush3.bf16.msra.mxu0 %v6062_v26 }
 0x49e   :  { %2263 = vmatprep.subr.bf16.mxu1 %v6063_v45  ;;  %3479 = vmatprep.subr.bf16.mxu0 %v6011_v18 }
 0x533   :  { %v1961_v27 = vpop.f32.mrb[48].mxu1  ;;  %v2002_v17 = vpop.f32.mrb[64].mxu0 }
 0x534   :  { %v2008_v4 = vadd.f32 %v1961_v27, %v6064_v55  ;;  %v1963_v19 = vpop.f32.mrb[49].mxu1  ;;  %v3437_v32 = vpop.f32.mrb[65].mxu0  ;;  %v5461_v27 = vld [vmem:[%s5918_s5] ss:$0 sm:$0xff] }
 0x535   :  { %v2015_v31 = vadd.f32 %v1963_v19, %v6065_v13  ;;  %v1965_v60 = vpop.f32.mrb[50].mxu1  ;;  %v2005_v24 = vpop.f32.mrb[66].mxu0  ;;  %v2022_v55 = vadd.f32 %v5461_v27, %v2002_v17 }
 0x536   :  { %v3095_v50 = vmul.f32 -1.442695, %v2008_v4  ;;  %v1966_v53 = vpop.f32.mrb[51].mxu1  ;;  %v3438_v35 = vpop.f32.mrb[67].mxu0  ;;  %v6066_v4 = vld [vmem:[#allocation23_spill] sm:$0xff]  ;;  %v6067_v24 = vld [vmem:[#allocation21_spill] sm:$0xff] }
 0x537   :  { %v3096_v20 = vmul.f32 -1.442695, %v2015_v31 }
 0x538   :  { %3804 = vpow2.f32 %v3095_v50 }
 0x539   :  { %3806 = vpow2.f32 %v3096_v20 }
 0x542   :  { %v3805_v26 = vpop.eup %3804 }
 0x543   :  { %v2012_v45 = vadd.f32 1.0, %v3805_v26  ;;  %v3807_v28 = vpop.eup %3806 }
 0x544   :  { %v2019_v48 = vadd.f32 1.0, %v3807_v28  ;;  %v6068_v28 = vld [vmem:[#allocation43_spill] sm:$0xff] }
 0x545   :  { %3808 = vrcp.f32 %v2012_v45 }
 0x546   :  { %3810 = vrcp.f32 %v2019_v48 }
 0x54f   :  { %v3809_v19 = vpop.eup %3808 }
 0x550   :  { %v2023_v32 = vmul.f32 %v3809_v19, %v2022_v55  ;;  %v3811_v17 = vpop.eup %3810 }
 0x551   :  { %v2026_v48 = vsub.f32 1.0, %v3811_v17 }
 0x552   :  { %v2024_v13 = vadd.f32 %v2023_v32, %v6066_v4  ;;  %v2028_v32 = vmul.f32 %v3811_v17, %v5366_v62  ;;  %v6069_v17 = vld [vmem:[#allocation44_spill] sm:$0xff] }
 0x553   :  { %v2073_v60 = vpop.f32.mrb[52].mxu1  ;;  %v2114_v31 = vpop.f32.mrb[68].mxu0 }
 0x554   :  { %3812 = vtanh.f32 %v2024_v13  ;;  %v2120_v26 = vadd.f32 %v2073_v60, %v6067_v24  ;;  %v2075_v45 = vpop.f32.mrb[53].mxu1  ;;  %v3457_v50 = vpop.f32.mrb[69].mxu0 }
 0x555   :  { %v2127_v53 = vadd.f32 %v2075_v45, %v6068_v28  ;;  %v2077_v35 = vpop.f32.mrb[54].mxu1  ;;  %v2117_v20 = vpop.f32.mrb[70].mxu0  ;;  %v5498_v28 = vld [vmem:[%s5920_s7] ss:$0 sm:$0xff] }
 0x556   :  { %v3098_v2 = vmul.f32 -1.442695, %v2120_v26  ;;  %v2078_v7 = vpop.f32.mrb[55].mxu1  ;;  %v3458_v54 = vpop.f32.mrb[71].mxu0 }
 0x557   :  { %v3099_v55 = vmul.f32 -1.442695, %v2127_v53  ;;  %v1919_v7 = vsel %vm1917_vm2, %v5406_v61, 0.0  ;;  %v2134_v53 = vadd.f32 %v5498_v28, %v2114_v31 }
 0x558   :  { %3814 = vpow2.f32 %v3098_v2 }
 0x559   :  { %3816 = vpow2.f32 %v3099_v55 }
 0x55e   :  { %v3813_v19 = vpop.eup %3812 }
 0x55f   :  { %v2027_v4 = vmul.f32 %v3813_v19, %v2026_v48 }
 0x561   :  { %v2029_v13 = vadd.f32 %v2028_v32, %v2027_v4 }
 0x562   :  { %v3815_v60 = vpop.eup %3814 }
 0x563   :  { %v2124_v24 = vadd.f32 1.0, %v3815_v60  ;;  %v5471_v45 = vsel %vm1917_vm2, %v2029_v13, %v5366_v62  ;;  %v2031_v54 = vsel %vm1917_vm2, %v2029_v13, 0.0  ;;  %v3817_v23 = vpop.eup %3816  ;;  %v1801_v60 = vsel %vm1799_vm1, %v5359_v25, 0.0  ;;  %v5540_v25 = vld [vmem:[%s5914_s4 + $0x4] ss:$12 sps:$4 sm:$0xff]  }
 0x564   :  { %v2150_v2 = vpack.c.bf16 %v5471_v45, %v5471_v45  ;;  %v2834_v26 = vadd.f32 %v2031_v54, %v1919_v7  ;;  %v2131_v61 = vadd.f32 1.0, %v3817_v23  ;;  %v5575_v23 = vld [vmem:[%s5914_s4 + $0x34] ss:$12 sps:$4 sm:$0xff]  }
 0x565   :  { %3818 = vrcp.f32 %v2124_v24 }
 0x566   :  { %2184 = vmatmul.mubr.bf16.vlgmr.msra.gmra.mrb[56].mxu1 %v2150_v2  ;;  %3476 = vmatmul.mubr.bf16.vlgmr.msra.gmra.mrb[72].mxu0 %v2150_v2  ;;  %v5480_v50 = vmul.f32 0.5, %v2834_v26  ;;  %3820 = vrcp.f32 %v2131_v61  ;;  %v5582_v61 = vld [vmem:[%s5914_s4 + $0x30] ss:$12 sps:$4 sm:$0xff]  }
 0x567   :  { %2264 = vmatpush1.bf16.msra.mxu1 %v5132_v14  ;;  %3480 = vmatpush3.bf16.msra.mxu0 %v5138_v3 }
 0x568   :  { %2265 = vmatprep.subr.bf16.mxu1 %v5144_v57  ;;  %3481 = vmatprep.subr.bf16.mxu0 %v6011_v18  ;;  %v2850_v62 = vmul.f32 %v5480_v50, %v5480_v50 }
 0x569   :  { %2295 = vmatprep.mubr.bf16.mxu1 %v6012_v6  ;;  %3495 = vmatprep.mubr.msk.bf16.mxu0 %vm4012_vm4, %v6011_v18 }
 0x56a   :  { %2862 = vadd.xlane.f32.xlu1 %v2850_v62  ;;  %v5558_v62 = vld [vmem:[%s5914_s4 + $0x1c] ss:$12 sps:$4 sm:$0xff]  }
 0x56b   :  { %2266 = vmatpush1.bf16.msra.mxu1 %v5154_v8  ;;  %3482 = vmatpush3.bf16.msra.mxu0 %v5160_v10 }
 0x56c   :  { %2267 = vmatprep.subr.bf16.mxu1 %v5166_v12  ;;  %3483 = vmatprep.subr.bf16.mxu0 %v6011_v18 }
 0x56f   :  { %v3819_v35 = vpop.eup %3818  ;;  %2268 = vmatpush1.bf16.msra.mxu1 %v5174_v16  ;;  %3484 = vmatpush3.bf16.msra.mxu0 %v5180_v21 }
 0x570   :  { %v2135_v20 = vmul.f32 %v3819_v35, %v2134_v53  ;;  %2269 = vmatprep.subr.bf16.mxu1 %v5186_v40  ;;  %3485 = vmatprep.subr.bf16.mxu0 %v6011_v18  ;;  %v3821_v31 = vpop.eup %3820 }
 0x571   :  { %v2138_v48 = vsub.f32 1.0, %v3821_v31  ;;  %v2140_v32 = vmul.f32 %v3821_v31, %v5415_v11 }
 0x572   :  { %v2136_v55 = vadd.f32 %v2135_v20, %v6069_v17 }
 0x573   :  { %2270 = vmatpush1.bf16.msra.mxu1 %v5194_v56  ;;  %3486 = vmatpush3.bf16.msra.mxu0 %v5200_v46 }
 0x574   :  { %3822 = vtanh.f32 %v2136_v55  ;;  %2271 = vmatprep.subr.bf16.mxu1 %v5206_v47  ;;  %3487 = vmatprep.subr.bf16.mxu0 %v6011_v18 }
 0x577   :  { %2272 = vmatpush1.bf16.msra.mxu1 %v5213_v1  ;;  %3488 = vmatpush3.bf16.msra.mxu0 %v5219_v22 }
 0x578   :  { %2273 = vmatprep.subr.bf16.mxu1 %v5225_v59  ;;  %3489 = vmatprep.subr.bf16.mxu0 %v6011_v18 }
 0x57b   :  { %2274 = vmatpush1.bf16.msra.mxu1 %v5232_v63  ;;  %3490 = vmatpush3.bf16.msra.mxu0 %v5238_v51 }
 0x57c   :  { %2275 = vmatprep.subr.bf16.mxu1 %v5244_v52  ;;  %3491 = vmatprep.subr.bf16.mxu0 %v6011_v18 }
 0x57e   :  { %v3823_v19 = vpop.eup %3822 }
 0x57f   :  { %2276 = vmatpush1.bf16.msra.mxu1 %v5252_v0  ;;  %3492 = vmatpush3.bf16.msra.mxu0 %v5258_v38  ;;  %v2139_v4 = vmul.f32 %v3823_v19, %v2138_v48 }
 0x580   :  { %2277 = vmatprep.subr.bf16.mxu1 %v5264_v15  ;;  %3493 = vmatprep.subr.bf16.mxu0 %v6011_v18 }
 0x581   :  { %v2141_v13 = vadd.f32 %v2140_v32, %v2139_v4 }
 0x583   :  { %2278 = vmatpush1.bf16.msra.mxu1 %v5276_v58  ;;  %3494 = vmatpush3.bf16.msra.mxu0 %v5282_v30  ;;  %v5531_v24 = vsel %vm1799_vm1, %v2141_v13, %v5415_v11  ;;  %v2143_v54 = vsel %vm1799_vm1, %v2141_v13, 0.0 }
 0x584   :  { %v2262_v7 = vpack.c.bf16 %v5531_v24, %v5531_v24  ;;  %v2833_v2 = vadd.f32 %v2143_v54, %v1801_v60  ;;  %2375 = vmatprep.subr.bf16.mxu1 %v5540_v25  ;;  %3499 = vmatprep.subr.bf16.mxu0 %v6011_v18 }
 0x586   :  { %2296 = vmatmul.mubr.bf16.vlgmr.msra.gmra.mrb[60].mxu1 %v2262_v7  ;;  %3496 = vmatmul.mubr.bf16.vlgmr.msra.gmra.mrb[76].mxu0 %v2262_v7  ;;  %v5544_v11 = vmul.f32 0.5, %v2833_v2 }
 0x587   :  { %2376 = vmatpush1.bf16.msra.mxu1 %v5549_v49  ;;  %3500 = vmatpush3.bf16.msra.mxu0 %v5003_v33  ;;  %v5568_v33 = vld [vmem:[%s5914_s4 + $0x18] ss:$12 sps:$4 sm:$0xff]  }
 0x588   :  { %v2849_v26 = vmul.f32 %v5544_v11, %v5544_v11  ;;  %2377 = vmatprep.subr.bf16.mxu1 %v5558_v62  ;;  %3501 = vmatprep.subr.bf16.mxu0 %v6011_v18 }
 0x589   :  { %2407 = vmatprep.mubr.bf16.mxu1 %v6012_v6  ;;  %3515 = vmatprep.mubr.msk.bf16.mxu0 %vm4012_vm4, %v6011_v18 }
 0x58a   :  { %2860 = vadd.xlane.f32.xlu0 %v2849_v26 }
 0x58b   :  { %2378 = vmatpush1.bf16.msra.mxu1 %v5568_v33  ;;  %3502 = vmatpush3.bf16.msra.mxu0 %v5015_v36  ;;  %v6070_v36 = vld [vmem:[#allocation11_spill] sm:$0xff] }
 0x58c   :  { %2379 = vmatprep.subr.bf16.mxu1 %v5575_v23  ;;  %3503 = vmatprep.subr.bf16.mxu0 %v6011_v18 }
 0x58f   :  { %2380 = vmatpush1.bf16.msra.mxu1 %v5582_v61  ;;  %3504 = vmatpush3.bf16.msra.mxu0 %v5024_v34  ;;  %v6071_v34 = vld [vmem:[#allocation33_spill] sm:$0xff] }
 0x590   :  { %2381 = vmatprep.subr.bf16.mxu1 %v5030_v37  ;;  %3505 = vmatprep.subr.bf16.mxu0 %v6011_v18  ;;  %v6072_v37 = vld [vmem:[#allocation48_spill] sm:$0xff] }
 0x593   :  { %2382 = vmatpush1.bf16.msra.mxu1 %v5037_v39  ;;  %3506 = vmatpush3.bf16.msra.mxu0 %v5043_v41  ;;  %v6073_v39 = vld [vmem:[#allocation49_spill] sm:$0xff]  ;;  %v6074_v41 = vld [vmem:[#allocation50_spill] sm:$0xff] }
 0x594   :  { %2383 = vmatprep.subr.bf16.mxu1 %v5049_v42  ;;  %3507 = vmatprep.subr.bf16.mxu0 %v6011_v18  ;;  %v6075_v42 = vld [vmem:[#allocation54_spill] sm:$0xff] }
 0x597   :  { %2384 = vmatpush1.bf16.msra.mxu1 %v5056_v43  ;;  %3508 = vmatpush3.bf16.msra.mxu0 %v5318_v29  ;;  %v6076_v43 = vld [vmem:[#allocation53_spill] sm:$0xff] }
 0x598   :  { %2385 = vmatprep.subr.bf16.mxu1 %v6054_v5  ;;  %3509 = vmatprep.subr.bf16.mxu0 %v6011_v18 }
 0x59b   :  { %2386 = vmatpush1.bf16.msra.mxu1 %v6055_v9  ;;  %3510 = vmatpush3.bf16.msra.mxu0 %v6056_v44 }
 0x59c   :  { %2387 = vmatprep.subr.bf16.mxu1 %v6070_v36  ;;  %3511 = vmatprep.subr.bf16.mxu0 %v6011_v18 }
 0x59f   :  { %2388 = vmatpush1.bf16.msra.mxu1 %v6071_v34  ;;  %3512 = vmatpush3.bf16.msra.mxu0 %v6072_v37  ;;  %v6077_v34 = vld [vmem:[#allocation26_spill] sm:$0xff] }
 0x5a0   :  { %2389 = vmatprep.subr.bf16.mxu1 %v6073_v39  ;;  %3513 = vmatprep.subr.bf16.mxu0 %v6011_v18 }
 0x5a3   :  { %2390 = vmatpush1.bf16.msra.mxu1 %v6074_v41  ;;  %3514 = vmatpush3.bf16.msra.mxu0 %v6075_v42 }
 0x5a4   :  { %2487 = vmatprep.subr.bf16.mxu1 %v6076_v43  ;;  %3519 = vmatprep.subr.bf16.mxu0 %v6011_v18 }
 0x5f7   :  { %v2863_v5 = vpop.xlane.xlu1 %2862 }
 0x5f8   :  { %3824 = vrsqrt.f32 %v2863_v5  ;;  %vm2900_vm3 = vcmp.eq.f32.partialorder %v2863_v5, inf  ;;  %v2903_v35 = vand.u32 2147483648, %v2863_v5  ;;  %vm2902_vm5 = vcmp.eq.f32.partialorder %v2863_v5, 0.0 }
 0x602   :  { %v3825_v9 = vpop.eup %3824 }
 0x603   :  { %v2899_v53 = vmul.f32 %v3825_v9, %v2863_v5 }
 0x605   :  { %v2901_v20 = vsel %vm2900_vm3, %v2863_v5, %v2899_v53  ;;  %v6078_v5 = vld [vmem:[#allocation28_spill] sm:$0xff] }
 0x606   :  { %v2904_v17 = vsel %vm2902_vm5, %v2903_v35, %v2901_v20 }
 0x607   :  { %v2930_v55 = vadd.f32 1e-08, %v2904_v17 }
 0x609   :  { %3826 = vrcp.f32 %v2930_v55 }
 0x613   :  { %v3827_v31 = vpop.eup %3826 }
 0x614   :  { %v2946_v48 = vmul.f32 %v3827_v31, %v5480_v50 }
 0x616   :  { %2954 = vst [vmem:[%s5919_s8 + $0x20] sm:$0xff] %v2946_v48 }
 0x617   :  { %v2861_v19 = vpop.xlane.xlu0 %2860 }
 0x618   :  { %3828 = vrsqrt.f32 %v2861_v19  ;;  %vm2893_vm6 = vcmp.eq.f32.partialorder %v2861_v19, inf  ;;  %v2896_v13 = vand.u32 2147483648, %v2861_v19  ;;  %vm2895_vm7 = vcmp.eq.f32.partialorder %v2861_v19, 0.0 }
 0x622   :  { %v3829_v32 = vpop.eup %3828 }
 0x623   :  { %v2892_v4 = vmul.f32 %v3829_v32, %v2861_v19 }
 0x625   :  { %v2894_v60 = vsel %vm2893_vm6, %v2861_v19, %v2892_v4 }
 0x626   :  { %v2897_v54 = vsel %vm2895_vm7, %v2896_v13, %v2894_v60 }
 0x627   :  { %v2929_v7 = vadd.f32 1e-08, %v2897_v54  ;;  %v6079_v54 = vld [vmem:[#allocation27_spill] sm:$0xff] }
 0x629   :  { %3830 = vrcp.f32 %v2929_v7 }
 0x633   :  { %v3831_v2 = vpop.eup %3830 }
 0x634   :  { %v2945_v26 = vmul.f32 %v3831_v2, %v5544_v11 }
 0x636   :  { %2953 = vst [vmem:[%s5919_s8 + $0x18] sm:$0xff] %v2945_v26 }
 0x639   :  { %v2185_v50 = vpop.f32.mrb[56].mxu1  ;;  %v2226_v36 = vpop.f32.mrb[72].mxu0 }
 0x63a   :  { %v2232_v39 = vadd.f32 %v2185_v50, %v6077_v34  ;;  %v2187_v41 = vpop.f32.mrb[57].mxu1  ;;  %v3477_v43 = vpop.f32.mrb[73].mxu0  ;;  %v2246_v4 = vadd.f32 %v5461_v27, %v2226_v36  ;;  %v6080_v50 = vld [vmem:[#allocation17_spill] sm:$0xff] }
 0x63b   :  { %v2239_v9 = vadd.f32 %v2187_v41, %v6078_v5  ;;  %v2189_v53 = vpop.f32.mrb[58].mxu1  ;;  %v2229_v35 = vpop.f32.mrb[74].mxu0  ;;  %v6081_v43 = vld [vmem:[#allocation41_spill] sm:$0xff] }
 0x63c   :  { %v3100_v20 = vmul.f32 -1.442695, %v2232_v39  ;;  %v2190_v17 = vpop.f32.mrb[59].mxu1  ;;  %v3478_v55 = vpop.f32.mrb[75].mxu0 }
 0x63d   :  { %v3101_v31 = vmul.f32 -1.442695, %v2239_v9 }
 0x63e   :  { %3832 = vpow2.f32 %v3100_v20 }
 0x63f   :  { %3834 = vpow2.f32 %v3101_v31 }
 0x648   :  { %v3833_v11 = vpop.eup %3832 }
 0x649   :  { %v2236_v48 = vadd.f32 1.0, %v3833_v11  ;;  %v3835_v19 = vpop.eup %3834 }
 0x64a   :  { %v2243_v32 = vadd.f32 1.0, %v3835_v19 }
 0x64b   :  { %3836 = vrcp.f32 %v2236_v48 }
 0x64c   :  { %3838 = vrcp.f32 %v2243_v32 }
 0x655   :  { %v3837_v13 = vpop.eup %3836 }
 0x656   :  { %v2247_v60 = vmul.f32 %v3837_v13, %v2246_v4  ;;  %v3839_v36 = vpop.eup %3838 }
 0x657   :  { %v2250_v31 = vsub.f32 1.0, %v3839_v36  ;;  %v2252_v48 = vmul.f32 %v3839_v36, %v5471_v45 }
 0x658   :  { %v2248_v7 = vadd.f32 %v2247_v60, %v6079_v54 }
 0x659   :  { %v2297_v2 = vpop.f32.mrb[60].mxu1  ;;  %v2338_v26 = vpop.f32.mrb[76].mxu0 }
 0x65a   :  { %3840 = vtanh.f32 %v2248_v7  ;;  %v2344_v34 = vadd.f32 %v2297_v2, %v6080_v50  ;;  %v2299_v39 = vpop.f32.mrb[61].mxu1  ;;  %v3497_v41 = vpop.f32.mrb[77].mxu0  ;;  %v6083_v2 = vld [vmem:[#allocation29_spill] sm:$0xff] }
 0x65b   :  { %v2351_v5 = vadd.f32 %v2299_v39, %v6081_v43  ;;  %v2301_v9 = vpop.f32.mrb[62].mxu1  ;;  %v2341_v53 = vpop.f32.mrb[78].mxu0  ;;  %v1683_v50 = vsel %vm1681_vm0, %v6083_v2, 0.0 }
 0x65c   :  { %v3103_v35 = vmul.f32 -1.442695, %v2344_v34  ;;  %v2302_v20 = vpop.f32.mrb[63].mxu1  ;;  %v3498_v17 = vpop.f32.mrb[79].mxu0  ;;  %v3984_v9 = vld [vmem:[%s5914_s4 + $0xac] ss:$12 sps:$4 sm:$0xff]  }
 0x65d   :  { %v3104_v55 = vmul.f32 -1.442695, %v2351_v5  ;;  %v3986_v53 = vld [vmem:[%s5915_s6 + $0x4] ss:$12 sps:$4 sm:$0xff]  }
 0x65e   :  { %3842 = vpow2.f32 %v3103_v35 }
 0x65f   :  { %3844 = vpow2.f32 %v3104_v55 }
 0x664   :  { %v3841_v11 = vpop.eup %3840 }
 0x665   :  { %v2251_v19 = vmul.f32 %v3841_v11, %v2250_v31 }
 0x667   :  { %v2253_v32 = vadd.f32 %v2252_v48, %v2251_v19 }
 0x668   :  { %v3843_v4 = vpop.eup %3842 }
 0x669   :  { %v2348_v13 = vadd.f32 1.0, %v3843_v4  ;;  %v5626_v54 = vsel %vm1681_vm0, %v2253_v32, %v5471_v45  ;;  %v2255_v7 = vsel %vm1681_vm0, %v2253_v32, 0.0  ;;  %v3845_v43 = vpop.eup %3844 }
 0x66a   :  { %v2374_v34 = vpack.c.bf16 %v5626_v54, %v5626_v54  ;;  %v2835_v39 = vadd.f32 %v2255_v7, %v1683_v50 }
 0x66b   :  { %3846 = vrcp.f32 %v2348_v13 }
 0x66c   :  { %2408 = vmatmul.mubr.bf16.vlgmr.msra.gmra.mrb[64].mxu1 %v2374_v34  ;;  %3516 = vmatmul.mubr.bf16.vlgmr.msra.gmra.mrb[80].mxu0 %v2374_v34  ;;  %v5635_v41 = vmul.f32 0.5, %v2835_v39 }
 0x66d   :  { %2488 = vmatpush1.bf16.msra.mxu1 %v5132_v14  ;;  %3520 = vmatpush3.bf16.msra.mxu0 %v5138_v3  ;;  %v2355_v14 = vadd.f32 1.0, %v3845_v43  ;;  %v2358_v3 = vadd.f32 %v5498_v28, %v2338_v26  ;;  %v3982_v26 = vld [vmem:[%s5914_s4 + $0x94] ss:$12 sps:$4 sm:$0xff]  }
 0x66e   :  { %2489 = vmatprep.subr.bf16.mxu1 %v5144_v57  ;;  %3521 = vmatprep.subr.bf16.mxu0 %v6011_v18  ;;  %v2851_v45 = vmul.f32 %v5635_v41, %v5635_v41 }
 0x66f   :  { %2519 = vmatprep.mubr.bf16.mxu1 %v6012_v6  ;;  %3535 = vmatprep.mubr.msk.bf16.mxu0 %vm4012_vm4, %v6011_v18  ;;  %3848 = vrcp.f32 %v2355_v14 }
 0x670   :  { %2864 = vadd.xlane.f32.xlu0 %v2851_v45 }
 0x671   :  { %2490 = vmatpush1.bf16.msra.mxu1 %v5154_v8  ;;  %3522 = vmatpush3.bf16.msra.mxu0 %v5160_v10  ;;  %v6084_v8 = vld [vmem:[#allocation42_spill] sm:$0xff] }
 0x672   :  { %2491 = vmatprep.subr.bf16.mxu1 %v5166_v12  ;;  %3523 = vmatprep.subr.bf16.mxu0 %v6011_v18 }
 0x675   :  { %v3847_v57 = vpop.eup %3846  ;;  %2492 = vmatpush1.bf16.msra.mxu1 %v5174_v16  ;;  %3524 = vmatpush3.bf16.msra.mxu0 %v5180_v21 }
 0x676   :  { %v2359_v5 = vmul.f32 %v3847_v57, %v2358_v3  ;;  %2493 = vmatprep.subr.bf16.mxu1 %v5186_v40  ;;  %3525 = vmatprep.subr.bf16.mxu0 %v6011_v18  ;;  %v6088_v3 = vld [vmem:[#allocation32_spill] sm:$0xff] }
 0x678   :  { %v2360_v10 = vadd.f32 %v2359_v5, %v6084_v8 }
 0x679   :  { %2494 = vmatpush1.bf16.msra.mxu1 %v5194_v56  ;;  %3526 = vmatpush3.bf16.msra.mxu0 %v5200_v46  ;;  %v3849_v12 = vpop.eup %3848 }
 0x67a   :  { %3850 = vtanh.f32 %v2360_v10  ;;  %2495 = vmatprep.subr.bf16.mxu1 %v5206_v47  ;;  %3527 = vmatprep.subr.bf16.mxu0 %v6011_v18  ;;  %v2362_v16 = vsub.f32 1.0, %v3849_v12  ;;  %v2364_v40 = vmul.f32 %v3849_v12, %v5531_v24  ;;  %v6085_v47 = vld [vmem:[#allocation16_spill] sm:$0xff] }
 0x67d   :  { %2496 = vmatpush1.bf16.msra.mxu1 %v5213_v1  ;;  %3528 = vmatpush3.bf16.msra.mxu0 %v5219_v22  ;;  %v1565_v22 = vsel %vm1563_vm15, %v6085_v47, 0.0 }
 0x67e   :  { %2497 = vmatprep.subr.bf16.mxu1 %v5225_v59  ;;  %3529 = vmatprep.subr.bf16.mxu0 %v6011_v18 }
 0x681   :  { %2498 = vmatpush1.bf16.msra.mxu1 %v5232_v63  ;;  %3530 = vmatpush3.bf16.msra.mxu0 %v5238_v51 }
 0x682   :  { %2499 = vmatprep.subr.bf16.mxu1 %v5244_v52  ;;  %3531 = vmatprep.subr.bf16.mxu0 %v6011_v18 }
 0x684   :  { %v3851_v21 = vpop.eup %3850 }
 0x685   :  { %2500 = vmatpush1.bf16.msra.mxu1 %v5252_v0  ;;  %3532 = vmatpush3.bf16.msra.mxu0 %v5258_v38  ;;  %v2363_v56 = vmul.f32 %v3851_v21, %v2362_v16  ;;  %v3972_v38 = vld [vmem:[%s5914_s4 + $0x8] ss:$12 sps:$4 sm:$0xff]  }
 0x686   :  { %2501 = vmatprep.subr.bf16.mxu1 %v5264_v15  ;;  %3533 = vmatprep.subr.bf16.mxu0 %v6011_v18 }
 0x687   :  { %v2365_v46 = vadd.f32 %v2364_v40, %v2363_v56 }
 0x689   :  { %2502 = vmatpush1.bf16.msra.mxu1 %v5276_v58  ;;  %3534 = vmatpush3.bf16.msra.mxu0 %v5282_v30  ;;  %v5681_v59 = vsel %vm1563_vm15, %v2365_v46, %v5531_v24  ;;  %v2367_v63 = vsel %vm1563_vm15, %v2365_v46, 0.0  ;;  %v3973_v58 = vld [vmem:[%s5914_s4 + $0x20] ss:$12 sps:$4 sm:$0xff]   ;;  %v3974_v30 = vld [vmem:[%s5914_s4 + $0x38] ss:$12 sps:$4 sm:$0xff]  }
 0x68a   :  { %v2486_v51 = vpack.c.bf16 %v5681_v59, %v5681_v59  ;;  %v2832_v52 = vadd.f32 %v2367_v63, %v1565_v22  ;;  %2599 = vmatprep.subr.bf16.mxu1 %v5540_v25  ;;  %3539 = vmatprep.subr.bf16.mxu0 %v6011_v18  ;;  %v3975_v24 = vld [vmem:[%s5914_s4 + $0x4c] ss:$12 sps:$4 sm:$0xff]   ;;  %v3976_v25 = vld [vmem:[%s5914_s4 + $0x48] ss:$12 sps:$4 sm:$0xff]  }
 0x68c   :  { %2520 = vmatmul.mubr.bf16.vlgmr.msra.gmra.mrb[68].mxu1 %v2486_v51  ;;  %3536 = vmatmul.mubr.bf16.vlgmr.msra.gmra.mrb[84].mxu0 %v2486_v51  ;;  %v5689_v0 = vmul.f32 0.5, %v2832_v52  ;;  %v6089_v51 = vld [vmem:[#allocation31_spill] sm:$0xff] }
 0x68d   :  { %2600 = vmatpush1.bf16.msra.mxu1 %v5549_v49  ;;  %3540 = vmatpush3.bf16.msra.mxu0 %v3972_v38  ;;  %v3977_v49 = vld [vmem:[%s5914_s4 + $0x50] ss:$12 sps:$4 sm:$0xff]  }
 0x68e   :  { %v2848_v15 = vmul.f32 %v5689_v0, %v5689_v0  ;;  %2601 = vmatprep.subr.bf16.mxu1 %v5558_v62  ;;  %3541 = vmatprep.subr.bf16.mxu0 %v6011_v18  ;;  %v3978_v62 = vld [vmem:[%s5914_s4 + $0x64] ss:$12 sps:$4 sm:$0xff]  }
 0x68f   :  { %2631 = vmatprep.mubr.bf16.mxu1 %v6012_v6  ;;  %3555 = vmatprep.mubr.msk.bf16.mxu0 %vm4012_vm4, %v6011_v18 }
 0x690   :  { %2858 = vadd.xlane.f32.xlu0 %v2848_v15  ;;  %v6090_v15 = vld [vmem:[#allocation13_spill] sm:$0xff] }
 0x691   :  { %2602 = vmatpush1.bf16.msra.mxu1 %v5568_v33  ;;  %3542 = vmatpush3.bf16.msra.mxu0 %v3973_v58  ;;  %v3979_v33 = vld [vmem:[%s5914_s4 + $0x60] ss:$12 sps:$4 sm:$0xff]  }
 0x692   :  { %2603 = vmatprep.subr.bf16.mxu1 %v5575_v23  ;;  %3543 = vmatprep.subr.bf16.mxu0 %v6011_v18  ;;  %v3980_v23 = vld [vmem:[%s5914_s4 + $0x7c] ss:$12 sps:$4 sm:$0xff]  }
 0x695   :  { %2604 = vmatpush1.bf16.msra.mxu1 %v5582_v61  ;;  %3544 = vmatpush3.bf16.msra.mxu0 %v3974_v30  ;;  %v3981_v61 = vld [vmem:[%s5914_s4 + $0x78] ss:$12 sps:$4 sm:$0xff]  }
 0x696   :  { %2605 = vmatprep.subr.bf16.mxu1 %v3975_v24  ;;  %3545 = vmatprep.subr.bf16.mxu0 %v6011_v18 }
 0x699   :  { %2606 = vmatpush1.bf16.msra.mxu1 %v3976_v25  ;;  %3546 = vmatpush3.bf16.msra.mxu0 %v3977_v49  ;;  %v6091_v25 = vld [vmem:[#allocation39_spill] sm:$0xff] }
 0x69a   :  { %2607 = vmatprep.subr.bf16.mxu1 %v3978_v62  ;;  %3547 = vmatprep.subr.bf16.mxu0 %v6011_v18 }
 0x69d   :  { %2608 = vmatpush1.bf16.msra.mxu1 %v3979_v33  ;;  %3548 = vmatpush3.bf16.msra.mxu0 %v5318_v29  ;;  %v3983_v29 = vld [vmem:[%s5914_s4 + $0x90] ss:$12 sps:$4 sm:$0xff]  }
 0x69e   :  { %2609 = vmatprep.subr.bf16.mxu1 %v3980_v23  ;;  %3549 = vmatprep.subr.bf16.mxu0 %v6011_v18 }
 0x6a1   :  { %2610 = vmatpush1.bf16.msra.mxu1 %v3981_v61  ;;  %3550 = vmatpush3.bf16.msra.mxu0 %v6056_v44  ;;  %v3985_v44 = vld [vmem:[%s5914_s4 + $0xa8] ss:$12 sps:$4 sm:$0xff]  }
 0x6a2   :  { %2611 = vmatprep.subr.bf16.mxu1 %v3982_v26  ;;  %3551 = vmatprep.subr.bf16.mxu0 %v6011_v18 }
 0x6a5   :  { %2612 = vmatpush1.bf16.msra.mxu1 %v3983_v29  ;;  %3552 = vmatpush3.bf16.msra.mxu0 %v6072_v37 }
 0x6a6   :  { %2613 = vmatprep.subr.bf16.mxu1 %v3984_v9  ;;  %3553 = vmatprep.subr.bf16.mxu0 %v6011_v18 }
 0x6a9   :  { %2614 = vmatpush1.bf16.msra.mxu1 %v3985_v44  ;;  %3554 = vmatpush3.bf16.msra.mxu0 %v6075_v42 }
 0x6aa   :  { %2709 = vmatprep.subr.bf16.mxu1 %v3986_v53  ;;  %3559 = vmatprep.subr.bf16.mxu0 %v6011_v18 }
 0x6fd   :  { %v2865_v37 = vpop.xlane.xlu0 %2864 }
 0x6fe   :  { %3852 = vrsqrt.f32 %v2865_v37  ;;  %vm2907_vm8 = vcmp.eq.f32.partialorder %v2865_v37, inf  ;;  %v2910_v17 = vand.u32 2147483648, %v2865_v37  ;;  %vm2909_vm10 = vcmp.eq.f32.partialorder %v2865_v37, 0.0 }
 0x708   :  { %v3853_v35 = vpop.eup %3852 }
 0x709   :  { %v2906_v20 = vmul.f32 %v3853_v35, %v2865_v37 }
 0x70b   :  { %v2908_v36 = vsel %vm2907_vm8, %v2865_v37, %v2906_v20 }
 0x70c   :  { %v2911_v55 = vsel %vm2909_vm10, %v2910_v17, %v2908_v36  ;;  %v6092_v36 = vld [vmem:[#allocation7_spill] sm:$0xff] }
 0x70d   :  { %v2931_v31 = vadd.f32 1e-08, %v2911_v55 }
 0x70f   :  { %3854 = vrcp.f32 %v2931_v31  ;;  %v1447_v31 = vsel %vm1445_vm14, %v6092_v36, 0.0 }
 0x719   :  { %v3855_v11 = vpop.eup %3854 }
 0x71a   :  { %v2947_v42 = vmul.f32 %v3855_v11, %v5635_v41  ;;  %v6087_v41 = vld [vmem:[#allocation30_spill] sm:$0xff] }
 0x71c   :  { %2955 = vst [vmem:[%s5919_s8 + $0x28] sm:$0xff] %v2947_v42 }
 0x71d   :  { %v2859_v48 = vpop.xlane.xlu0 %2858 }
 0x71e   :  { %3856 = vrsqrt.f32 %v2859_v48  ;;  %vm2886_vm12 = vcmp.eq.f32.partialorder %v2859_v48, inf  ;;  %v2889_v4 = vand.u32 2147483648, %v2859_v48  ;;  %vm2888_vm15 = vcmp.eq.f32.partialorder %v2859_v48, 0.0 }
 0x728   :  { %v3857_v19 = vpop.eup %3856 }
 0x729   :  { %v2885_v32 = vmul.f32 %v3857_v19, %v2859_v48 }
 0x72b   :  { %v2887_v13 = vsel %vm2886_vm12, %v2859_v48, %v2885_v32 }
 0x72c   :  { %v2890_v60 = vsel %vm2888_vm15, %v2889_v4, %v2887_v13  ;;  %v3987_v4 = vld [vmem:[%s5915_s6] ss:$12 sps:$4 sm:$0xff]   ;;  %v3989_v13 = vld [vmem:[%s5915_s6 + $0x1c] ss:$12 sps:$4 sm:$0xff]  }
 0x72d   :  { %v2928_v7 = vadd.f32 1e-08, %v2890_v60 }
 0x72f   :  { %3858 = vrcp.f32 %v2928_v7  ;;  %v3990_v7 = vld [vmem:[%s5915_s6 + $0x18] ss:$12 sps:$4 sm:$0xff]  }
 0x739   :  { %v3859_v2 = vpop.eup %3858 }
 0x73a   :  { %v2944_v50 = vmul.f32 %v3859_v2, %v5689_v0  ;;  %v3991_v2 = vld [vmem:[%s5915_s6 + $0x20] ss:$12 sps:$4 sm:$0xff]  }
 0x73c   :  { %2952 = vst [vmem:[%s5919_s8 + $0x10] sm:$0xff] %v2944_v50 }
 0x73f   :  { %v2409_v34 = vpop.f32.mrb[64].mxu1  ;;  %v2450_v39 = vpop.f32.mrb[80].mxu0 }
 0x740   :  { %v2456_v45 = vadd.f32 %v2409_v34, %v6087_v41  ;;  %v2411_v43 = vpop.f32.mrb[65].mxu1  ;;  %v3517_v14 = vpop.f32.mrb[81].mxu0  ;;  %v2470_v1 = vadd.f32 %v5461_v27, %v2450_v39  ;;  %v3992_v34 = vld [vmem:[%s5915_s6 + $0x34] ss:$12 sps:$4 sm:$0xff]   ;;  %v3993_v41 = vld [vmem:[%s5915_s6 + $0x30] ss:$12 sps:$4 sm:$0xff]  }
 0x741   :  { %v2463_v57 = vadd.f32 %v2411_v43, %v6088_v3  ;;  %v2413_v5 = vpop.f32.mrb[66].mxu1  ;;  %v2453_v8 = vpop.f32.mrb[82].mxu0  ;;  %v3995_v14 = vld [vmem:[%s5915_s6 + $0x4c] ss:$12 sps:$4 sm:$0xff]  }
 0x742   :  { %v3105_v10 = vmul.f32 -1.442695, %v2456_v45  ;;  %v2414_v12 = vpop.f32.mrb[67].mxu1  ;;  %v3518_v16 = vpop.f32.mrb[83].mxu0  ;;  %v3994_v45 = vld [vmem:[%s5915_s6 + $0x38] ss:$12 sps:$4 sm:$0xff]  }
 0x743   :  { %v3106_v21 = vmul.f32 -1.442695, %v2463_v57  ;;  %v6094_v3 = vld [vmem:[#allocation40_spill] sm:$0xff]  ;;  %v3996_v5 = vld [vmem:[%s5915_s6 + $0x48] ss:$12 sps:$4 sm:$0xff]  }
 0x744   :  { %3860 = vpow2.f32 %v3105_v10  ;;  %v3997_v8 = vld [vmem:[%s5915_s6 + $0x50] ss:$12 sps:$4 sm:$0xff]   ;;  %v3999_v12 = vld [vmem:[%s5915_s6 + $0x60] ss:$12 sps:$4 sm:$0xff]   ;;  %v4000_v16 = vld [vmem:[%s5915_s6 + $0x68] ss:$12 sps:$4 sm:$0xff]  }
 0x745   :  { %3862 = vpow2.f32 %v3106_v21  ;;  %v3998_v10 = vld [vmem:[%s5915_s6 + $0x64] ss:$12 sps:$4 sm:$0xff]   ;;  %v4001_v21 = vld [vmem:[%s5915_s6 + $0x7c] ss:$12 sps:$4 sm:$0xff]  }
 0x74e   :  { %v3861_v40 = vpop.eup %3860 }
 0x74f   :  { %v2460_v56 = vadd.f32 1.0, %v3861_v40  ;;  %v3863_v46 = vpop.eup %3862 }
 0x750   :  { %v2467_v47 = vadd.f32 1.0, %v3863_v46  ;;  %v4003_v46 = vld [vmem:[%s5915_s6 + $0x80] ss:$12 sps:$4 sm:$0xff]  }
 0x751   :  { %3864 = vrcp.f32 %v2460_v56  ;;  %v4002_v56 = vld [vmem:[%s5915_s6 + $0x78] ss:$12 sps:$4 sm:$0xff]  }
 0x752   :  { %3866 = vrcp.f32 %v2467_v47  ;;  %v4004_v47 = vld [vmem:[%s5915_s6 + $0x94] ss:$12 sps:$4 sm:$0xff]  }
 0x75b   :  { %v3865_v22 = vpop.eup %3864 }
 0x75c   :  { %v2471_v63 = vmul.f32 %v3865_v22, %v2470_v1  ;;  %v3867_v29 = vpop.eup %3866 }
 0x75d   :  { %v2474_v44 = vsub.f32 1.0, %v3867_v29  ;;  %v2476_v35 = vmul.f32 %v3867_v29, %v5626_v54 }
 0x75e   :  { %v2472_v52 = vadd.f32 %v2471_v63, %v6089_v51  ;;  %v4005_v63 = vld [vmem:[%s5915_s6 + $0x90] ss:$12 sps:$4 sm:$0xff]   ;;  %v4006_v51 = vld [vmem:[%s5915_s6 + $0x98] ss:$12 sps:$4 sm:$0xff]  }
 0x75f   :  { %v2521_v0 = vpop.f32.mrb[68].mxu1  ;;  %v2562_v38 = vpop.f32.mrb[84].mxu0 }
 0x760   :  { %3868 = vtanh.f32 %v2472_v52  ;;  %v2568_v58 = vadd.f32 %v2521_v0, %v6090_v15  ;;  %v2523_v30 = vpop.f32.mrb[69].mxu1  ;;  %v3537_v24 = vpop.f32.mrb[85].mxu0 }
 0x761   :  { %v2575_v49 = vadd.f32 %v2523_v30, %v6091_v25  ;;  %v2525_v62 = vpop.f32.mrb[70].mxu1  ;;  %v2565_v33 = vpop.f32.mrb[86].mxu0  ;;  %v4009_v30 = vld [vmem:[%s5915_s6 + $0xb0] ss:$12 sps:$4 sm:$0xff]  }
 0x762   :  { %v3108_v23 = vmul.f32 -1.442695, %v2568_v58  ;;  %v2526_v61 = vpop.f32.mrb[71].mxu1  ;;  %v3538_v26 = vpop.f32.mrb[87].mxu0  ;;  %v4008_v58 = vld [vmem:[%s5915_s6 + $0xa8] ss:$12 sps:$4 sm:$0xff]  }
 0x763   :  { %v3109_v9 = vmul.f32 -1.442695, %v2575_v49 }
 0x764   :  { %3870 = vpow2.f32 %v3108_v23 }
 0x765   :  { %3872 = vpow2.f32 %v3109_v9 }
 0x76a   :  { %v3869_v53 = vpop.eup %3868 }
 0x76b   :  { %v2475_v37 = vmul.f32 %v3869_v53, %v2474_v44 }
 0x76d   :  { %v2477_v20 = vadd.f32 %v2476_v35, %v2475_v37 }
 0x76e   :  { %v3871_v17 = vpop.eup %3870 }
 0x76f   :  { %v2572_v11 = vadd.f32 1.0, %v3871_v17  ;;  %v5779_v42 = vsel %vm1445_vm14, %v2477_v20, %v5626_v54  ;;  %v2479_v48 = vsel %vm1445_vm14, %v2477_v20, 0.0  ;;  %v3988_v54 = vld [vmem:[%s5915_s6 + $0x8] ss:$12 sps:$4 sm:$0xff]   ;;  %v3873_v60 = vpop.eup %3872 }
 0x770   :  { %v2598_v19 = vpack.c.bf16 %v5779_v42, %v5779_v42  ;;  %v5785_v32 = vadd.f32 %v2479_v48, %v1447_v31  ;;  %v2579_v50 = vadd.f32 1.0, %v3873_v60 }
 0x771   :  { %3874 = vrcp.f32 %v2572_v11 }
 0x772   :  { %2632 = vmatmul.mubr.bf16.vlgmr.msra.gmra.mrb[72].mxu1 %v2598_v19  ;;  %3556 = vmatmul.mubr.bf16.vlgmr.msra.gmra.mrb[88].mxu0 %v2598_v19  ;;  %3876 = vrcp.f32 %v2579_v50  ;;  %v2844_v26 = vmul.f32 0.5, %v5785_v32 }
 0x773   :  { %2710 = vmatpush1.bf16.msra.mxu1 %v3987_v4  ;;  %3560 = vmatpush3.bf16.msra.mxu0 %v3988_v54 }
 0x774   :  { %2711 = vmatprep.subr.bf16.mxu1 %v3989_v13  ;;  %3561 = vmatprep.subr.bf16.mxu0 %v6011_v18 }
 0x775   :  { %2741 = vmatprep.mubr.bf16.mxu1 %v6012_v6  ;;  %3575 = vmatprep.mubr.msk.bf16.mxu0 %vm4012_vm4, %v6011_v18  ;;  %v2582_v6 = vadd.f32 %v5498_v28, %v2562_v38  ;;  %v4007_v38 = vld [vmem:[%s5915_s6 + $0xac] ss:$12 sps:$4 sm:$0xff]  }
 0x777   :  { %2712 = vmatpush1.bf16.msra.mxu1 %v3990_v7  ;;  %3562 = vmatpush3.bf16.msra.mxu0 %v3991_v2  ;;  %v6096_v2 = vld [vmem:[#allocation34_spill] sm:$0xff] }
 0x778   :  { %2713 = vmatprep.subr.bf16.mxu1 %v3992_v34  ;;  %3563 = vmatprep.subr.bf16.mxu0 %v6011_v18 }
 0x77b   :  { %v3875_v39 = vpop.eup %3874  ;;  %2714 = vmatpush1.bf16.msra.mxu1 %v3993_v41  ;;  %3564 = vmatpush3.bf16.msra.mxu0 %v3994_v45 }
 0x77c   :  { %v2583_v43 = vmul.f32 %v3875_v39, %v2582_v6  ;;  %2715 = vmatprep.subr.bf16.mxu1 %v3995_v14  ;;  %3565 = vmatprep.subr.bf16.mxu0 %v6011_v18  ;;  %v3877_v40 = vpop.eup %3876  ;;  %v6097_v39 = vld [vmem:[#allocation36_spill] sm:$0xff] }
 0x77d   :  { %v2586_v1 = vsub.f32 1.0, %v3877_v40  ;;  %v2588_v0 = vmul.f32 %v3877_v40, %v5681_v59 }
 0x77e   :  { %v2584_v57 = vadd.f32 %v2583_v43, %v6094_v3 }
 0x77f   :  { %2716 = vmatpush1.bf16.msra.mxu1 %v3996_v5  ;;  %3566 = vmatpush3.bf16.msra.mxu0 %v3997_v8 }
 0x780   :  { %3878 = vtanh.f32 %v2584_v57  ;;  %2717 = vmatprep.subr.bf16.mxu1 %v3998_v10  ;;  %3567 = vmatprep.subr.bf16.mxu0 %v6011_v18 }
 0x783   :  { %2718 = vmatpush1.bf16.msra.mxu1 %v3999_v12  ;;  %3568 = vmatpush3.bf16.msra.mxu0 %v4000_v16 }
 0x784   :  { %2719 = vmatprep.subr.bf16.mxu1 %v4001_v21  ;;  %3569 = vmatprep.subr.bf16.mxu0 %v6011_v18 }
 0x787   :  { %2720 = vmatpush1.bf16.msra.mxu1 %v4002_v56  ;;  %3570 = vmatpush3.bf16.msra.mxu0 %v4003_v46  ;;  %v6098_v46 = vld [vmem:[#allocation35_spill] sm:$0xff] }
 0x788   :  { %2721 = vmatprep.subr.bf16.mxu1 %v4004_v47  ;;  %3571 = vmatprep.subr.bf16.mxu0 %v6011_v18 }
 0x78a   :  { %v3879_v22 = vpop.eup %3878 }
 0x78b   :  { %2722 = vmatpush1.bf16.msra.mxu1 %v4005_v63  ;;  %3572 = vmatpush3.bf16.msra.mxu0 %v4006_v51  ;;  %v2587_v52 = vmul.f32 %v3879_v22, %v2586_v1  ;;  %v6099_v63 = vld [vmem:[#allocation9_spill] sm:$0xff] }
 0x78c   :  { %2723 = vmatprep.subr.bf16.mxu1 %v4007_v38  ;;  %3573 = vmatprep.subr.bf16.mxu0 %v6011_v18  ;;  %v2815_v18 = vld [vmem:[%s5919_s8 + $0x8] sm:$0xff]  ;;  %v6100_v38 = vld [vmem:[#allocation37_spill] sm:$0xff] }
 0x78d   :  { %v2589_v15 = vadd.f32 %v2588_v0, %v2587_v52 }
 0x78f   :  { %2724 = vmatpush1.bf16.msra.mxu1 %v4008_v58  ;;  %3574 = vmatpush3.bf16.msra.mxu0 %v4009_v30  ;;  %v5872_v25 = vsel %vm1327_vm13, %v2589_v15, %v5681_v59  ;;  %v2591_v49 = vsel %vm1327_vm13, %v2589_v15, 0.0  ;;  %v2852_v59 = vmul.f32 %v2844_v26, %v2844_v26 }
 0x790   :  { %v2708_v62 = vpack.c.bf16 %v5872_v25, %v5872_v25  ;;  %v2831_v33 = vadd.f32 %v2815_v18, %v2591_v49 }
 0x792   :  { %2742 = vmatmul.mubr.bf16.vlgmr.msra.gmra.mrb[76].mxu1 %v2708_v62  ;;  %3576 = vmatmul.mubr.bf16.vlgmr.msra.gmra.mrb[92].mxu0 %v2708_v62  ;;  %v2839_v23 = vmul.f32 0.5, %v2831_v33 }
 0x794   :  { %v2847_v61 = vmul.f32 %v2839_v23, %v2839_v23 }
 0x796   :  { %2856 = vadd.xlane.f32.xlu1 %v2847_v61 }
 0x79a   :  { %2866 = vadd.xlane.f32.xlu1 %v2852_v59 }
 0x823   :  { %v2857_v29 = vpop.xlane.xlu1 %2856 }
 0x824   :  { %3880 = vrsqrt.f32 %v2857_v29  ;;  %vm2879_vm4 = vcmp.eq.f32.partialorder %v2857_v29, inf  ;;  %v2882_v37 = vand.u32 2147483648, %v2857_v29  ;;  %vm2881_vm13 = vcmp.eq.f32.partialorder %v2857_v29, 0.0 }
 0x827   :  { %v2867_v9 = vpop.xlane.xlu1 %2866 }
 0x828   :  { %3882 = vrsqrt.f32 %v2867_v9  ;;  %vm2914_vm14 = vcmp.eq.f32.partialorder %v2867_v9, inf  ;;  %v2917_v31 = vand.u32 2147483648, %v2867_v9  ;;  %vm2916_vm0 = vcmp.eq.f32.partialorder %v2867_v9, 0.0 }
 0x82e   :  { %v3881_v44 = vpop.eup %3880 }
 0x82f   :  { %v2878_v53 = vmul.f32 %v3881_v44, %v2857_v29 }
 0x831   :  { %v2880_v35 = vsel %vm2879_vm4, %v2857_v29, %v2878_v53 }
 0x832   :  { %v3883_v20 = vpop.eup %3882  ;;  %v2883_v17 = vsel %vm2881_vm13, %v2882_v37, %v2880_v35 }
 0x833   :  { %v2927_v36 = vadd.f32 1e-08, %v2883_v17  ;;  %v2913_v55 = vmul.f32 %v3883_v20, %v2867_v9  ;;  %v6101_v17 = vld [vmem:[#allocation38_spill] sm:$0xff] }
 0x835   :  { %3884 = vrcp.f32 %v2927_v36  ;;  %v2915_v11 = vsel %vm2914_vm14, %v2867_v9, %v2913_v55 }
 0x836   :  { %v2918_v48 = vsel %vm2916_vm0, %v2917_v31, %v2915_v11 }
 0x837   :  { %v2932_v19 = vadd.f32 1e-08, %v2918_v48 }
 0x839   :  { %3886 = vrcp.f32 %v2932_v19 }
 0x83f   :  { %v3885_v32 = vpop.eup %3884 }
 0x840   :  { %v2943_v4 = vmul.f32 %v3885_v32, %v2839_v23 }
 0x842   :  { %2951 = vst [vmem:[%s5919_s8 + $0x8] sm:$0xff] %v2943_v4 }
 0x843   :  { %v3887_v54 = vpop.eup %3886 }
 0x844   :  { %v2948_v13 = vmul.f32 %v3887_v54, %v2844_v26 }
 0x845   :  { %v2633_v60 = vpop.f32.mrb[72].mxu1  ;;  %v2674_v7 = vpop.f32.mrb[88].mxu0 }
 0x846   :  { %2956 = vst [vmem:[%s5919_s8 + $0x30] sm:$0xff] %v2948_v13  ;;  %v2680_v50 = vadd.f32 %v2633_v60, %v6096_v2  ;;  %v2635_v34 = vpop.f32.mrb[73].mxu1  ;;  %v3557_v6 = vpop.f32.mrb[89].mxu0  ;;  %v2694_v21 = vadd.f32 %v5461_v27, %v2674_v7  ;;  %v6104_v7 = vld [vmem:[#allocation6_spill] sm:$0xff] }
 0x847   :  { %v2687_v41 = vadd.f32 %v2635_v34, %v6097_v39  ;;  %v2637_v45 = vpop.f32.mrb[74].mxu1  ;;  %v2677_v43 = vpop.f32.mrb[90].mxu0 }
 0x848   :  { %v3110_v14 = vmul.f32 -1.442695, %v2680_v50  ;;  %v2638_v3 = vpop.f32.mrb[75].mxu1  ;;  %v3558_v57 = vpop.f32.mrb[91].mxu0 }
 0x849   :  { %v3111_v5 = vmul.f32 -1.442695, %v2687_v41 }
 0x84a   :  { %3888 = vpow2.f32 %v3110_v14 }
 0x84b   :  { %3890 = vpow2.f32 %v3111_v5 }
 0x854   :  { %v3889_v8 = vpop.eup %3888 }
 0x855   :  { %v2684_v10 = vadd.f32 1.0, %v3889_v8  ;;  %v3891_v12 = vpop.eup %3890 }
 0x856   :  { %v2691_v16 = vadd.f32 1.0, %v3891_v12 }
 0x857   :  { %3892 = vrcp.f32 %v2684_v10 }
 0x858   :  { %3894 = vrcp.f32 %v2691_v16 }
 0x861   :  { %v3893_v40 = vpop.eup %3892 }
 0x862   :  { %v2695_v56 = vmul.f32 %v3893_v40, %v2694_v21  ;;  %v3895_v27 = vpop.eup %3894 }
 0x863   :  { %v2698_v33 = vsub.f32 1.0, %v3895_v27  ;;  %v2700_v26 = vmul.f32 %v3895_v27, %v5779_v42 }
 0x864   :  { %v2696_v47 = vadd.f32 %v2695_v56, %v6098_v46 }
 0x865   :  { %v2743_v1 = vpop.f32.mrb[76].mxu1  ;;  %v2784_v22 = vpop.f32.mrb[92].mxu0 }
 0x866   :  { %3896 = vtanh.f32 %v2696_v47  ;;  %v2790_v51 = vadd.f32 %v2743_v1, %v6099_v63  ;;  %v2745_v52 = vpop.f32.mrb[77].mxu1  ;;  %v3577_v0 = vpop.f32.mrb[93].mxu0  ;;  %v2804_v37 = vadd.f32 %v5498_v28, %v2784_v22  ;;  %v2814_v28 = vld [vmem:[%s5919_s8] sm:$0xff] }
 0x867   :  { %v2797_v15 = vadd.f32 %v2745_v52, %v6100_v38  ;;  %v2747_v58 = vpop.f32.mrb[78].mxu1  ;;  %v2787_v30 = vpop.f32.mrb[94].mxu0 }
 0x868   :  { %v3113_v24 = vmul.f32 -1.442695, %v2790_v51  ;;  %v2748_v49 = vpop.f32.mrb[79].mxu1  ;;  %v3578_v18 = vpop.f32.mrb[95].mxu0 }
 0x869   :  { %v3114_v62 = vmul.f32 -1.442695, %v2797_v15 }
 0x86a   :  { %3898 = vpow2.f32 %v3113_v24 }
 0x86b   :  { %3900 = vpow2.f32 %v3114_v62 }
 0x870   :  { %v3897_v23 = vpop.eup %3896 }
 0x871   :  { %v2699_v61 = vmul.f32 %v3897_v23, %v2698_v33 }
 0x873   :  { %v2701_v59 = vadd.f32 %v2700_v26, %v2699_v61 }
 0x874   :  { %v3899_v29 = vpop.eup %3898 }
 0x875   :  { %v2794_v9 = vadd.f32 1.0, %v3899_v29  ;;  %v3901_v44 = vpop.eup %3900  ;;  %v2702_v32 = vsel %vm1210_vm11, %v2701_v59, 0.0 }
 0x876   :  { %v2801_v53 = vadd.f32 1.0, %v3901_v44  ;;  %v2837_v2 = vadd.f32 %v2702_v32, %v6104_v7 }
 0x877   :  { %3902 = vrcp.f32 %v2794_v9 }
 0x878   :  { %3904 = vrcp.f32 %v2801_v53  ;;  %v2845_v6 = vmul.f32 0.5, %v2837_v2 }
 0x87a   :  { %v2853_v39 = vmul.f32 %v2845_v6, %v2845_v6 }
 0x881   :  { %v3903_v35 = vpop.eup %3902 }
 0x882   :  { %v2805_v20 = vmul.f32 %v3903_v35, %v2804_v37  ;;  %v3905_v55 = vpop.eup %3904 }
 0x883   :  { %v2808_v31 = vsub.f32 1.0, %v3905_v55  ;;  %v2810_v42 = vmul.f32 %v3905_v55, %v5872_v25 }
 0x884   :  { %v2806_v36 = vadd.f32 %v2805_v20, %v6101_v17 }
 0x886   :  { %3906 = vtanh.f32 %v2806_v36 }
 0x890   :  { %v3907_v11 = vpop.eup %3906 }
 0x891   :  { %v2809_v48 = vmul.f32 %v3907_v11, %v2808_v31 }
 0x893   :  { %v2811_v4 = vadd.f32 %v2810_v42, %v2809_v48 }
 0x895   :  { %v2812_v13 = vsel %vm967_vm9, %v2811_v4, 0.0 }
 0x896   :  { %v2830_v60 = vadd.f32 %v2814_v28, %v2812_v13 }
 0x898   :  { %v2838_v50 = vmul.f32 0.5, %v2830_v60 }
 0x89a   :  { %v2846_v34 = vmul.f32 %v2838_v50, %v2838_v50 }
 0x89c   :  { %2854 = vadd.xlane.f32.xlu0 %v2846_v34 }
 0x8a0   :  { %2868 = vadd.xlane.f32.xlu0 %v2853_v39 }
 0x929   :  { %v2855_v25 = vpop.xlane.xlu0 %2854 }
 0x92a   :  { %3908 = vrsqrt.f32 %v2855_v25  ;;  %vm2872_vm9 = vcmp.eq.f32.partialorder %v2855_v25, inf  ;;  %v2875_v14 = vand.u32 2147483648, %v2855_v25  ;;  %vm2874_vm11 = vcmp.eq.f32.partialorder %v2855_v25, 0.0 }
 0x92d   :  { %v2869_v41 = vpop.xlane.xlu0 %2868 }
 0x92e   :  { %3910 = vrsqrt.f32 %v2869_v41  ;;  %vm2921_vm1 = vcmp.eq.f32.partialorder %v2869_v41, inf  ;;  %v2924_v12 = vand.u32 2147483648, %v2869_v41  ;;  %vm2923_vm2 = vcmp.eq.f32.partialorder %v2869_v41, 0.0 }
 0x934   :  { %v3909_v45 = vpop.eup %3908 }
 0x935   :  { %v2871_v43 = vmul.f32 %v3909_v45, %v2855_v25 }
 0x937   :  { %v2873_v3 = vsel %vm2872_vm9, %v2855_v25, %v2871_v43 }
 0x938   :  { %v3911_v57 = vpop.eup %3910  ;;  %v2876_v5 = vsel %vm2874_vm11, %v2875_v14, %v2873_v3 }
 0x939   :  { %v2926_v8 = vadd.f32 1e-08, %v2876_v5  ;;  %v2920_v10 = vmul.f32 %v3911_v57, %v2869_v41 }
 0x93b   :  { %3912 = vrcp.f32 %v2926_v8  ;;  %v2922_v16 = vsel %vm2921_vm1, %v2869_v41, %v2920_v10 }
 0x93c   :  { %v2925_v21 = vsel %vm2923_vm2, %v2924_v12, %v2922_v16 }
 0x93d   :  { %v2933_v40 = vadd.f32 1e-08, %v2925_v21 }
 0x93f   :  { %3914 = vrcp.f32 %v2933_v40 }
 0x945   :  { %v3913_v56 = vpop.eup %3912 }
 0x946   :  { %v2942_v46 = vmul.f32 %v3913_v56, %v2838_v50 }
 0x948   :  { %2950 = vst [vmem:[%s5919_s8] sm:$0xff] %v2942_v46 }
 0x949   :  { %v3915_v47 = vpop.eup %3914 }
 0x94a   :  { %v2949_v1 = vmul.f32 %v3915_v47, %v2845_v6 }
 0x94c   :  { %2957 = vst [vmem:[%s5919_s8 + $0x38] sm:$0xff] %v2949_v1 }

</bundles_post_ra>
